<compile_context>
chip_gen: v5e
topology: v5e:2x2
jax: 0.10.0
libtpu: 0.0.40
codegen_flags: <defaults>
</compile_context>

<pallas_src>
import functools
import numpy as np

import jax
import jax.numpy as jnp
from jax import lax
from jax.experimental import pallas as pl
from jax.experimental.pallas import tpu as pltpu


# ----------------------------------------------------------------------------
# Small helpers: block sizing + compiler params.
# ----------------------------------------------------------------------------
def _round_up(x, m):
    return ((x + m - 1) // m) * m


def _pick_block(n, target, align):
    """Largest block <= target (multiple of `align`); keeps >=2 grid steps when the
    batch allows so v7x's two TensorCores both get work."""
    n_al = _round_up(max(n, 1), align)
    bb = min(_round_up(target, align), n_al)
    if bb >= n_al and n_al >= 2 * align:
        bb = _round_up(n_al // 2, align)
    return bb


def _mosaic_params(semantics, block_bytes):
    # double-buffered per-step footprint + headroom, clamped for v7x's 64 MiB physical VMEM
    limit = int(min(max(2 * block_bytes + (8 << 20), 16 << 20), 48 << 20))
    return pltpu.CompilerParams(dimension_semantics=semantics, vmem_limit_bytes=limit)


# ----------------------------------------------------------------------------
# Kernel 1: bidirectional LSTM, final hidden state of each direction.
# x is time-major (T, BB, E) bf16; lens is (BB, 1) int32.
# Per direction the 4 gates (PyTorch order i, f, g, o) are packed along lanes:
#   wih (E, 4H) bf16, whh (H, 4H) bf16, b (1, 4H) f32 with b = b_ih + b_hh.
# Output block is a single lane-dense (BB, 2H) slab: [fwd final || bwd final].
# ----------------------------------------------------------------------------
def bilstm_kernel(x_ref, lens_ref, wih_f_ref, whh_f_ref, b_f_ref,
                  wih_b_ref, whh_b_ref, b_b_ref, out_ref):
    T, BB, _ = x_ref.shape
    H4 = wih_f_ref.shape[-1]
    H = H4 // 4

    # Weights arrive pre-cast to bf16 from glue; biases stay f32 and are broadcast
    # ONCE (JAX does not CSE broadcast_in_dim inside the unrolled time loop).
    wih_f = wih_f_ref[...]
    whh_f = whh_f_ref[...]
    wih_b = wih_b_ref[...]
    whh_b = whh_b_ref[...]
    b_f = jnp.broadcast_to(b_f_ref[...], (BB, H4))
    b_b = jnp.broadcast_to(b_b_ref[...], (BB, H4))
    lens = lens_ref[...]                                      # (BB, 1) int32

    def cell(x_t, keep, h, c, wih, whh, b):
        # fused 4-gate matmul pair (MXU), f32 accumulate
        gates = (jnp.dot(x_t, wih, preferred_element_type=jnp.float32)
                 + jnp.dot(h.astype(jnp.bfloat16), whh, preferred_element_type=jnp.float32)
                 + b)                                         # (BB, 4H), gate order i,f,g,o
        sg = jax.nn.sigmoid(gates)                            # full-width EUP work, slice once
        th = jnp.tanh(gates)
        i, f, o = sg[:, 0:H], sg[:, H:2 * H], sg[:, 3 * H:4 * H]
        g = th[:, 2 * H:3 * H]
        c_new = f * c + i * g
        h_new = o * jnp.tanh(c_new)
        # emulate pack_padded_sequence: frozen state past each sequence's length
        return jnp.where(keep, h_new, h), jnp.where(keep, c_new, c)

    def step(k, carry):
        # Interleave the two independent direction chains so MXU/EUP/VPU co-issue.
        h_f, c_f, h_b, c_b = carry
        t_b = T - 1 - k
        h_f, c_f = cell(x_ref[k], lens > k, h_f, c_f, wih_f, whh_f, b_f)
        h_b, c_b = cell(x_ref[t_b], lens > t_b, h_b, c_b, wih_b, whh_b, b_b)
        return (h_f, c_f, h_b, c_b)

    z = jnp.zeros((BB, H), jnp.float32)
    h_f, _, h_b, _ = lax.fori_loop(0, T, step, (z, z, z, z), unroll=True)
    # single lane-dense store == h_n.permute(1,0,2).reshape(B, 2H)  ([fwd || bwd] per row)
    out_ref[...] = jnp.concatenate([h_f, h_b], axis=-1)


def bilstm_encode(x_tbe_bf16, lens_b1, lstm_p, *, block_b=256):
    T, B, E = x_tbe_bf16.shape
    H4 = lstm_p["b_f"].shape[-1]
    H = H4 // 4
    bb = _pick_block(B, block_b, align=16)                    # bf16 blocks: 16-sublane align
    b_pad = _round_up(B, bb)

    x = x_tbe_bf16
    lens = lens_b1.astype(jnp.int32)
    if b_pad != B:
        x = jnp.pad(x, ((0, 0), (0, b_pad - B), (0, 0)))
        lens = jnp.pad(lens, ((0, b_pad - B), (0, 0)))        # padded rows: len 0 -> h stays 0

    block_bytes = (T * bb * E * 2 + bb * 4                    # x + lens blocks
                   + 2 * (E * H4 + H * H4) * 2 + 2 * H4 * 4   # weights + biases
                   + bb * 2 * H * 4)                          # output block
    out = pl.pallas_call(
        bilstm_kernel,
        out_shape=jax.ShapeDtypeStruct((b_pad, 2 * H), jnp.float32),
        grid=(b_pad // bb,),
        in_specs=[
            pl.BlockSpec((T, bb, E), lambda b: (0, b, 0)),
            pl.BlockSpec((bb, 1), lambda b: (b, 0)),
            pl.BlockSpec((E, H4), lambda b: (0, 0)),
            pl.BlockSpec((H, H4), lambda b: (0, 0)),
            pl.BlockSpec((1, H4), lambda b: (0, 0)),
            pl.BlockSpec((E, H4), lambda b: (0, 0)),
            pl.BlockSpec((H, H4), lambda b: (0, 0)),
            pl.BlockSpec((1, H4), lambda b: (0, 0)),
        ],
        out_specs=pl.BlockSpec((bb, 2 * H), lambda b: (b, 0)),
        compiler_params=_mosaic_params(("parallel",), block_bytes),
    )(x, lens, lstm_p["wih_f"], lstm_p["whh_f"], lstm_p["b_f"],
      lstm_p["wih_b"], lstm_p["whh_b"], lstm_p["b_b"])
    return out[:B]                                            # (B, 2H), no wrapper transpose


# ----------------------------------------------------------------------------
# Kernel 2: Conv1d (valid, stride 1) + ReLU + max over output length.
# x is length-major (A_max, bb_e, Cin) bf16 so every slice is a leading-dim index;
# the K shifted rows are concatenated along lanes -> one (bb_e, K*Cin)x(K*Cin, Cout)
# MXU matmul per output position, fused with a running max (no im2col duplication).
# Note: the max over length includes zero-padded positions, matching the padded
# reference behavior (ReLU(bias) from padding can win the max).
# ----------------------------------------------------------------------------
def conv_relu_max_kernel(x_ref, w_ref, b_ref, out_ref, *, k_size, l_out):
    w = w_ref[...]                                            # (K*Cin, Cout) bf16
    b = b_ref[...]                                            # (1, Cout) f32

    def window(l):
        return jnp.concatenate([x_ref[l + k] for k in range(k_size)], axis=-1)

    res = jnp.maximum(jnp.dot(window(0), w, preferred_element_type=jnp.float32) + b, 0.0)
    for l in range(1, l_out):                                 # small static loop, VPU running max
        y = jnp.dot(window(l), w, preferred_element_type=jnp.float32) + b
        res = jnp.maximum(res, jnp.maximum(y, 0.0))
    out_ref[...] = res                                        # (bb_e, Cout) lane-dense store


def conv_relu_max(x_aec_bf16, w_kio, b_1o, *, block_e=256):
    A, E_tot, Cin = x_aec_bf16.shape                          # length-major input
    K, _, Cout = w_kio.shape
    Lout = A - K + 1                                          # >= 1 (padded to >= K upstream)
    bb = _pick_block(E_tot, block_e, align=16)
    e_pad = _round_up(E_tot, bb)
    x = x_aec_bf16
    if e_pad != E_tot:
        x = jnp.pad(x, ((0, 0), (0, e_pad - E_tot), (0, 0)))
    w_flat = w_kio.reshape(K * Cin, Cout).astype(jnp.bfloat16)

    block_bytes = A * bb * Cin * 2 + K * Cin * Cout * 2 + Cout * 4 + bb * Cout * 4
    out = pl.pallas_call(
        functools.partial(conv_relu_max_kernel, k_size=K, l_out=Lout),
        out_shape=jax.ShapeDtypeStruct((e_pad, Cout), jnp.float32),
        grid=(e_pad // bb,),
        in_specs=[
            pl.BlockSpec((A, bb, Cin), lambda i: (0, i, 0)),
            pl.BlockSpec((K * Cin, Cout), lambda i: (0, 0)),
            pl.BlockSpec((1, Cout), lambda i: (0, 0)),
        ],
        out_specs=pl.BlockSpec((bb, Cout), lambda i: (i, 0)),
        compiler_params=_mosaic_params(("parallel",), block_bytes),
    )(x, w_flat, b_1o)
    return out[:E_tot]


# ----------------------------------------------------------------------------
# Kernel 3: multi-head graph attention (dense batched adjacency), one doc per grid step.
# Inputs per step: h (1, N, F) bf16, adj (1, N, N) f32, W stacked over heads (F, heads*Dh)
# bf16, and a block-diagonal [a_src | a_dst] matrix (heads*Dh, 2*heads) f32 so ALL heads'
# attention scores come from a single matmul (no 1-lane matvecs, no wide transposes).
# ----------------------------------------------------------------------------
def gat_kernel(h_ref, adj_ref, w_ref, a_ref, out_ref, *, heads, dh):
    h = h_ref[0]                                              # (N, F) bf16
    adj = adj_ref[0]                                          # (N, N) f32
    wh = jnp.dot(h, w_ref[...], preferred_element_type=jnp.float32)   # (N, heads*Dh), all heads
    wh_bf = wh.astype(jnp.bfloat16)

    scores = jnp.dot(wh, a_ref[...], preferred_element_type=jnp.float32)  # (N, 2*heads)
    s_all = scores[:, 0:heads]                                # (N, heads)  src scores
    d_all_t = scores[:, heads:2 * heads].T                    # (heads, N)  one tiny transpose

    outs = []
    for hd in range(heads):                                   # heads is small and static
        e = s_all[:, hd:hd + 1] + d_all_t[hd:hd + 1, :]       # (N, N) attention logits
        e = jnp.where(e > 0, e, 0.1 * e)                      # LeakyReLU(alpha=0.1)
        e = jnp.where(adj > 0, e, -9e15)                      # adjacency mask
        e = e - jnp.max(e, axis=1, keepdims=True)
        p = jnp.exp(e)
        attn = p / jnp.sum(p, axis=1, keepdims=True)          # exact softmax (reference parity)
        outs.append(jnp.dot(attn.astype(jnp.bfloat16), wh_bf[:, hd * dh:(hd + 1) * dh],
                            preferred_element_type=jnp.float32))        # (N, Dh)
    o = jnp.concatenate(outs, axis=-1)                        # one lane-dense (N, heads*Dh)
    out_ref[0] = jnp.where(o > 0, o, jnp.exp(o) - 1.0)        # ELU, single wide store


def gat_layer(h_bnf, adj_bnn, w_stacked_bf16, a_att):
    B, N, F = h_bnf.shape
    Dout, two_heads = a_att.shape
    heads = two_heads // 2
    dh = Dout // heads
    block_bytes = (N * F * 2 + N * N * 4 + F * Dout * 2 + Dout * two_heads * 4 + N * Dout * 4)
    # TODO(synk): at production N pass adj as int8 to cut the largest per-step DMA 4x.
    out = pl.pallas_call(
        functools.partial(gat_kernel, heads=heads, dh=dh),
        out_shape=jax.ShapeDtypeStruct((B, N, Dout), jnp.float32),
        grid=(B,),
        in_specs=[
            pl.BlockSpec((1, N, F), lambda b: (b, 0, 0)),
            pl.BlockSpec((1, N, N), lambda b: (b, 0, 0)),
            pl.BlockSpec((F, Dout), lambda b: (0, 0)),
            pl.BlockSpec((Dout, two_heads), lambda b: (0, 0)),
        ],
        out_specs=pl.BlockSpec((1, N, Dout), lambda b: (b, 0, 0)),
        compiler_params=_mosaic_params(("parallel",), block_bytes),
    )(h_bnf.astype(jnp.bfloat16), adj_bnn, w_stacked_bf16, a_att)
    return out


# ----------------------------------------------------------------------------
# Glue helpers (embedding lookup, split/pad, node gather, parameter repack).
# ----------------------------------------------------------------------------
def split_and_pad(x, sizes, min_len=1, length_major=False):
    """torch.split + pad_sequence(batch_first=True) as ONE gather (zero row prepended).
    min_len guards Conv1d against groups shorter than the kernel size.
    length_major=True returns (max_n, len(sizes), C) so kernels only slice the length
    axis with leading-dim indices (no in-kernel relayouts, no im2col duplication)."""
    max_n = max(max(sizes), min_len)
    idx = np.zeros((len(sizes), max_n), dtype=np.int32)       # 0 -> prepended zero row
    off = 0
    for i, n in enumerate(sizes):
        idx[i, :n] = np.arange(off + 1, off + n + 1)
        off += n
    if length_major:
        idx = idx.T
    x_pad = jnp.concatenate([jnp.zeros((1, x.shape[-1]), x.dtype), x], axis=0)
    return x_pad[jnp.asarray(idx)]


def pack_gates(w_4xh):
    """(4, In, H) per-gate (PyTorch order i,f,g,o) -> (In, 4H) lane-packed."""
    g4, inner, h = w_4xh.shape
    return jnp.transpose(w_4xh, (1, 0, 2)).reshape(inner, g4 * h)


def build_att_matrix(a_src, a_dst):
    """(heads, Dh, 1) src/dst vectors -> block-diagonal (heads*Dh, 2*heads) matrix so all
    heads' attention scores come from ONE (N, heads*Dh) x (heads*Dh, 2*heads) matmul."""
    heads, dh, _ = a_src.shape
    eye = jnp.eye(heads, dtype=a_src.dtype)
    src = (a_src[:, :, 0][:, :, None] * eye[:, None, :]).reshape(heads * dh, heads)
    dst = (a_dst[:, :, 0][:, :, None] * eye[:, None, :]).reshape(heads * dh, heads)
    return jnp.concatenate([src, dst], axis=-1)


def rela_triple_enc_forward(params, entity_attrs, attrs_nums, entity_attr_lens,
                            kg_adj, entity_doc_nodeid):
    batch_size = entity_doc_nodeid.shape[0]
    entity_nums = [len(a) for a in attrs_nums]
    attrs_flat = [n for a in attrs_nums for n in a]
    K = params["conv_w"].shape[0]
    bf16 = jnp.bfloat16

    # Kernel-layout parameter repack (glue).  NOTE: when loading real PyTorch weights,
    # each packed bias must equal b_ih + b_hh and weights are W^T per gate.
    lstm_p = {
        "wih_f": pack_gates(params["wih_f"]).astype(bf16),
        "whh_f": pack_gates(params["whh_f"]).astype(bf16),
        "b_f": pack_gates(params["b_f"]),
        "wih_b": pack_gates(params["wih_b"]).astype(bf16),
        "whh_b": pack_gates(params["whh_b"]).astype(bf16),
        "b_b": pack_gates(params["b_b"]),
    }

    # ---- Attr_triple_enc ----
    # Gather embeddings directly into time-major bf16 (no separate HBM transpose pass).
    embedded_tbe = params["emb"][jnp.transpose(entity_attrs)].astype(bf16)   # (T, B_attr, EMB)
    encoded_attr_hiddens = bilstm_encode(embedded_tbe, entity_attr_lens, lstm_p)   # (B_attr, 2H)

    padded_attr = split_and_pad(encoded_attr_hiddens, attrs_flat, min_len=K,
                                length_major=True).astype(bf16)              # (A_max, E_tot, C)
    entity_hiddens = conv_relu_max(padded_attr, params["conv_w"], params["conv_b"])   # (E_tot, C)
    attr_hiddens = split_and_pad(entity_hiddens, entity_nums)                # (B, N_max, C)

    # ---- SpGAT (substituted dense multi-head GAT) ----
    gat_w = params["gat_w"]                                   # (heads, C, Dh)
    w_stacked = jnp.transpose(gat_w, (1, 0, 2)).reshape(gat_w.shape[1], -1).astype(bf16)
    a_att = build_att_matrix(params["gat_a_src"], params["gat_a_dst"])       # (heads*Dh, 2*heads)
    ent_kg_hiddens = gat_layer(attr_hiddens, kg_adj, w_stacked, a_att)

    # ---- node-id gather with zero padding row ----
    ids = entity_doc_nodeid + 1
    ids = jnp.where(ids == -99, 0, ids)
    pad = jnp.zeros((ent_kg_hiddens.shape[0], 1, ent_kg_hiddens.shape[2]), ent_kg_hiddens.dtype)
    new_ent_kg_hiddens = jnp.concatenate([pad, ent_kg_hiddens], axis=1)
    kg_input_ent = new_ent_kg_hiddens[jnp.arange(batch_size)[:, None], ids]
    return kg_input_ent, ent_kg_hiddens


# ----------------------------------------------------------------------------
# Deterministic parameter init (shapes follow the module __init__; vocab / hidden
# sizes are scaled down for this synthetic test: lstm_units=16 -> ent_hidden_dim=32).
# ----------------------------------------------------------------------------
def init_params(key, vocab, emb, H, C, K, heads, Dh):
    ks = jax.random.split(key, 12)
    s = 0.1
    xav = 1.414 * np.sqrt(2.0 / (C + C))
    return {
        "emb":   jax.random.normal(ks[0], (vocab, emb), jnp.float32) * s,
        "wih_f": jax.random.normal(ks[1], (4, emb, H), jnp.float32) * s,
        "whh_f": jax.random.normal(ks[2], (4, H, H), jnp.float32) * s,
        "b_f":   jax.random.normal(ks[3], (4, 1, H), jnp.float32) * s,
        "wih_b": jax.random.normal(ks[4], (4, emb, H), jnp.float32) * s,
        "whh_b": jax.random.normal(ks[5], (4, H, H), jnp.float32) * s,
        "b_b":   jax.random.normal(ks[6], (4, 1, H), jnp.float32) * s,
        "conv_w": jax.random.normal(ks[7], (K, C, C), jnp.float32) * xav,
        "conv_b": jnp.zeros((1, C), jnp.float32),
        "gat_w":     jax.random.normal(ks[9], (heads, C, Dh), jnp.float32) * s,
        "gat_a_src": jax.random.normal(ks[10], (heads, Dh, 1), jnp.float32) * s,
        "gat_a_dst": jax.random.normal(ks[11], (heads, Dh, 1), jnp.float32) * s,
    }


if __name__ == "__main__":
    # Small synthetic configuration consistent with the module's forward.
    VOCAB, EMB, H = 211, 32, 16
    C = 2 * H                         # ent_hidden_dim (bi-LSTM output width)
    K = 3                             # Conv1d kernel_size
    HEADS, DH = 2, C // 2             # gcn_head_nums, per-head dim
    T = 8                             # max attr token length
    B = 2                             # documents
    attrs_nums = [[2, 5], [3, 3]]     # attrs per entity, per document
    B_attr = sum(n for a in attrs_nums for n in a)   # 13
    N_max = max(len(a) for a in attrs_nums)          # 2
    L_doc = 4                         # mentions per document (with -100 padding)

    key = jax.random.PRNGKey(0)
    kp, k1, k2, k3 = jax.random.split(key, 4)
    params = init_params(kp, VOCAB, EMB, H, C, K, HEADS, DH)

    entity_attrs = jax.random.randint(k1, (B_attr, T), 0, VOCAB, dtype=jnp.int32)
    entity_attr_lens = jax.random.randint(k2, (B_attr, 1), 1, T + 1, dtype=jnp.int32)
    kg_adj = (jax.random.uniform(k3, (B, N_max, N_max)) > 0.5).astype(jnp.float32)
    kg_adj = jnp.maximum(kg_adj, jnp.eye(N_max, dtype=jnp.float32)[None])  # self loops
    entity_doc_nodeid = jnp.array([[0, 1, 1, -100],
                                   [1, 0, -100, -100]], dtype=jnp.int32)

    kg_input_ent, ent_kg_hiddens = rela_triple_enc_forward(
        params, entity_attrs, attrs_nums, entity_attr_lens, kg_adj, entity_doc_nodeid)
    jax.block_until_ready((kg_input_ent, ent_kg_hiddens))

    assert kg_input_ent.shape == (B, L_doc, HEADS * DH)
    assert ent_kg_hiddens.shape == (B, N_max, HEADS * DH)
    assert bool(jnp.all(jnp.isfinite(kg_input_ent)))
    assert bool(jnp.all(jnp.isfinite(ent_kg_hiddens)))
    print("KERNEL_OK")
</pallas_src>

<mosaic_0001>
module attributes {stable_mosaic.version = 11 : i64} {
  func.func @bilstm_kernel(%arg0: i32, %arg1: memref<8x16x32xbf16, #tpu.memory_space<vmem>>, %arg2: memref<16x1xi32, #tpu.memory_space<vmem>>, %arg3: memref<32x64xbf16, #tpu.memory_space<vmem>>, %arg4: memref<16x64xbf16, #tpu.memory_space<vmem>>, %arg5: memref<1x64xf32, #tpu.memory_space<vmem>>, %arg6: memref<32x64xbf16, #tpu.memory_space<vmem>>, %arg7: memref<16x64xbf16, #tpu.memory_space<vmem>>, %arg8: memref<1x64xf32, #tpu.memory_space<vmem>>, %arg9: memref<16x32xf32, #tpu.memory_space<vmem>>) attributes {dimension_semantics = [#tpu.dimension_semantics<parallel>], iteration_bounds = array<i64: 1>, scalar_prefetch = 0 : i64, scratch_operands = 0 : i64, tpu.core_type = #tpu.core_type<tc>, window_params = [{transform_indices = @transform_0, window_bounds = array<i64: 8, 16, 32>}, {transform_indices = @transform_1, window_bounds = array<i64: 16, 1>}, {pipeline_mode = #tpu.pipeline_mode<synchronous>, transform_indices = @transform_2, window_bounds = array<i64: 32, 64>}, {pipeline_mode = #tpu.pipeline_mode<synchronous>, transform_indices = @transform_3, window_bounds = array<i64: 16, 64>}, {pipeline_mode = #tpu.pipeline_mode<synchronous>, transform_indices = @transform_4, window_bounds = array<i64: 1, 64>}, {pipeline_mode = #tpu.pipeline_mode<synchronous>, transform_indices = @transform_5, window_bounds = array<i64: 32, 64>}, {pipeline_mode = #tpu.pipeline_mode<synchronous>, transform_indices = @transform_6, window_bounds = array<i64: 16, 64>}, {pipeline_mode = #tpu.pipeline_mode<synchronous>, transform_indices = @transform_7, window_bounds = array<i64: 1, 64>}, {transform_indices = @transform_8, window_bounds = array<i64: 16, 32>}]} {
    %c0 = arith.constant 0 : index
    %c0_0 = arith.constant 0 : index
    %0 = vector.load %arg3[%c0, %c0_0] : memref<32x64xbf16, #tpu.memory_space<vmem>>, vector<32x64xbf16>
    %c0_1 = arith.constant 0 : index
    %c0_2 = arith.constant 0 : index
    %1 = vector.load %arg4[%c0_1, %c0_2] : memref<16x64xbf16, #tpu.memory_space<vmem>>, vector<16x64xbf16>
    %c0_3 = arith.constant 0 : index
    %c0_4 = arith.constant 0 : index
    %2 = vector.load %arg6[%c0_3, %c0_4] : memref<32x64xbf16, #tpu.memory_space<vmem>>, vector<32x64xbf16>
    %c0_5 = arith.constant 0 : index
    %c0_6 = arith.constant 0 : index
    %3 = vector.load %arg7[%c0_5, %c0_6] : memref<16x64xbf16, #tpu.memory_space<vmem>>, vector<16x64xbf16>
    %c0_7 = arith.constant 0 : index
    %c0_8 = arith.constant 0 : index
    %4 = vector.load %arg5[%c0_7, %c0_8] : memref<1x64xf32, #tpu.memory_space<vmem>>, vector<1x64xf32>
    %5 = vector.shape_cast %4 : vector<1x64xf32> to vector<1x64xf32>
    %6 = vector.broadcast %5 : vector<1x64xf32> to vector<16x64xf32>
    %c0_9 = arith.constant 0 : index
    %c0_10 = arith.constant 0 : index
    %7 = vector.load %arg8[%c0_9, %c0_10] : memref<1x64xf32, #tpu.memory_space<vmem>>, vector<1x64xf32>
    %8 = vector.shape_cast %7 : vector<1x64xf32> to vector<1x64xf32>
    %9 = vector.broadcast %8 : vector<1x64xf32> to vector<16x64xf32>
    %c0_11 = arith.constant 0 : index
    %c0_12 = arith.constant 0 : index
    %10 = vector.load %arg2[%c0_11, %c0_12] : memref<16x1xi32, #tpu.memory_space<vmem>>, vector<16x1xi32>
    %cst = arith.constant 0.000000e+00 : f32
    %11 = vector.broadcast %cst : f32 to vector<16x16xf32>
    %c0_i32 = arith.constant 0 : i32
    %c7_i32 = arith.constant 7 : i32
    %12 = arith.subi %c7_i32, %c0_i32 : i32
    %13 = arith.index_cast %c0_i32 : i32 to index
    %c0_13 = arith.constant 0 : index
    %c0_14 = arith.constant 0 : index
    %14 = vector.load %arg1[%13, %c0_13, %c0_14] : memref<8x16x32xbf16, #tpu.memory_space<vmem>>, vector<1x16x32xbf16>
    %15 = vector.shape_cast %14 : vector<1x16x32xbf16> to vector<16x32xbf16>
    %16 = vector.broadcast %c0_i32 : i32 to vector<16x1xi32>
    %17 = arith.cmpi sgt, %10, %16 : vector<16x1xi32>
    %cst_15 = arith.constant dense<0.000000e+00> : vector<16x64xf32>
    %18 = tpu.matmul %15, %0, %cst_15 {dimension_numbers = #tpu.dot_dimension_numbers<[1], [0], [0], [1], [0, 0, 1, 1], [], []>} : vector<16x32xbf16>, vector<32x64xbf16>, vector<16x64xf32> -> vector<16x64xf32>
    %19 = arith.truncf %11 : vector<16x16xf32> to vector<16x16xbf16>
    %cst_16 = arith.constant dense<0.000000e+00> : vector<16x64xf32>
    %20 = tpu.matmul %19, %1, %cst_16 {dimension_numbers = #tpu.dot_dimension_numbers<[1], [0], [0], [1], [0, 0, 1, 1], [], []>} : vector<16x16xbf16>, vector<16x64xbf16>, vector<16x64xf32> -> vector<16x64xf32>
    %21 = arith.addf %18, %20 : vector<16x64xf32>
    %22 = arith.addf %21, %6 : vector<16x64xf32>
    %23 = arith.negf %22 : vector<16x64xf32>
    %24 = math.exp %23 : vector<16x64xf32>
    %cst_17 = arith.constant 1.000000e+00 : f32
    %25 = vector.broadcast %cst_17 : f32 to vector<16x64xf32>
    %26 = arith.addf %25, %24 : vector<16x64xf32>
    %27 = arith.divf %25, %26 : vector<16x64xf32>
    %28 = math.tanh %22 : vector<16x64xf32>
    %29 = vector.extract_strided_slice %27 {offsets = [0, 0], sizes = [16, 16], strides = [1, 1]} : vector<16x64xf32> to vector<16x16xf32>
    %30 = vector.extract_strided_slice %27 {offsets = [0, 16], sizes = [16, 16], strides = [1, 1]} : vector<16x64xf32> to vector<16x16xf32>
    %31 = vector.extract_strided_slice %27 {offsets = [0, 48], sizes = [16, 16], strides = [1, 1]} : vector<16x64xf32> to vector<16x16xf32>
    %32 = vector.extract_strided_slice %28 {offsets = [0, 32], sizes = [16, 16], strides = [1, 1]} : vector<16x64xf32> to vector<16x16xf32>
    %33 = arith.mulf %30, %11 : vector<16x16xf32>
    %34 = arith.mulf %29, %32 : vector<16x16xf32>
    %35 = arith.addf %33, %34 : vector<16x16xf32>
    %36 = math.tanh %35 : vector<16x16xf32>
    %37 = arith.mulf %31, %36 : vector<16x16xf32>
    %38 = vector.shape_cast %17 : vector<16x1xi1> to vector<16x1xi1>
    %39 = vector.broadcast %38 : vector<16x1xi1> to vector<16x16xi1>
    %40 = arith.select %39, %37, %11 : vector<16x16xi1>, vector<16x16xf32>
    %41 = vector.shape_cast %17 : vector<16x1xi1> to vector<16x1xi1>
    %42 = vector.broadcast %41 : vector<16x1xi1> to vector<16x16xi1>
    %43 = arith.select %42, %35, %11 : vector<16x16xi1>, vector<16x16xf32>
    %44 = arith.index_cast %12 : i32 to index
    %c0_18 = arith.constant 0 : index
    %c0_19 = arith.constant 0 : index
    %45 = vector.load %arg1[%44, %c0_18, %c0_19] : memref<8x16x32xbf16, #tpu.memory_space<vmem>>, vector<1x16x32xbf16>
    %46 = vector.shape_cast %45 : vector<1x16x32xbf16> to vector<16x32xbf16>
    %47 = vector.broadcast %12 : i32 to vector<16x1xi32>
    %48 = arith.cmpi sgt, %10, %47 : vector<16x1xi32>
    %cst_20 = arith.constant dense<0.000000e+00> : vector<16x64xf32>
    %49 = tpu.matmul %46, %2, %cst_20 {dimension_numbers = #tpu.dot_dimension_numbers<[1], [0], [0], [1], [0, 0, 1, 1], [], []>} : vector<16x32xbf16>, vector<32x64xbf16>, vector<16x64xf32> -> vector<16x64xf32>
    %50 = arith.truncf %11 : vector<16x16xf32> to vector<16x16xbf16>
    %cst_21 = arith.constant dense<0.000000e+00> : vector<16x64xf32>
    %51 = tpu.matmul %50, %3, %cst_21 {dimension_numbers = #tpu.dot_dimension_numbers<[1], [0], [0], [1], [0, 0, 1, 1], [], []>} : vector<16x16xbf16>, vector<16x64xbf16>, vector<16x64xf32> -> vector<16x64xf32>
    %52 = arith.addf %49, %51 : vector<16x64xf32>
    %53 = arith.addf %52, %9 : vector<16x64xf32>
    %54 = arith.negf %53 : vector<16x64xf32>
    %55 = math.exp %54 : vector<16x64xf32>
    %cst_22 = arith.constant 1.000000e+00 : f32
    %56 = vector.broadcast %cst_22 : f32 to vector<16x64xf32>
    %57 = arith.addf %56, %55 : vector<16x64xf32>
    %58 = arith.divf %56, %57 : vector<16x64xf32>
    %59 = math.tanh %53 : vector<16x64xf32>
    %60 = vector.extract_strided_slice %58 {offsets = [0, 0], sizes = [16, 16], strides = [1, 1]} : vector<16x64xf32> to vector<16x16xf32>
    %61 = vector.extract_strided_slice %58 {offsets = [0, 16], sizes = [16, 16], strides = [1, 1]} : vector<16x64xf32> to vector<16x16xf32>
    %62 = vector.extract_strided_slice %58 {offsets = [0, 48], sizes = [16, 16], strides = [1, 1]} : vector<16x64xf32> to vector<16x16xf32>
    %63 = vector.extract_strided_slice %59 {offsets = [0, 32], sizes = [16, 16], strides = [1, 1]} : vector<16x64xf32> to vector<16x16xf32>
    %64 = arith.mulf %61, %11 : vector<16x16xf32>
    %65 = arith.mulf %60, %63 : vector<16x16xf32>
    %66 = arith.addf %64, %65 : vector<16x16xf32>
    %67 = math.tanh %66 : vector<16x16xf32>
    %68 = arith.mulf %62, %67 : vector<16x16xf32>
    %69 = vector.shape_cast %48 : vector<16x1xi1> to vector<16x1xi1>
    %70 = vector.broadcast %69 : vector<16x1xi1> to vector<16x16xi1>
    %71 = arith.select %70, %68, %11 : vector<16x16xi1>, vector<16x16xf32>
    %72 = vector.shape_cast %48 : vector<16x1xi1> to vector<16x1xi1>
    %73 = vector.broadcast %72 : vector<16x1xi1> to vector<16x16xi1>
    %74 = arith.select %73, %66, %11 : vector<16x16xi1>, vector<16x16xf32>
    %c1_i32 = arith.constant 1 : i32
    %c7_i32_23 = arith.constant 7 : i32
    %75 = arith.subi %c7_i32_23, %c1_i32 : i32
    %76 = arith.index_cast %c1_i32 : i32 to index
    %c0_24 = arith.constant 0 : index
    %c0_25 = arith.constant 0 : index
    %77 = vector.load %arg1[%76, %c0_24, %c0_25] : memref<8x16x32xbf16, #tpu.memory_space<vmem>>, vector<1x16x32xbf16>
    %78 = vector.shape_cast %77 : vector<1x16x32xbf16> to vector<16x32xbf16>
    %79 = vector.broadcast %c1_i32 : i32 to vector<16x1xi32>
    %80 = arith.cmpi sgt, %10, %79 : vector<16x1xi32>
    %cst_26 = arith.constant dense<0.000000e+00> : vector<16x64xf32>
    %81 = tpu.matmul %78, %0, %cst_26 {dimension_numbers = #tpu.dot_dimension_numbers<[1], [0], [0], [1], [0, 0, 1, 1], [], []>} : vector<16x32xbf16>, vector<32x64xbf16>, vector<16x64xf32> -> vector<16x64xf32>
    %82 = arith.truncf %40 : vector<16x16xf32> to vector<16x16xbf16>
    %cst_27 = arith.constant dense<0.000000e+00> : vector<16x64xf32>
    %83 = tpu.matmul %82, %1, %cst_27 {dimension_numbers = #tpu.dot_dimension_numbers<[1], [0], [0], [1], [0, 0, 1, 1], [], []>} : vector<16x16xbf16>, vector<16x64xbf16>, vector<16x64xf32> -> vector<16x64xf32>
    %84 = arith.addf %81, %83 : vector<16x64xf32>
    %85 = arith.addf %84, %6 : vector<16x64xf32>
    %86 = arith.negf %85 : vector<16x64xf32>
    %87 = math.exp %86 : vector<16x64xf32>
    %cst_28 = arith.constant 1.000000e+00 : f32
    %88 = vector.broadcast %cst_28 : f32 to vector<16x64xf32>
    %89 = arith.addf %88, %87 : vector<16x64xf32>
    %90 = arith.divf %88, %89 : vector<16x64xf32>
    %91 = math.tanh %85 : vector<16x64xf32>
    %92 = vector.extract_strided_slice %90 {offsets = [0, 0], sizes = [16, 16], strides = [1, 1]} : vector<16x64xf32> to vector<16x16xf32>
    %93 = vector.extract_strided_slice %90 {offsets = [0, 16], sizes = [16, 16], strides = [1, 1]} : vector<16x64xf32> to vector<16x16xf32>
    %94 = vector.extract_strided_slice %90 {offsets = [0, 48], sizes = [16, 16], strides = [1, 1]} : vector<16x64xf32> to vector<16x16xf32>
    %95 = vector.extract_strided_slice %91 {offsets = [0, 32], sizes = [16, 16], strides = [1, 1]} : vector<16x64xf32> to vector<16x16xf32>
    %96 = arith.mulf %93, %43 : vector<16x16xf32>
    %97 = arith.mulf %92, %95 : vector<16x16xf32>
    %98 = arith.addf %96, %97 : vector<16x16xf32>
    %99 = math.tanh %98 : vector<16x16xf32>
    %100 = arith.mulf %94, %99 : vector<16x16xf32>
    %101 = vector.shape_cast %80 : vector<16x1xi1> to vector<16x1xi1>
    %102 = vector.broadcast %101 : vector<16x1xi1> to vector<16x16xi1>
    %103 = arith.select %102, %100, %40 : vector<16x16xi1>, vector<16x16xf32>
    %104 = vector.shape_cast %80 : vector<16x1xi1> to vector<16x1xi1>
    %105 = vector.broadcast %104 : vector<16x1xi1> to vector<16x16xi1>
    %106 = arith.select %105, %98, %43 : vector<16x16xi1>, vector<16x16xf32>
    %107 = arith.index_cast %75 : i32 to index
    %c0_29 = arith.constant 0 : index
    %c0_30 = arith.constant 0 : index
    %108 = vector.load %arg1[%107, %c0_29, %c0_30] : memref<8x16x32xbf16, #tpu.memory_space<vmem>>, vector<1x16x32xbf16>
    %109 = vector.shape_cast %108 : vector<1x16x32xbf16> to vector<16x32xbf16>
    %110 = vector.broadcast %75 : i32 to vector<16x1xi32>
    %111 = arith.cmpi sgt, %10, %110 : vector<16x1xi32>
    %cst_31 = arith.constant dense<0.000000e+00> : vector<16x64xf32>
    %112 = tpu.matmul %109, %2, %cst_31 {dimension_numbers = #tpu.dot_dimension_numbers<[1], [0], [0], [1], [0, 0, 1, 1], [], []>} : vector<16x32xbf16>, vector<32x64xbf16>, vector<16x64xf32> -> vector<16x64xf32>
    %113 = arith.truncf %71 : vector<16x16xf32> to vector<16x16xbf16>
    %cst_32 = arith.constant dense<0.000000e+00> : vector<16x64xf32>
    %114 = tpu.matmul %113, %3, %cst_32 {dimension_numbers = #tpu.dot_dimension_numbers<[1], [0], [0], [1], [0, 0, 1, 1], [], []>} : vector<16x16xbf16>, vector<16x64xbf16>, vector<16x64xf32> -> vector<16x64xf32>
    %115 = arith.addf %112, %114 : vector<16x64xf32>
    %116 = arith.addf %115, %9 : vector<16x64xf32>
    %117 = arith.negf %116 : vector<16x64xf32>
    %118 = math.exp %117 : vector<16x64xf32>
    %cst_33 = arith.constant 1.000000e+00 : f32
    %119 = vector.broadcast %cst_33 : f32 to vector<16x64xf32>
    %120 = arith.addf %119, %118 : vector<16x64xf32>
    %121 = arith.divf %119, %120 : vector<16x64xf32>
    %122 = math.tanh %116 : vector<16x64xf32>
    %123 = vector.extract_strided_slice %121 {offsets = [0, 0], sizes = [16, 16], strides = [1, 1]} : vector<16x64xf32> to vector<16x16xf32>
    %124 = vector.extract_strided_slice %121 {offsets = [0, 16], sizes = [16, 16], strides = [1, 1]} : vector<16x64xf32> to vector<16x16xf32>
    %125 = vector.extract_strided_slice %121 {offsets = [0, 48], sizes = [16, 16], strides = [1, 1]} : vector<16x64xf32> to vector<16x16xf32>
    %126 = vector.extract_strided_slice %122 {offsets = [0, 32], sizes = [16, 16], strides = [1, 1]} : vector<16x64xf32> to vector<16x16xf32>
    %127 = arith.mulf %124, %74 : vector<16x16xf32>
    %128 = arith.mulf %123, %126 : vector<16x16xf32>
    %129 = arith.addf %127, %128 : vector<16x16xf32>
    %130 = math.tanh %129 : vector<16x16xf32>
    %131 = arith.mulf %125, %130 : vector<16x16xf32>
    %132 = vector.shape_cast %111 : vector<16x1xi1> to vector<16x1xi1>
    %133 = vector.broadcast %132 : vector<16x1xi1> to vector<16x16xi1>
    %134 = arith.select %133, %131, %71 : vector<16x16xi1>, vector<16x16xf32>
    %135 = vector.shape_cast %111 : vector<16x1xi1> to vector<16x1xi1>
    %136 = vector.broadcast %135 : vector<16x1xi1> to vector<16x16xi1>
    %137 = arith.select %136, %129, %74 : vector<16x16xi1>, vector<16x16xf32>
    %c2_i32 = arith.constant 2 : i32
    %c7_i32_34 = arith.constant 7 : i32
    %138 = arith.subi %c7_i32_34, %c2_i32 : i32
    %139 = arith.index_cast %c2_i32 : i32 to index
    %c0_35 = arith.constant 0 : index
    %c0_36 = arith.constant 0 : index
    %140 = vector.load %arg1[%139, %c0_35, %c0_36] : memref<8x16x32xbf16, #tpu.memory_space<vmem>>, vector<1x16x32xbf16>
    %141 = vector.shape_cast %140 : vector<1x16x32xbf16> to vector<16x32xbf16>
    %142 = vector.broadcast %c2_i32 : i32 to vector<16x1xi32>
    %143 = arith.cmpi sgt, %10, %142 : vector<16x1xi32>
    %cst_37 = arith.constant dense<0.000000e+00> : vector<16x64xf32>
    %144 = tpu.matmul %141, %0, %cst_37 {dimension_numbers = #tpu.dot_dimension_numbers<[1], [0], [0], [1], [0, 0, 1, 1], [], []>} : vector<16x32xbf16>, vector<32x64xbf16>, vector<16x64xf32> -> vector<16x64xf32>
    %145 = arith.truncf %103 : vector<16x16xf32> to vector<16x16xbf16>
    %cst_38 = arith.constant dense<0.000000e+00> : vector<16x64xf32>
    %146 = tpu.matmul %145, %1, %cst_38 {dimension_numbers = #tpu.dot_dimension_numbers<[1], [0], [0], [1], [0, 0, 1, 1], [], []>} : vector<16x16xbf16>, vector<16x64xbf16>, vector<16x64xf32> -> vector<16x64xf32>
    %147 = arith.addf %144, %146 : vector<16x64xf32>
    %148 = arith.addf %147, %6 : vector<16x64xf32>
    %149 = arith.negf %148 : vector<16x64xf32>
    %150 = math.exp %149 : vector<16x64xf32>
    %cst_39 = arith.constant 1.000000e+00 : f32
    %151 = vector.broadcast %cst_39 : f32 to vector<16x64xf32>
    %152 = arith.addf %151, %150 : vector<16x64xf32>
    %153 = arith.divf %151, %152 : vector<16x64xf32>
    %154 = math.tanh %148 : vector<16x64xf32>
    %155 = vector.extract_strided_slice %153 {offsets = [0, 0], sizes = [16, 16], strides = [1, 1]} : vector<16x64xf32> to vector<16x16xf32>
    %156 = vector.extract_strided_slice %153 {offsets = [0, 16], sizes = [16, 16], strides = [1, 1]} : vector<16x64xf32> to vector<16x16xf32>
    %157 = vector.extract_strided_slice %153 {offsets = [0, 48], sizes = [16, 16], strides = [1, 1]} : vector<16x64xf32> to vector<16x16xf32>
    %158 = vector.extract_strided_slice %154 {offsets = [0, 32], sizes = [16, 16], strides = [1, 1]} : vector<16x64xf32> to vector<16x16xf32>
    %159 = arith.mulf %156, %106 : vector<16x16xf32>
    %160 = arith.mulf %155, %158 : vector<16x16xf32>
    %161 = arith.addf %159, %160 : vector<16x16xf32>
    %162 = math.tanh %161 : vector<16x16xf32>
    %163 = arith.mulf %157, %162 : vector<16x16xf32>
    %164 = vector.shape_cast %143 : vector<16x1xi1> to vector<16x1xi1>
    %165 = vector.broadcast %164 : vector<16x1xi1> to vector<16x16xi1>
    %166 = arith.select %165, %163, %103 : vector<16x16xi1>, vector<16x16xf32>
    %167 = vector.shape_cast %143 : vector<16x1xi1> to vector<16x1xi1>
    %168 = vector.broadcast %167 : vector<16x1xi1> to vector<16x16xi1>
    %169 = arith.select %168, %161, %106 : vector<16x16xi1>, vector<16x16xf32>
    %170 = arith.index_cast %138 : i32 to index
    %c0_40 = arith.constant 0 : index
    %c0_41 = arith.constant 0 : index
    %171 = vector.load %arg1[%170, %c0_40, %c0_41] : memref<8x16x32xbf16, #tpu.memory_space<vmem>>, vector<1x16x32xbf16>
    %172 = vector.shape_cast %171 : vector<1x16x32xbf16> to vector<16x32xbf16>
    %173 = vector.broadcast %138 : i32 to vector<16x1xi32>
    %174 = arith.cmpi sgt, %10, %173 : vector<16x1xi32>
    %cst_42 = arith.constant dense<0.000000e+00> : vector<16x64xf32>
    %175 = tpu.matmul %172, %2, %cst_42 {dimension_numbers = #tpu.dot_dimension_numbers<[1], [0], [0], [1], [0, 0, 1, 1], [], []>} : vector<16x32xbf16>, vector<32x64xbf16>, vector<16x64xf32> -> vector<16x64xf32>
    %176 = arith.truncf %134 : vector<16x16xf32> to vector<16x16xbf16>
    %cst_43 = arith.constant dense<0.000000e+00> : vector<16x64xf32>
    %177 = tpu.matmul %176, %3, %cst_43 {dimension_numbers = #tpu.dot_dimension_numbers<[1], [0], [0], [1], [0, 0, 1, 1], [], []>} : vector<16x16xbf16>, vector<16x64xbf16>, vector<16x64xf32> -> vector<16x64xf32>
    %178 = arith.addf %175, %177 : vector<16x64xf32>
    %179 = arith.addf %178, %9 : vector<16x64xf32>
    %180 = arith.negf %179 : vector<16x64xf32>
    %181 = math.exp %180 : vector<16x64xf32>
    %cst_44 = arith.constant 1.000000e+00 : f32
    %182 = vector.broadcast %cst_44 : f32 to vector<16x64xf32>
    %183 = arith.addf %182, %181 : vector<16x64xf32>
    %184 = arith.divf %182, %183 : vector<16x64xf32>
    %185 = math.tanh %179 : vector<16x64xf32>
    %186 = vector.extract_strided_slice %184 {offsets = [0, 0], sizes = [16, 16], strides = [1, 1]} : vector<16x64xf32> to vector<16x16xf32>
    %187 = vector.extract_strided_slice %184 {offsets = [0, 16], sizes = [16, 16], strides = [1, 1]} : vector<16x64xf32> to vector<16x16xf32>
    %188 = vector.extract_strided_slice %184 {offsets = [0, 48], sizes = [16, 16], strides = [1, 1]} : vector<16x64xf32> to vector<16x16xf32>
    %189 = vector.extract_strided_slice %185 {offsets = [0, 32], sizes = [16, 16], strides = [1, 1]} : vector<16x64xf32> to vector<16x16xf32>
    %190 = arith.mulf %187, %137 : vector<16x16xf32>
    %191 = arith.mulf %186, %189 : vector<16x16xf32>
    %192 = arith.addf %190, %191 : vector<16x16xf32>
    %193 = math.tanh %192 : vector<16x16xf32>
    %194 = arith.mulf %188, %193 : vector<16x16xf32>
    %195 = vector.shape_cast %174 : vector<16x1xi1> to vector<16x1xi1>
    %196 = vector.broadcast %195 : vector<16x1xi1> to vector<16x16xi1>
    %197 = arith.select %196, %194, %134 : vector<16x16xi1>, vector<16x16xf32>
    %198 = vector.shape_cast %174 : vector<16x1xi1> to vector<16x1xi1>
    %199 = vector.broadcast %198 : vector<16x1xi1> to vector<16x16xi1>
    %200 = arith.select %199, %192, %137 : vector<16x16xi1>, vector<16x16xf32>
    %c3_i32 = arith.constant 3 : i32
    %c7_i32_45 = arith.constant 7 : i32
    %201 = arith.subi %c7_i32_45, %c3_i32 : i32
    %202 = arith.index_cast %c3_i32 : i32 to index
    %c0_46 = arith.constant 0 : index
    %c0_47 = arith.constant 0 : index
    %203 = vector.load %arg1[%202, %c0_46, %c0_47] : memref<8x16x32xbf16, #tpu.memory_space<vmem>>, vector<1x16x32xbf16>
    %204 = vector.shape_cast %203 : vector<1x16x32xbf16> to vector<16x32xbf16>
    %205 = vector.broadcast %c3_i32 : i32 to vector<16x1xi32>
    %206 = arith.cmpi sgt, %10, %205 : vector<16x1xi32>
    %cst_48 = arith.constant dense<0.000000e+00> : vector<16x64xf32>
    %207 = tpu.matmul %204, %0, %cst_48 {dimension_numbers = #tpu.dot_dimension_numbers<[1], [0], [0], [1], [0, 0, 1, 1], [], []>} : vector<16x32xbf16>, vector<32x64xbf16>, vector<16x64xf32> -> vector<16x64xf32>
    %208 = arith.truncf %166 : vector<16x16xf32> to vector<16x16xbf16>
    %cst_49 = arith.constant dense<0.000000e+00> : vector<16x64xf32>
    %209 = tpu.matmul %208, %1, %cst_49 {dimension_numbers = #tpu.dot_dimension_numbers<[1], [0], [0], [1], [0, 0, 1, 1], [], []>} : vector<16x16xbf16>, vector<16x64xbf16>, vector<16x64xf32> -> vector<16x64xf32>
    %210 = arith.addf %207, %209 : vector<16x64xf32>
    %211 = arith.addf %210, %6 : vector<16x64xf32>
    %212 = arith.negf %211 : vector<16x64xf32>
    %213 = math.exp %212 : vector<16x64xf32>
    %cst_50 = arith.constant 1.000000e+00 : f32
    %214 = vector.broadcast %cst_50 : f32 to vector<16x64xf32>
    %215 = arith.addf %214, %213 : vector<16x64xf32>
    %216 = arith.divf %214, %215 : vector<16x64xf32>
    %217 = math.tanh %211 : vector<16x64xf32>
    %218 = vector.extract_strided_slice %216 {offsets = [0, 0], sizes = [16, 16], strides = [1, 1]} : vector<16x64xf32> to vector<16x16xf32>
    %219 = vector.extract_strided_slice %216 {offsets = [0, 16], sizes = [16, 16], strides = [1, 1]} : vector<16x64xf32> to vector<16x16xf32>
    %220 = vector.extract_strided_slice %216 {offsets = [0, 48], sizes = [16, 16], strides = [1, 1]} : vector<16x64xf32> to vector<16x16xf32>
    %221 = vector.extract_strided_slice %217 {offsets = [0, 32], sizes = [16, 16], strides = [1, 1]} : vector<16x64xf32> to vector<16x16xf32>
    %222 = arith.mulf %219, %169 : vector<16x16xf32>
    %223 = arith.mulf %218, %221 : vector<16x16xf32>
    %224 = arith.addf %222, %223 : vector<16x16xf32>
    %225 = math.tanh %224 : vector<16x16xf32>
    %226 = arith.mulf %220, %225 : vector<16x16xf32>
    %227 = vector.shape_cast %206 : vector<16x1xi1> to vector<16x1xi1>
    %228 = vector.broadcast %227 : vector<16x1xi1> to vector<16x16xi1>
    %229 = arith.select %228, %226, %166 : vector<16x16xi1>, vector<16x16xf32>
    %230 = vector.shape_cast %206 : vector<16x1xi1> to vector<16x1xi1>
    %231 = vector.broadcast %230 : vector<16x1xi1> to vector<16x16xi1>
    %232 = arith.select %231, %224, %169 : vector<16x16xi1>, vector<16x16xf32>
    %233 = arith.index_cast %201 : i32 to index
    %c0_51 = arith.constant 0 : index
    %c0_52 = arith.constant 0 : index
    %234 = vector.load %arg1[%233, %c0_51, %c0_52] : memref<8x16x32xbf16, #tpu.memory_space<vmem>>, vector<1x16x32xbf16>
    %235 = vector.shape_cast %234 : vector<1x16x32xbf16> to vector<16x32xbf16>
    %236 = vector.broadcast %201 : i32 to vector<16x1xi32>
    %237 = arith.cmpi sgt, %10, %236 : vector<16x1xi32>
    %cst_53 = arith.constant dense<0.000000e+00> : vector<16x64xf32>
    %238 = tpu.matmul %235, %2, %cst_53 {dimension_numbers = #tpu.dot_dimension_numbers<[1], [0], [0], [1], [0, 0, 1, 1], [], []>} : vector<16x32xbf16>, vector<32x64xbf16>, vector<16x64xf32> -> vector<16x64xf32>
    %239 = arith.truncf %197 : vector<16x16xf32> to vector<16x16xbf16>
    %cst_54 = arith.constant dense<0.000000e+00> : vector<16x64xf32>
    %240 = tpu.matmul %239, %3, %cst_54 {dimension_numbers = #tpu.dot_dimension_numbers<[1], [0], [0], [1], [0, 0, 1, 1], [], []>} : vector<16x16xbf16>, vector<16x64xbf16>, vector<16x64xf32> -> vector<16x64xf32>
    %241 = arith.addf %238, %240 : vector<16x64xf32>
    %242 = arith.addf %241, %9 : vector<16x64xf32>
    %243 = arith.negf %242 : vector<16x64xf32>
    %244 = math.exp %243 : vector<16x64xf32>
    %cst_55 = arith.constant 1.000000e+00 : f32
    %245 = vector.broadcast %cst_55 : f32 to vector<16x64xf32>
    %246 = arith.addf %245, %244 : vector<16x64xf32>
    %247 = arith.divf %245, %246 : vector<16x64xf32>
    %248 = math.tanh %242 : vector<16x64xf32>
    %249 = vector.extract_strided_slice %247 {offsets = [0, 0], sizes = [16, 16], strides = [1, 1]} : vector<16x64xf32> to vector<16x16xf32>
    %250 = vector.extract_strided_slice %247 {offsets = [0, 16], sizes = [16, 16], strides = [1, 1]} : vector<16x64xf32> to vector<16x16xf32>
    %251 = vector.extract_strided_slice %247 {offsets = [0, 48], sizes = [16, 16], strides = [1, 1]} : vector<16x64xf32> to vector<16x16xf32>
    %252 = vector.extract_strided_slice %248 {offsets = [0, 32], sizes = [16, 16], strides = [1, 1]} : vector<16x64xf32> to vector<16x16xf32>
    %253 = arith.mulf %250, %200 : vector<16x16xf32>
    %254 = arith.mulf %249, %252 : vector<16x16xf32>
    %255 = arith.addf %253, %254 : vector<16x16xf32>
    %256 = math.tanh %255 : vector<16x16xf32>
    %257 = arith.mulf %251, %256 : vector<16x16xf32>
    %258 = vector.shape_cast %237 : vector<16x1xi1> to vector<16x1xi1>
    %259 = vector.broadcast %258 : vector<16x1xi1> to vector<16x16xi1>
    %260 = arith.select %259, %257, %197 : vector<16x16xi1>, vector<16x16xf32>
    %261 = vector.shape_cast %237 : vector<16x1xi1> to vector<16x1xi1>
    %262 = vector.broadcast %261 : vector<16x1xi1> to vector<16x16xi1>
    %263 = arith.select %262, %255, %200 : vector<16x16xi1>, vector<16x16xf32>
    %c4_i32 = arith.constant 4 : i32
    %c7_i32_56 = arith.constant 7 : i32
    %264 = arith.subi %c7_i32_56, %c4_i32 : i32
    %265 = arith.index_cast %c4_i32 : i32 to index
    %c0_57 = arith.constant 0 : index
    %c0_58 = arith.constant 0 : index
    %266 = vector.load %arg1[%265, %c0_57, %c0_58] : memref<8x16x32xbf16, #tpu.memory_space<vmem>>, vector<1x16x32xbf16>
    %267 = vector.shape_cast %266 : vector<1x16x32xbf16> to vector<16x32xbf16>
    %268 = vector.broadcast %c4_i32 : i32 to vector<16x1xi32>
    %269 = arith.cmpi sgt, %10, %268 : vector<16x1xi32>
    %cst_59 = arith.constant dense<0.000000e+00> : vector<16x64xf32>
    %270 = tpu.matmul %267, %0, %cst_59 {dimension_numbers = #tpu.dot_dimension_numbers<[1], [0], [0], [1], [0, 0, 1, 1], [], []>} : vector<16x32xbf16>, vector<32x64xbf16>, vector<16x64xf32> -> vector<16x64xf32>
    %271 = arith.truncf %229 : vector<16x16xf32> to vector<16x16xbf16>
    %cst_60 = arith.constant dense<0.000000e+00> : vector<16x64xf32>
    %272 = tpu.matmul %271, %1, %cst_60 {dimension_numbers = #tpu.dot_dimension_numbers<[1], [0], [0], [1], [0, 0, 1, 1], [], []>} : vector<16x16xbf16>, vector<16x64xbf16>, vector<16x64xf32> -> vector<16x64xf32>
    %273 = arith.addf %270, %272 : vector<16x64xf32>
    %274 = arith.addf %273, %6 : vector<16x64xf32>
    %275 = arith.negf %274 : vector<16x64xf32>
    %276 = math.exp %275 : vector<16x64xf32>
    %cst_61 = arith.constant 1.000000e+00 : f32
    %277 = vector.broadcast %cst_61 : f32 to vector<16x64xf32>
    %278 = arith.addf %277, %276 : vector<16x64xf32>
    %279 = arith.divf %277, %278 : vector<16x64xf32>
    %280 = math.tanh %274 : vector<16x64xf32>
    %281 = vector.extract_strided_slice %279 {offsets = [0, 0], sizes = [16, 16], strides = [1, 1]} : vector<16x64xf32> to vector<16x16xf32>
    %282 = vector.extract_strided_slice %279 {offsets = [0, 16], sizes = [16, 16], strides = [1, 1]} : vector<16x64xf32> to vector<16x16xf32>
    %283 = vector.extract_strided_slice %279 {offsets = [0, 48], sizes = [16, 16], strides = [1, 1]} : vector<16x64xf32> to vector<16x16xf32>
    %284 = vector.extract_strided_slice %280 {offsets = [0, 32], sizes = [16, 16], strides = [1, 1]} : vector<16x64xf32> to vector<16x16xf32>
    %285 = arith.mulf %282, %232 : vector<16x16xf32>
    %286 = arith.mulf %281, %284 : vector<16x16xf32>
    %287 = arith.addf %285, %286 : vector<16x16xf32>
    %288 = math.tanh %287 : vector<16x16xf32>
    %289 = arith.mulf %283, %288 : vector<16x16xf32>
    %290 = vector.shape_cast %269 : vector<16x1xi1> to vector<16x1xi1>
    %291 = vector.broadcast %290 : vector<16x1xi1> to vector<16x16xi1>
    %292 = arith.select %291, %289, %229 : vector<16x16xi1>, vector<16x16xf32>
    %293 = vector.shape_cast %269 : vector<16x1xi1> to vector<16x1xi1>
    %294 = vector.broadcast %293 : vector<16x1xi1> to vector<16x16xi1>
    %295 = arith.select %294, %287, %232 : vector<16x16xi1>, vector<16x16xf32>
    %296 = arith.index_cast %264 : i32 to index
    %c0_62 = arith.constant 0 : index
    %c0_63 = arith.constant 0 : index
    %297 = vector.load %arg1[%296, %c0_62, %c0_63] : memref<8x16x32xbf16, #tpu.memory_space<vmem>>, vector<1x16x32xbf16>
    %298 = vector.shape_cast %297 : vector<1x16x32xbf16> to vector<16x32xbf16>
    %299 = vector.broadcast %264 : i32 to vector<16x1xi32>
    %300 = arith.cmpi sgt, %10, %299 : vector<16x1xi32>
    %cst_64 = arith.constant dense<0.000000e+00> : vector<16x64xf32>
    %301 = tpu.matmul %298, %2, %cst_64 {dimension_numbers = #tpu.dot_dimension_numbers<[1], [0], [0], [1], [0, 0, 1, 1], [], []>} : vector<16x32xbf16>, vector<32x64xbf16>, vector<16x64xf32> -> vector<16x64xf32>
    %302 = arith.truncf %260 : vector<16x16xf32> to vector<16x16xbf16>
    %cst_65 = arith.constant dense<0.000000e+00> : vector<16x64xf32>
    %303 = tpu.matmul %302, %3, %cst_65 {dimension_numbers = #tpu.dot_dimension_numbers<[1], [0], [0], [1], [0, 0, 1, 1], [], []>} : vector<16x16xbf16>, vector<16x64xbf16>, vector<16x64xf32> -> vector<16x64xf32>
    %304 = arith.addf %301, %303 : vector<16x64xf32>
    %305 = arith.addf %304, %9 : vector<16x64xf32>
    %306 = arith.negf %305 : vector<16x64xf32>
    %307 = math.exp %306 : vector<16x64xf32>
    %cst_66 = arith.constant 1.000000e+00 : f32
    %308 = vector.broadcast %cst_66 : f32 to vector<16x64xf32>
    %309 = arith.addf %308, %307 : vector<16x64xf32>
    %310 = arith.divf %308, %309 : vector<16x64xf32>
    %311 = math.tanh %305 : vector<16x64xf32>
    %312 = vector.extract_strided_slice %310 {offsets = [0, 0], sizes = [16, 16], strides = [1, 1]} : vector<16x64xf32> to vector<16x16xf32>
    %313 = vector.extract_strided_slice %310 {offsets = [0, 16], sizes = [16, 16], strides = [1, 1]} : vector<16x64xf32> to vector<16x16xf32>
    %314 = vector.extract_strided_slice %310 {offsets = [0, 48], sizes = [16, 16], strides = [1, 1]} : vector<16x64xf32> to vector<16x16xf32>
    %315 = vector.extract_strided_slice %311 {offsets = [0, 32], sizes = [16, 16], strides = [1, 1]} : vector<16x64xf32> to vector<16x16xf32>
    %316 = arith.mulf %313, %263 : vector<16x16xf32>
    %317 = arith.mulf %312, %315 : vector<16x16xf32>
    %318 = arith.addf %316, %317 : vector<16x16xf32>
    %319 = math.tanh %318 : vector<16x16xf32>
    %320 = arith.mulf %314, %319 : vector<16x16xf32>
    %321 = vector.shape_cast %300 : vector<16x1xi1> to vector<16x1xi1>
    %322 = vector.broadcast %321 : vector<16x1xi1> to vector<16x16xi1>
    %323 = arith.select %322, %320, %260 : vector<16x16xi1>, vector<16x16xf32>
    %324 = vector.shape_cast %300 : vector<16x1xi1> to vector<16x1xi1>
    %325 = vector.broadcast %324 : vector<16x1xi1> to vector<16x16xi1>
    %326 = arith.select %325, %318, %263 : vector<16x16xi1>, vector<16x16xf32>
    %c5_i32 = arith.constant 5 : i32
    %c7_i32_67 = arith.constant 7 : i32
    %327 = arith.subi %c7_i32_67, %c5_i32 : i32
    %328 = arith.index_cast %c5_i32 : i32 to index
    %c0_68 = arith.constant 0 : index
    %c0_69 = arith.constant 0 : index
    %329 = vector.load %arg1[%328, %c0_68, %c0_69] : memref<8x16x32xbf16, #tpu.memory_space<vmem>>, vector<1x16x32xbf16>
    %330 = vector.shape_cast %329 : vector<1x16x32xbf16> to vector<16x32xbf16>
    %331 = vector.broadcast %c5_i32 : i32 to vector<16x1xi32>
    %332 = arith.cmpi sgt, %10, %331 : vector<16x1xi32>
    %cst_70 = arith.constant dense<0.000000e+00> : vector<16x64xf32>
    %333 = tpu.matmul %330, %0, %cst_70 {dimension_numbers = #tpu.dot_dimension_numbers<[1], [0], [0], [1], [0, 0, 1, 1], [], []>} : vector<16x32xbf16>, vector<32x64xbf16>, vector<16x64xf32> -> vector<16x64xf32>
    %334 = arith.truncf %292 : vector<16x16xf32> to vector<16x16xbf16>
    %cst_71 = arith.constant dense<0.000000e+00> : vector<16x64xf32>
    %335 = tpu.matmul %334, %1, %cst_71 {dimension_numbers = #tpu.dot_dimension_numbers<[1], [0], [0], [1], [0, 0, 1, 1], [], []>} : vector<16x16xbf16>, vector<16x64xbf16>, vector<16x64xf32> -> vector<16x64xf32>
    %336 = arith.addf %333, %335 : vector<16x64xf32>
    %337 = arith.addf %336, %6 : vector<16x64xf32>
    %338 = arith.negf %337 : vector<16x64xf32>
    %339 = math.exp %338 : vector<16x64xf32>
    %cst_72 = arith.constant 1.000000e+00 : f32
    %340 = vector.broadcast %cst_72 : f32 to vector<16x64xf32>
    %341 = arith.addf %340, %339 : vector<16x64xf32>
    %342 = arith.divf %340, %341 : vector<16x64xf32>
    %343 = math.tanh %337 : vector<16x64xf32>
    %344 = vector.extract_strided_slice %342 {offsets = [0, 0], sizes = [16, 16], strides = [1, 1]} : vector<16x64xf32> to vector<16x16xf32>
    %345 = vector.extract_strided_slice %342 {offsets = [0, 16], sizes = [16, 16], strides = [1, 1]} : vector<16x64xf32> to vector<16x16xf32>
    %346 = vector.extract_strided_slice %342 {offsets = [0, 48], sizes = [16, 16], strides = [1, 1]} : vector<16x64xf32> to vector<16x16xf32>
    %347 = vector.extract_strided_slice %343 {offsets = [0, 32], sizes = [16, 16], strides = [1, 1]} : vector<16x64xf32> to vector<16x16xf32>
    %348 = arith.mulf %345, %295 : vector<16x16xf32>
    %349 = arith.mulf %344, %347 : vector<16x16xf32>
    %350 = arith.addf %348, %349 : vector<16x16xf32>
    %351 = math.tanh %350 : vector<16x16xf32>
    %352 = arith.mulf %346, %351 : vector<16x16xf32>
    %353 = vector.shape_cast %332 : vector<16x1xi1> to vector<16x1xi1>
    %354 = vector.broadcast %353 : vector<16x1xi1> to vector<16x16xi1>
    %355 = arith.select %354, %352, %292 : vector<16x16xi1>, vector<16x16xf32>
    %356 = vector.shape_cast %332 : vector<16x1xi1> to vector<16x1xi1>
    %357 = vector.broadcast %356 : vector<16x1xi1> to vector<16x16xi1>
    %358 = arith.select %357, %350, %295 : vector<16x16xi1>, vector<16x16xf32>
    %359 = arith.index_cast %327 : i32 to index
    %c0_73 = arith.constant 0 : index
    %c0_74 = arith.constant 0 : index
    %360 = vector.load %arg1[%359, %c0_73, %c0_74] : memref<8x16x32xbf16, #tpu.memory_space<vmem>>, vector<1x16x32xbf16>
    %361 = vector.shape_cast %360 : vector<1x16x32xbf16> to vector<16x32xbf16>
    %362 = vector.broadcast %327 : i32 to vector<16x1xi32>
    %363 = arith.cmpi sgt, %10, %362 : vector<16x1xi32>
    %cst_75 = arith.constant dense<0.000000e+00> : vector<16x64xf32>
    %364 = tpu.matmul %361, %2, %cst_75 {dimension_numbers = #tpu.dot_dimension_numbers<[1], [0], [0], [1], [0, 0, 1, 1], [], []>} : vector<16x32xbf16>, vector<32x64xbf16>, vector<16x64xf32> -> vector<16x64xf32>
    %365 = arith.truncf %323 : vector<16x16xf32> to vector<16x16xbf16>
    %cst_76 = arith.constant dense<0.000000e+00> : vector<16x64xf32>
    %366 = tpu.matmul %365, %3, %cst_76 {dimension_numbers = #tpu.dot_dimension_numbers<[1], [0], [0], [1], [0, 0, 1, 1], [], []>} : vector<16x16xbf16>, vector<16x64xbf16>, vector<16x64xf32> -> vector<16x64xf32>
    %367 = arith.addf %364, %366 : vector<16x64xf32>
    %368 = arith.addf %367, %9 : vector<16x64xf32>
    %369 = arith.negf %368 : vector<16x64xf32>
    %370 = math.exp %369 : vector<16x64xf32>
    %cst_77 = arith.constant 1.000000e+00 : f32
    %371 = vector.broadcast %cst_77 : f32 to vector<16x64xf32>
    %372 = arith.addf %371, %370 : vector<16x64xf32>
    %373 = arith.divf %371, %372 : vector<16x64xf32>
    %374 = math.tanh %368 : vector<16x64xf32>
    %375 = vector.extract_strided_slice %373 {offsets = [0, 0], sizes = [16, 16], strides = [1, 1]} : vector<16x64xf32> to vector<16x16xf32>
    %376 = vector.extract_strided_slice %373 {offsets = [0, 16], sizes = [16, 16], strides = [1, 1]} : vector<16x64xf32> to vector<16x16xf32>
    %377 = vector.extract_strided_slice %373 {offsets = [0, 48], sizes = [16, 16], strides = [1, 1]} : vector<16x64xf32> to vector<16x16xf32>
    %378 = vector.extract_strided_slice %374 {offsets = [0, 32], sizes = [16, 16], strides = [1, 1]} : vector<16x64xf32> to vector<16x16xf32>
    %379 = arith.mulf %376, %326 : vector<16x16xf32>
    %380 = arith.mulf %375, %378 : vector<16x16xf32>
    %381 = arith.addf %379, %380 : vector<16x16xf32>
    %382 = math.tanh %381 : vector<16x16xf32>
    %383 = arith.mulf %377, %382 : vector<16x16xf32>
    %384 = vector.shape_cast %363 : vector<16x1xi1> to vector<16x1xi1>
    %385 = vector.broadcast %384 : vector<16x1xi1> to vector<16x16xi1>
    %386 = arith.select %385, %383, %323 : vector<16x16xi1>, vector<16x16xf32>
    %387 = vector.shape_cast %363 : vector<16x1xi1> to vector<16x1xi1>
    %388 = vector.broadcast %387 : vector<16x1xi1> to vector<16x16xi1>
    %389 = arith.select %388, %381, %326 : vector<16x16xi1>, vector<16x16xf32>
    %c6_i32 = arith.constant 6 : i32
    %c7_i32_78 = arith.constant 7 : i32
    %390 = arith.subi %c7_i32_78, %c6_i32 : i32
    %391 = arith.index_cast %c6_i32 : i32 to index
    %c0_79 = arith.constant 0 : index
    %c0_80 = arith.constant 0 : index
    %392 = vector.load %arg1[%391, %c0_79, %c0_80] : memref<8x16x32xbf16, #tpu.memory_space<vmem>>, vector<1x16x32xbf16>
    %393 = vector.shape_cast %392 : vector<1x16x32xbf16> to vector<16x32xbf16>
    %394 = vector.broadcast %c6_i32 : i32 to vector<16x1xi32>
    %395 = arith.cmpi sgt, %10, %394 : vector<16x1xi32>
    %cst_81 = arith.constant dense<0.000000e+00> : vector<16x64xf32>
    %396 = tpu.matmul %393, %0, %cst_81 {dimension_numbers = #tpu.dot_dimension_numbers<[1], [0], [0], [1], [0, 0, 1, 1], [], []>} : vector<16x32xbf16>, vector<32x64xbf16>, vector<16x64xf32> -> vector<16x64xf32>
    %397 = arith.truncf %355 : vector<16x16xf32> to vector<16x16xbf16>
    %cst_82 = arith.constant dense<0.000000e+00> : vector<16x64xf32>
    %398 = tpu.matmul %397, %1, %cst_82 {dimension_numbers = #tpu.dot_dimension_numbers<[1], [0], [0], [1], [0, 0, 1, 1], [], []>} : vector<16x16xbf16>, vector<16x64xbf16>, vector<16x64xf32> -> vector<16x64xf32>
    %399 = arith.addf %396, %398 : vector<16x64xf32>
    %400 = arith.addf %399, %6 : vector<16x64xf32>
    %401 = arith.negf %400 : vector<16x64xf32>
    %402 = math.exp %401 : vector<16x64xf32>
    %cst_83 = arith.constant 1.000000e+00 : f32
    %403 = vector.broadcast %cst_83 : f32 to vector<16x64xf32>
    %404 = arith.addf %403, %402 : vector<16x64xf32>
    %405 = arith.divf %403, %404 : vector<16x64xf32>
    %406 = math.tanh %400 : vector<16x64xf32>
    %407 = vector.extract_strided_slice %405 {offsets = [0, 0], sizes = [16, 16], strides = [1, 1]} : vector<16x64xf32> to vector<16x16xf32>
    %408 = vector.extract_strided_slice %405 {offsets = [0, 16], sizes = [16, 16], strides = [1, 1]} : vector<16x64xf32> to vector<16x16xf32>
    %409 = vector.extract_strided_slice %405 {offsets = [0, 48], sizes = [16, 16], strides = [1, 1]} : vector<16x64xf32> to vector<16x16xf32>
    %410 = vector.extract_strided_slice %406 {offsets = [0, 32], sizes = [16, 16], strides = [1, 1]} : vector<16x64xf32> to vector<16x16xf32>
    %411 = arith.mulf %408, %358 : vector<16x16xf32>
    %412 = arith.mulf %407, %410 : vector<16x16xf32>
    %413 = arith.addf %411, %412 : vector<16x16xf32>
    %414 = math.tanh %413 : vector<16x16xf32>
    %415 = arith.mulf %409, %414 : vector<16x16xf32>
    %416 = vector.shape_cast %395 : vector<16x1xi1> to vector<16x1xi1>
    %417 = vector.broadcast %416 : vector<16x1xi1> to vector<16x16xi1>
    %418 = arith.select %417, %415, %355 : vector<16x16xi1>, vector<16x16xf32>
    %419 = vector.shape_cast %395 : vector<16x1xi1> to vector<16x1xi1>
    %420 = vector.broadcast %419 : vector<16x1xi1> to vector<16x16xi1>
    %421 = arith.select %420, %413, %358 : vector<16x16xi1>, vector<16x16xf32>
    %422 = arith.index_cast %390 : i32 to index
    %c0_84 = arith.constant 0 : index
    %c0_85 = arith.constant 0 : index
    %423 = vector.load %arg1[%422, %c0_84, %c0_85] : memref<8x16x32xbf16, #tpu.memory_space<vmem>>, vector<1x16x32xbf16>
    %424 = vector.shape_cast %423 : vector<1x16x32xbf16> to vector<16x32xbf16>
    %425 = vector.broadcast %390 : i32 to vector<16x1xi32>
    %426 = arith.cmpi sgt, %10, %425 : vector<16x1xi32>
    %cst_86 = arith.constant dense<0.000000e+00> : vector<16x64xf32>
    %427 = tpu.matmul %424, %2, %cst_86 {dimension_numbers = #tpu.dot_dimension_numbers<[1], [0], [0], [1], [0, 0, 1, 1], [], []>} : vector<16x32xbf16>, vector<32x64xbf16>, vector<16x64xf32> -> vector<16x64xf32>
    %428 = arith.truncf %386 : vector<16x16xf32> to vector<16x16xbf16>
    %cst_87 = arith.constant dense<0.000000e+00> : vector<16x64xf32>
    %429 = tpu.matmul %428, %3, %cst_87 {dimension_numbers = #tpu.dot_dimension_numbers<[1], [0], [0], [1], [0, 0, 1, 1], [], []>} : vector<16x16xbf16>, vector<16x64xbf16>, vector<16x64xf32> -> vector<16x64xf32>
    %430 = arith.addf %427, %429 : vector<16x64xf32>
    %431 = arith.addf %430, %9 : vector<16x64xf32>
    %432 = arith.negf %431 : vector<16x64xf32>
    %433 = math.exp %432 : vector<16x64xf32>
    %cst_88 = arith.constant 1.000000e+00 : f32
    %434 = vector.broadcast %cst_88 : f32 to vector<16x64xf32>
    %435 = arith.addf %434, %433 : vector<16x64xf32>
    %436 = arith.divf %434, %435 : vector<16x64xf32>
    %437 = math.tanh %431 : vector<16x64xf32>
    %438 = vector.extract_strided_slice %436 {offsets = [0, 0], sizes = [16, 16], strides = [1, 1]} : vector<16x64xf32> to vector<16x16xf32>
    %439 = vector.extract_strided_slice %436 {offsets = [0, 16], sizes = [16, 16], strides = [1, 1]} : vector<16x64xf32> to vector<16x16xf32>
    %440 = vector.extract_strided_slice %436 {offsets = [0, 48], sizes = [16, 16], strides = [1, 1]} : vector<16x64xf32> to vector<16x16xf32>
    %441 = vector.extract_strided_slice %437 {offsets = [0, 32], sizes = [16, 16], strides = [1, 1]} : vector<16x64xf32> to vector<16x16xf32>
    %442 = arith.mulf %439, %389 : vector<16x16xf32>
    %443 = arith.mulf %438, %441 : vector<16x16xf32>
    %444 = arith.addf %442, %443 : vector<16x16xf32>
    %445 = math.tanh %444 : vector<16x16xf32>
    %446 = arith.mulf %440, %445 : vector<16x16xf32>
    %447 = vector.shape_cast %426 : vector<16x1xi1> to vector<16x1xi1>
    %448 = vector.broadcast %447 : vector<16x1xi1> to vector<16x16xi1>
    %449 = arith.select %448, %446, %386 : vector<16x16xi1>, vector<16x16xf32>
    %450 = vector.shape_cast %426 : vector<16x1xi1> to vector<16x1xi1>
    %451 = vector.broadcast %450 : vector<16x1xi1> to vector<16x16xi1>
    %452 = arith.select %451, %444, %389 : vector<16x16xi1>, vector<16x16xf32>
    %c7_i32_89 = arith.constant 7 : i32
    %c7_i32_90 = arith.constant 7 : i32
    %453 = arith.subi %c7_i32_90, %c7_i32_89 : i32
    %454 = arith.index_cast %c7_i32_89 : i32 to index
    %c0_91 = arith.constant 0 : index
    %c0_92 = arith.constant 0 : index
    %455 = vector.load %arg1[%454, %c0_91, %c0_92] : memref<8x16x32xbf16, #tpu.memory_space<vmem>>, vector<1x16x32xbf16>
    %456 = vector.shape_cast %455 : vector<1x16x32xbf16> to vector<16x32xbf16>
    %457 = vector.broadcast %c7_i32_89 : i32 to vector<16x1xi32>
    %458 = arith.cmpi sgt, %10, %457 : vector<16x1xi32>
    %cst_93 = arith.constant dense<0.000000e+00> : vector<16x64xf32>
    %459 = tpu.matmul %456, %0, %cst_93 {dimension_numbers = #tpu.dot_dimension_numbers<[1], [0], [0], [1], [0, 0, 1, 1], [], []>} : vector<16x32xbf16>, vector<32x64xbf16>, vector<16x64xf32> -> vector<16x64xf32>
    %460 = arith.truncf %418 : vector<16x16xf32> to vector<16x16xbf16>
    %cst_94 = arith.constant dense<0.000000e+00> : vector<16x64xf32>
    %461 = tpu.matmul %460, %1, %cst_94 {dimension_numbers = #tpu.dot_dimension_numbers<[1], [0], [0], [1], [0, 0, 1, 1], [], []>} : vector<16x16xbf16>, vector<16x64xbf16>, vector<16x64xf32> -> vector<16x64xf32>
    %462 = arith.addf %459, %461 : vector<16x64xf32>
    %463 = arith.addf %462, %6 : vector<16x64xf32>
    %464 = arith.negf %463 : vector<16x64xf32>
    %465 = math.exp %464 : vector<16x64xf32>
    %cst_95 = arith.constant 1.000000e+00 : f32
    %466 = vector.broadcast %cst_95 : f32 to vector<16x64xf32>
    %467 = arith.addf %466, %465 : vector<16x64xf32>
    %468 = arith.divf %466, %467 : vector<16x64xf32>
    %469 = math.tanh %463 : vector<16x64xf32>
    %470 = vector.extract_strided_slice %468 {offsets = [0, 0], sizes = [16, 16], strides = [1, 1]} : vector<16x64xf32> to vector<16x16xf32>
    %471 = vector.extract_strided_slice %468 {offsets = [0, 16], sizes = [16, 16], strides = [1, 1]} : vector<16x64xf32> to vector<16x16xf32>
    %472 = vector.extract_strided_slice %468 {offsets = [0, 48], sizes = [16, 16], strides = [1, 1]} : vector<16x64xf32> to vector<16x16xf32>
    %473 = vector.extract_strided_slice %469 {offsets = [0, 32], sizes = [16, 16], strides = [1, 1]} : vector<16x64xf32> to vector<16x16xf32>
    %474 = arith.mulf %471, %421 : vector<16x16xf32>
    %475 = arith.mulf %470, %473 : vector<16x16xf32>
    %476 = arith.addf %474, %475 : vector<16x16xf32>
    %477 = math.tanh %476 : vector<16x16xf32>
    %478 = arith.mulf %472, %477 : vector<16x16xf32>
    %479 = vector.shape_cast %458 : vector<16x1xi1> to vector<16x1xi1>
    %480 = vector.broadcast %479 : vector<16x1xi1> to vector<16x16xi1>
    %481 = arith.select %480, %478, %418 : vector<16x16xi1>, vector<16x16xf32>
    %482 = vector.shape_cast %458 : vector<16x1xi1> to vector<16x1xi1>
    %483 = vector.broadcast %482 : vector<16x1xi1> to vector<16x16xi1>
    %484 = arith.select %483, %476, %421 : vector<16x16xi1>, vector<16x16xf32>
    %485 = arith.index_cast %453 : i32 to index
    %c0_96 = arith.constant 0 : index
    %c0_97 = arith.constant 0 : index
    %486 = vector.load %arg1[%485, %c0_96, %c0_97] : memref<8x16x32xbf16, #tpu.memory_space<vmem>>, vector<1x16x32xbf16>
    %487 = vector.shape_cast %486 : vector<1x16x32xbf16> to vector<16x32xbf16>
    %488 = vector.broadcast %453 : i32 to vector<16x1xi32>
    %489 = arith.cmpi sgt, %10, %488 : vector<16x1xi32>
    %cst_98 = arith.constant dense<0.000000e+00> : vector<16x64xf32>
    %490 = tpu.matmul %487, %2, %cst_98 {dimension_numbers = #tpu.dot_dimension_numbers<[1], [0], [0], [1], [0, 0, 1, 1], [], []>} : vector<16x32xbf16>, vector<32x64xbf16>, vector<16x64xf32> -> vector<16x64xf32>
    %491 = arith.truncf %449 : vector<16x16xf32> to vector<16x16xbf16>
    %cst_99 = arith.constant dense<0.000000e+00> : vector<16x64xf32>
    %492 = tpu.matmul %491, %3, %cst_99 {dimension_numbers = #tpu.dot_dimension_numbers<[1], [0], [0], [1], [0, 0, 1, 1], [], []>} : vector<16x16xbf16>, vector<16x64xbf16>, vector<16x64xf32> -> vector<16x64xf32>
    %493 = arith.addf %490, %492 : vector<16x64xf32>
    %494 = arith.addf %493, %9 : vector<16x64xf32>
    %495 = arith.negf %494 : vector<16x64xf32>
    %496 = math.exp %495 : vector<16x64xf32>
    %cst_100 = arith.constant 1.000000e+00 : f32
    %497 = vector.broadcast %cst_100 : f32 to vector<16x64xf32>
    %498 = arith.addf %497, %496 : vector<16x64xf32>
    %499 = arith.divf %497, %498 : vector<16x64xf32>
    %500 = math.tanh %494 : vector<16x64xf32>
    %501 = vector.extract_strided_slice %499 {offsets = [0, 0], sizes = [16, 16], strides = [1, 1]} : vector<16x64xf32> to vector<16x16xf32>
    %502 = vector.extract_strided_slice %499 {offsets = [0, 16], sizes = [16, 16], strides = [1, 1]} : vector<16x64xf32> to vector<16x16xf32>
    %503 = vector.extract_strided_slice %499 {offsets = [0, 48], sizes = [16, 16], strides = [1, 1]} : vector<16x64xf32> to vector<16x16xf32>
    %504 = vector.extract_strided_slice %500 {offsets = [0, 32], sizes = [16, 16], strides = [1, 1]} : vector<16x64xf32> to vector<16x16xf32>
    %505 = arith.mulf %502, %452 : vector<16x16xf32>
    %506 = arith.mulf %501, %504 : vector<16x16xf32>
    %507 = arith.addf %505, %506 : vector<16x16xf32>
    %508 = math.tanh %507 : vector<16x16xf32>
    %509 = arith.mulf %503, %508 : vector<16x16xf32>
    %510 = vector.shape_cast %489 : vector<16x1xi1> to vector<16x1xi1>
    %511 = vector.broadcast %510 : vector<16x1xi1> to vector<16x16xi1>
    %512 = arith.select %511, %509, %449 : vector<16x16xi1>, vector<16x16xf32>
    %513 = vector.shape_cast %489 : vector<16x1xi1> to vector<16x1xi1>
    %514 = vector.broadcast %513 : vector<16x1xi1> to vector<16x16xi1>
    %515 = arith.select %514, %507, %452 : vector<16x16xi1>, vector<16x16xf32>
    %c8_i32 = arith.constant 8 : i32
    %516 = tpu.concatenate %481, %512 in 1 : vector<16x16xf32>, vector<16x16xf32> -> vector<16x32xf32>
    %c0_101 = arith.constant 0 : index
    %c0_102 = arith.constant 0 : index
    %517 = vector.load %arg9[%c0_101, %c0_102] : memref<16x32xf32, #tpu.memory_space<vmem>>, vector<16x32xf32>
    tpu.vector_store %arg9[%c0_101, %c0_102], %516 {strides = array<i32>} : memref<16x32xf32, #tpu.memory_space<vmem>>, vector<16x32xf32>,
    return
  }
  func.func @transform_0(%arg0: i32) -> (i32, i32, i32) {
    %c0_i32 = arith.constant 0 : i32
    %c0_i32_0 = arith.constant 0 : i32
    %c0_i32_1 = arith.constant 0 : i32
    return %c0_i32, %arg0, %c0_i32_0 : i32, i32, i32
  }
  func.func @transform_1(%arg0: i32) -> (i32, i32) {
    %c0_i32 = arith.constant 0 : i32
    %c0_i32_0 = arith.constant 0 : i32
    return %arg0, %c0_i32 : i32, i32
  }
  func.func @transform_2(%arg0: i32) -> (i32, i32) {
    %c0_i32 = arith.constant 0 : i32
    %c0_i32_0 = arith.constant 0 : i32
    %c0_i32_1 = arith.constant 0 : i32
    return %c0_i32, %c0_i32_0 : i32, i32
  }
  func.func @transform_3(%arg0: i32) -> (i32, i32) {
    %c0_i32 = arith.constant 0 : i32
    %c0_i32_0 = arith.constant 0 : i32
    %c0_i32_1 = arith.constant 0 : i32
    return %c0_i32, %c0_i32_0 : i32, i32
  }
  func.func @transform_4(%arg0: i32) -> (i32, i32) {
    %c0_i32 = arith.constant 0 : i32
    %c0_i32_0 = arith.constant 0 : i32
    %c0_i32_1 = arith.constant 0 : i32
    return %c0_i32, %c0_i32_0 : i32, i32
  }
  func.func @transform_5(%arg0: i32) -> (i32, i32) {
    %c0_i32 = arith.constant 0 : i32
    %c0_i32_0 = arith.constant 0 : i32
    %c0_i32_1 = arith.constant 0 : i32
    return %c0_i32, %c0_i32_0 : i32, i32
  }
  func.func @transform_6(%arg0: i32) -> (i32, i32) {
    %c0_i32 = arith.constant 0 : i32
    %c0_i32_0 = arith.constant 0 : i32
    %c0_i32_1 = arith.constant 0 : i32
    return %c0_i32, %c0_i32_0 : i32, i32
  }
  func.func @transform_7(%arg0: i32) -> (i32, i32) {
    %c0_i32 = arith.constant 0 : i32
    %c0_i32_0 = arith.constant 0 : i32
    %c0_i32_1 = arith.constant 0 : i32
    return %c0_i32, %c0_i32_0 : i32, i32
  }
  func.func @transform_8(%arg0: i32) -> (i32, i32) {
    %c0_i32 = arith.constant 0 : i32
    %c0_i32_0 = arith.constant 0 : i32
    return %arg0, %c0_i32 : i32, i32
  }
}

</mosaic_0001>

<bundles_post_ra>
// kernel: tpu_custom_call.1
= control target key start
LH: loop header
LB: loop body
LE: loop exit
PB: predicated region body
PF: predicated region fallthrough
CT: control target
= control target key end

     0   :  { %13 = vsyncpa [#allocation3], 0  ;;  %s3766_s0 = inlined_call_operand.hbm [shape: bf16[8,16,32], index: 0, kind: input, shape index: {}]   ;;  %s3767_s1 = inlined_call_operand.vmem [shape: s32[16,1], index: 1, kind: input, shape index: {}]   ;;  %s3768_s2 = inlined_call_operand.vmem [shape: bf16[32,64], index: 2, kind: input, shape index: {}]   ;;  %s3769_s3 = inlined_call_operand.hbm [shape: bf16[16,64], index: 3, kind: input, shape index: {}]   ;;  %s3770_s4 = inlined_call_operand.vmem [shape: f32[1,64], index: 4, kind: input, shape index: {}]   ;;  %s3771_s5 = inlined_call_operand.hbm [shape: bf16[32,64], index: 5, kind: input, shape index: {}]   ;;  %s3772_s6 = inlined_call_operand.hbm [shape: bf16[16,64], index: 6, kind: input, shape index: {}]   ;;  %s3773_s7 = inlined_call_operand.vmem [shape: f32[1,64], index: 7, kind: input, shape index: {}]   ;;  %s3774_s8 = inlined_call_operand.hbm [shape: f32[16,32], index: 8, kind: output, shape index: {}]  }
   0x1   :  { %14 = vsyncpa [#allocation6], 0 }
   0x2   :  { %15 = vsyncpa [#allocation9], 0 }
   0x3   :  { %16 = vsyncpa [#allocation4], 0  ;;  %s38_s29 = sshll.u32 %s3769_s3, 4  ;;  %s2752_s30 = smov [#allocation5]   ;;  %s39_s29 = int_to_ptr.hbm [resolvable:$true] %s38_s29 }
   0x4   :  { %s40_s9 = sshll.u32 %s2752_s30, 4  ;;  %s21_s12 = sshll.u32 %s3766_s0, 4  ;;  %s41_s9 = int_to_ptr.vmem [resolvable:$true] %s40_s9  ;;  %s22_s12 = int_to_ptr.hbm [resolvable:$true] %s21_s12 }
   0x5   :  { %s2753_s13 = smov 64   ;;  %s2754_s14 = smov 4  }
   0x6   :  { %46 = dma.hbm_to_vmem [thread:$0]  %s39_s29, 128, %s41_s9, [#allocation6], %s2753_s13, %s2753_s13, %s2754_s14  }
   0x7   :  { %s2755_s15 = smov [#allocation2]   ;;  %s53_s19 = sshll.u32 %s3771_s5, 4  ;;  %s54_s19 = int_to_ptr.hbm [resolvable:$true] %s53_s19 }
   0x8   :  { %s23_s16 = sshll.u32 %s2755_s15, 4  ;;  %s66_s21 = sshll.u32 %s3772_s6, 4  ;;  %s24_s16 = int_to_ptr.vmem [resolvable:$true] %s23_s16  ;;  %s67_s21 = int_to_ptr.hbm [resolvable:$true] %s66_s21 }
   0x9   :  { %29 = dma.hbm_to_vmem [thread:$0]  %s22_s12, 1024, %s24_s16, [#allocation3], %s2753_s13, %s2753_s13, %s2754_s14  }
   0xa   :  { %s2756_s22 = smov [#allocation7]   ;;  %s2757_s0 = smov [#allocation8]  }
   0xb   :  { %s55_s23 = sshll.u32 %s2756_s22, 4  ;;  %s68_s24 = sshll.u32 %s2757_s0, 4  ;;  %s56_s23 = int_to_ptr.vmem [resolvable:$true] %s55_s23  ;;  %s69_s24 = int_to_ptr.vmem [resolvable:$true] %s68_s24 }
   0xc   :  { %61 = dma.hbm_to_vmem [thread:$0]  %s54_s19, 256, %s56_s23, [#allocation6], %s2753_s13, %s2753_s13, %s2754_s14  }
   0xd   :  { %74 = dma.hbm_to_vmem [thread:$0]  %s67_s21, 128, %s69_s24, [#allocation9], %s2753_s13, %s2753_s13, %s2754_s14  }
   0xe   :  { %2744 = dma.done.wait [#allocation3], 1024  }
   0xf   :  { %2745 = vsyncadd [#allocation3], 4294966272 }
  0x10   :  { %2746 = dma.done.wait [#allocation6], 384  }
  0x11   :  { %2747 = vsyncadd [#allocation6], 4294966912 }
  0x12   :  { %2748 = dma.done.wait [#allocation9], 128  }
  0x13   :  { %2749 = vsyncadd [#allocation9], 4294967168  ;;  %v2758_v0 = vmov 0   ;;  %v2829_v1 = vld [vmem:[%s3768_s2 + $0x8] sm:$0xff]  ;;  %v2831_v2 = vld [vmem:[#allocation8] sm:$0xff]  ;;  %vm3776_vm0 = vcmask 261120  }
  0x14   :  { %2349 = vset.pattern.permute.xlu0 %v2758_v0  ;;  %2350 = vset.pattern.permute.xlu1 %v2758_v0  ;;  %v2833_v3 = vld [vmem:[#allocation7 + $0x8] sm:$0xff]  ;;  %v2835_v4 = vld [vmem:[#allocation5] sm:$0xff]  ;;  %v2846_v6 = vld [vmem:[#allocation7] sm:$0xff]  ;;  %s2759_s9 = smov 96   ;;  %s2760_s10 = smov 16  }
  0x15   :  { %2351 = vset.pattern.permute.xlu2 %v2758_v0  ;;  %171 = vmatpush.bf16.msra.mxu1 %v2829_v1  ;;  %v2842_v5 = vld [vmem:[%s3768_s2] sm:$0xff]  ;;  %v2328_v8 = vld [vmem:[#allocation2 + $0x38] sm:$0xff]  ;;  %s2761_s11 = smov 32   ;;  %s2762_s16 = smov 80  }
  0x16   :  { %287 = vmatpush.bf16.msra.mxu2 %v2831_v2  ;;  %320 = vmatpush.bf16.msra.mxu3 %v2833_v3  ;;  %v2327_v7 = vld [vmem:[#allocation2] sm:$0xff]  ;;  %s2188_s29 = sshll.u32 %s3774_s8, 4  ;;  %s2764_s30 = smov 128   ;;  %s2189_s29 = int_to_ptr.hbm [resolvable:$true] %s2188_s29 }
  0x17   :  { %137 = vmatpush.bf16.msra.mxu0 %v2835_v4  ;;  %v2869_v10 = vld [vmem:[%s3770_s4] ss:$0 sm:$0xff] }
  0x18   :  { %v2875_v15 = vld [vmem:[%s3773_s7] ss:$0 sm:$0xff] }
  0x19   :  { %288 = vmatmul.bf16.vlgmr.msra.gmra.mxu2 %v2758_v0  ;;  %172 = vmatpush.bf16.msra.mxu1 %v2842_v5 }
  0x1a   :  { %458 = vmatpush.bf16.msrb.mxu2 %v2829_v1  ;;  %138 = vmatmul.bf16.vlgmr.msra.gmra.mxu0 %v2758_v0 }
  0x1b   :  { %437 = vmatpush.bf16.msrb.mxu0 %v2835_v4  ;;  %321 = vmatpush.bf16.msra.mxu3 %v2846_v6 }
  0x1c   :  { %2219 = vmatmul.msk.bf16.vlgmr.msra.gmra.mxu1 %vm3776_vm0, %v2327_v7 }
  0x1d   :  { %575 = vmatpush.bf16.msrb.mxu1 %v2831_v2 }
  0x1e   :  { %459 = vmatpush.bf16.msrb.mxu2 %v2842_v5  ;;  %2238 = vmatmul.msk.bf16.vlgmr.msra.gmra.mxu3 %vm3776_vm0, %v2328_v8 }
  0x1f   :  { %596 = vmatpush.bf16.msrb.mxu3 %v2833_v3  ;;  %713 = vmatpush.bf16.msra.mxu0 %v2835_v4 }
  0x21   :  { %851 = vmatpush.bf16.msra.mxu1 %v2831_v2 }
  0x22   :  { %734 = vmatpush.bf16.msra.mxu2 %v2829_v1 }
  0x23   :  { %597 = vmatpush.bf16.msrb.mxu3 %v2846_v6 }
  0x26   :  { %735 = vmatpush.bf16.msra.mxu2 %v2842_v5 }
  0x27   :  { %872 = vmatpush.bf16.msra.mxu3 %v2833_v3 }
  0x2b   :  { %873 = vmatpush.bf16.msra.mxu3 %v2846_v6 }
  0x97   :  { %v139_v9 = vpop.f32.mrf.mxu0 }
  0x99   :  { %v174_v11 = vpop.f32.mrf.mxu1 }
  0x9a   :  { %v175_v12 = vadd.f32 %v174_v11, %v139_v9 }
  0x9c   :  { %v179_v13 = vadd.f32 %v2869_v10, %v175_v12  ;;  %v289_v14 = vpop.f32.mrf.mxu2 }
  0x9e   :  { %2354 = vtanh.f32 %v179_v13  ;;  %v2220_v31 = vmul.f32 -1.442695, %v179_v13 }
  0x9f   :  { %v141_v16 = vpop.f32.mrf.mxu0 }
  0xa1   :  { %v323_v17 = vpop.f32.mrf.mxu3  ;;  %v176_v19 = vpop.f32.mrf.mxu1 }
  0xa2   :  { %v324_v18 = vadd.f32 %v323_v17, %v289_v14  ;;  %v177_v20 = vadd.f32 %v176_v19, %v141_v16 }
  0xa4   :  { %v328_v21 = vadd.f32 %v2875_v15, %v324_v18  ;;  %v2355_v22 = vpop.eup %2354  ;;  %v180_v23 = vadd.f32 %v2869_v10, %v177_v20  ;;  %v291_v24 = vpop.f32.mrf.mxu2 }
  0xa5   :  { %225 = vrot.lane.b32.xlu0 %v2355_v22, %s2759_s9 }
  0xa6   :  { %2356 = vtanh.f32 %v328_v21  ;;  %v2239_v32 = vmul.f32 -1.442695, %v328_v21  ;;  %v2221_v33 = vmul.f32 -1.442695, %v180_v23 }
  0xa7   :  { %2358 = vtanh.f32 %v180_v23 }
  0xa9   :  { %v325_v25 = vpop.f32.mrf.mxu3 }
  0xaa   :  { %v326_v26 = vadd.f32 %v325_v25, %v291_v24 }
  0xac   :  { %v2357_v27 = vpop.eup %2356  ;;  %v329_v28 = vadd.f32 %v2875_v15, %v326_v26 }
  0xad   :  { %v2359_v29 = vpop.eup %2358  ;;  %374 = vrot.lane.b32.xlu1 %v2357_v27, %s2759_s9 }
  0xae   :  { %2360 = vtanh.f32 %v329_v28  ;;  %227 = vrot.lane.b32.xlu0 %v2359_v29, %s2759_s9  ;;  %v2240_v36 = vmul.f32 -1.442695, %v329_v28 }
  0xaf   :  { %2362 = vpow2.f32 %v2220_v31 }
  0xb0   :  { %2364 = vpow2.f32 %v2239_v32 }
  0xb1   :  { %2366 = vpow2.f32 %v2221_v33 }
  0xb4   :  { %v2361_v30 = vpop.eup %2360 }
  0xb5   :  { %376 = vrot.lane.b32.xlu1 %v2361_v30, %s2759_s9  ;;  %v2363_v34 = vpop.eup %2362 }
  0xb6   :  { %v187_v35 = vadd.f32 1.0, %v2363_v34  ;;  %v2365_v37 = vpop.eup %2364 }
  0xb7   :  { %v2367_v38 = vpop.eup %2366  ;;  %v336_v39 = vadd.f32 1.0, %v2365_v37 }
  0xb8   :  { %2368 = vrcp.f32 %v187_v35  ;;  %v188_v40 = vadd.f32 1.0, %v2367_v38  ;;  %vm194_vm1 = vweird.f32 %v187_v35  ;;  %v200_v51 = vand.u32 2147483648, %v187_v35 }
  0xb9   :  { %2370 = vpow2.f32 %v2240_v36  ;;  %v198_v55 = vand.u32 2147483647, %v187_v35  ;;  %v349_v12 = vand.u32 2147483648, %v336_v39  ;;  %vm343_vm8 = vweird.f32 %v336_v39 }
  0xba   :  { %2372 = vrcp.f32 %v336_v39  ;;  %v201_v57 = vor.u32 1.1754944e-38, %v200_v51  ;;  %vm209_vm6 = vweird.f32 %v188_v40  ;;  %v215_v8 = vand.u32 2147483648, %v188_v40 }
  0xbb   :  { %2374 = vrcp.f32 %v188_v40  ;;  %vm199_vm4 = vcmp.eq.f32.partialorder %v198_v55, 8.507059e+37  ;;  %v213_v14 = vand.u32 2147483647, %v188_v40  ;;  %v347_v16 = vand.u32 2147483647, %v336_v39 }
  0xbc   :  { %v216_v18 = vor.u32 1.1754944e-38, %v215_v8  ;;  %v350_v20 = vor.u32 1.1754944e-38, %v349_v12 }
  0xbd   :  { %vm214_vm11 = vcmp.eq.f32.partialorder %v213_v14, 8.507059e+37  ;;  %vm348_vm12 = vcmp.eq.f32.partialorder %v347_v16, 8.507059e+37 }
  0xbe   :  { %v2369_v41 = vpop.eup %2368 }
  0xbf   :  { %v2371_v42 = vpop.eup %2370  ;;  %v190_v43 = vmul.f32 %v2369_v41, %v187_v35  ;;  %vm195_vm2 = vweird.f32 %v2369_v41 }
  0xc0   :  { %v2884_v44 = vadd.f32 1.0, %v2371_v42  ;;  %v2373_v45 = vpop.eup %2372  ;;  %vm196_vm3 = vmor %vm194_vm1, %vm195_vm2 }
  0xc1   :  { %v191_v46 = vsub.f32 1.0, %v190_v43  ;;  %v2375_v47 = vpop.eup %2374  ;;  %v339_v48 = vmul.f32 %v2373_v45, %v336_v39  ;;  %vm344_vm5 = vweird.f32 %v2373_v45 }
  0xc2   :  { %2376 = vrcp.f32 %v2884_v44  ;;  %v205_v50 = vmul.f32 %v2375_v47, %v188_v40  ;;  %vm210_vm7 = vweird.f32 %v2375_v47  ;;  %vm345_vm10 = vmor %vm343_vm8, %vm344_vm5  ;;  %v364_v29 = vand.u32 2147483648, %v2884_v44 }
  0xc3   :  { %v192_v49 = vmul.f32 %v2369_v41, %v191_v46  ;;  %v340_v52 = vsub.f32 1.0, %v339_v48  ;;  %vm211_vm9 = vmor %vm209_vm6, %vm210_vm7  ;;  %vm358_vm14 = vweird.f32 %v2884_v44  ;;  %v362_v30 = vand.u32 2147483647, %v2884_v44 }
  0xc4   :  { %v206_v56 = vsub.f32 1.0, %v205_v50  ;;  %v365_v32 = vor.u32 1.1754944e-38, %v364_v29 }
  0xc5   :  { %v193_v54 = vadd.f32 %v2369_v41, %v192_v49  ;;  %v341_v58 = vmul.f32 %v2373_v45, %v340_v52  ;;  %vm363_vm1 = vcmp.eq.f32.partialorder %v362_v30, 8.507059e+37 }
  0xc6   :  { %v207_v61 = vmul.f32 %v2375_v47, %v206_v56 }
  0xc7   :  { %v197_v60 = vsel %vm196_vm3, %v2369_v41, %v193_v54  ;;  %v342_v7 = vadd.f32 %v2373_v45, %v341_v58  ;;  %v2946_v58 = vld [vmem:[#allocation2 + $0x8] sm:$0xff] }
  0xc8   :  { %v2377_v53 = vpop.eup %2376  ;;  %v2888_v63 = vsel %vm199_vm4, %v201_v57, %v197_v60  ;;  %v208_v13 = vadd.f32 %v2375_v47, %v207_v61  ;;  %2246 = vmatmul.msk.bf16.vlgmr.msrb.gmra.mxu2 %vm3776_vm0, %v2946_v58 }
  0xc9   :  { %v354_v59 = vmul.f32 %v2377_v53, %v2884_v44  ;;  %v346_v17 = vsel %vm345_vm10, %v2373_v45, %v342_v7  ;;  %vm359_vm13 = vweird.f32 %v2377_v53  ;;  %v221_v36 = vmul.f32 0.0, %v2888_v63  ;;  %v2920_v44 = vld [vmem:[%s3767_s1] sm:$0xff]  ;;  %1010 = vmatpush.bf16.msrb.mxu2 %v2829_v1 }
  0xca   :  { %v212_v21 = vsel %vm211_vm9, %v2375_v47, %v208_v13  ;;  %v2893_v23 = vsel %vm348_vm12, %v350_v20, %v346_v17  ;;  %vm360_vm15 = vmor %vm358_vm14, %vm359_vm13  ;;  %vm118_vm2 = vcmp.gt.s32.totalorder %v2920_v44, 0  ;;  %vm272_vm5 = vcmp.gt.s32.totalorder %v2920_v44, 7 }
  0xcb   :  { %v355_v9 = vsub.f32 1.0, %v354_v59  ;;  %v2896_v25 = vsel %vm214_vm11, %v216_v18, %v212_v21  ;;  %v255_v45 = vsel %vm118_vm2, 1, %v2758_v0  ;;  %v370_v46 = vmul.f32 0.0, %v2893_v23 }
  0xcc   :  { %v222_v39 = vmul.f32 0.0, %v2896_v25  ;;  %v404_v57 = vsel %vm272_vm5, 1, %v2758_v0  ;;  %vm126_vm10 = vcmask 130048  }
  0xcd   :  { %v356_v19 = vmul.f32 %v2377_v53, %v355_v9  ;;  %1011 = vmatpush.bf16.msrb.mxu2 %v2842_v5 }
  0xcf   :  { %v357_v27 = vadd.f32 %v2377_v53, %v356_v19 }
  0xd1   :  { %v361_v31 = vsel %vm360_vm15, %v2377_v53, %v357_v27  ;;  %v2935_v53 = vld [vmem:[%s3767_s1 + $0x8] sm:$0xff] }
  0xd2   :  { %v2904_v33 = vsel %vm363_vm1, %v365_v32, %v361_v31  ;;  %vm119_vm3 = vcmp.gt.s32.totalorder %v2935_v53, 0  ;;  %vm273_vm4 = vcmp.gt.s32.totalorder %v2935_v53, 7 }
  0xd3   :  { %v371_v49 = vmul.f32 0.0, %v2904_v33  ;;  %v256_v54 = vsel %vm119_vm3, 1, %v2758_v0  ;;  %v405_v56 = vsel %vm273_vm4, 1, %v2758_v0 }
 0x117   :  { %v226_v62 = vpop.permute.xlu0 %225 }
 0x118   :  { %v231_v11 = vmul.f32 %v226_v62, %v2888_v63 }
 0x11a   :  { %235 = vrot.lane.b32.xlu2 %v231_v11, %s2760_s10 }
 0x11f   :  { %v375_v22 = vpop.permute.xlu1 %374 }
 0x120   :  { %v380_v24 = vmul.f32 %v375_v22, %v2893_v23  ;;  %v228_v26 = vpop.permute.xlu0 %227  ;;  %v2990_v22 = vld [vmem:[#allocation2 + $0x30] sm:$0xff] }
 0x121   :  { %v232_v28 = vmul.f32 %v228_v26, %v2896_v25  ;;  %2254 = vmatmul.msk.bf16.vlgmr.msrb.gmra.mxu3 %vm3776_vm0, %v2990_v22 }
 0x122   :  { %384 = vrot.lane.b32.xlu0 %v380_v24, %s2760_s10  ;;  %1148 = vmatpush.bf16.msrb.mxu3 %v2833_v3 }
 0x123   :  { %237 = vrot.lane.b32.xlu2 %v232_v28, %s2760_s10 }
 0x126   :  { %1149 = vmatpush.bf16.msrb.mxu3 %v2846_v6 }
 0x127   :  { %v377_v34 = vpop.permute.xlu1 %376 }
 0x128   :  { %v381_v35 = vmul.f32 %v377_v34, %v2904_v33 }
 0x12a   :  { %386 = vrot.lane.b32.xlu1 %v381_v35, %s2760_s10 }
 0x174   :  { %v236_v37 = vpop.permute.xlu2 %235 }
 0x175   :  { %v2909_v38 = vadd.f32 %v236_v37, %v221_v36 }
 0x177   :  { %2378 = vtanh.f32 %v2909_v38 }
 0x17d   :  { %v238_v40 = vpop.permute.xlu2 %237  ;;  %v2379_v41 = vpop.eup %2378 }
 0x17e   :  { %v2913_v42 = vadd.f32 %v238_v40, %v222_v39  ;;  %247 = vrot.lane.b32.xlu2 %v2379_v41, %s2761_s11 }
 0x180   :  { %2380 = vtanh.f32 %v2913_v42 }
 0x186   :  { %v2381_v43 = vpop.eup %2380 }
 0x187   :  { %249 = vrot.lane.b32.xlu0 %v2381_v43, %s2761_s11 }
 0x18f   :  { %258 = vperm.xlu0 %2349, %v255_v45  }
 0x194   :  { %v385_v47 = vpop.permute.xlu0 %384 }
 0x195   :  { %v2926_v48 = vadd.f32 %v385_v47, %v370_v46 }
 0x197   :  { %2382 = vtanh.f32 %v2926_v48 }
 0x19c   :  { %v387_v50 = vpop.permute.xlu1 %386 }
 0x19d   :  { %v2383_v51 = vpop.eup %2382  ;;  %v2930_v52 = vadd.f32 %v387_v50, %v371_v49 }
 0x19e   :  { %396 = vrot.lane.b32.xlu1 %v2383_v51, %s2761_s11 }
 0x19f   :  { %2384 = vtanh.f32 %v2930_v52 }
 0x1a4   :  { %v599_v35 = vpop.f32.mrf.mxu3 }
 0x1a5   :  { %v2385_v55 = vpop.eup %2384 }
 0x1a6   :  { %261 = vperm.xlu1 %2350, %v256_v54   ;;  %398 = vrot.lane.b32.xlu2 %v2385_v55, %s2761_s11 }
 0x1ac   :  { %v601_v40 = vpop.f32.mrf.mxu3 }
 0x1ae   :  { %410 = vperm.xlu1 %2350, %v405_v56   ;;  %407 = vperm.xlu2 %2351, %v404_v57  }
 0x1d8   :  { %v248_v60 = vpop.permute.xlu2 %247 }
 0x1d9   :  { %v253_v8 = vmul.f32 %v248_v60, %v2888_v63 }
 0x1f9   :  { %v250_v59 = vpop.permute.xlu0 %249 }
 0x1fa   :  { %v254_v9 = vmul.f32 %v250_v59, %v2896_v25  ;;  %v461_v25 = vpop.f32.mrf.mxu2 }
 0x200   :  { %v399_v62 = vpop.permute.xlu2 %398 }
 0x201   :  { %v2952_v7 = vpop.permute.xlu0 %258  ;;  %v403_v17 = vmul.f32 %v399_v62, %v2904_v33 }
 0x202   :  { %vm3777_vm6 = vcmp.eq.s32.totalorder %v2952_v7, 1  ;;  %v463_v29 = vpop.f32.mrf.mxu2 }
 0x203   :  { %v2962_v12 = vsel %vm3777_vm6, %v253_v8, 0.0 }
 0x208   :  { %v2971_v63 = vpop.permute.xlu2 %407 }
 0x209   :  { %vm3779_vm8 = vcmp.eq.s32.totalorder %v2971_v63, 1 }
 0x210   :  { %v397_v61 = vpop.permute.xlu1 %396 }
 0x211   :  { %v402_v16 = vmul.f32 %v397_v61, %v2893_v23 }
 0x213   :  { %v2981_v19 = vsel %vm3779_vm8, %v402_v16, 0.0 }
 0x218   :  { %v2957_v11 = vpop.permute.xlu1 %261 }
 0x219   :  { %vm3775_vm7 = vcmp.eq.s32.totalorder %v2957_v11, 1 }
 0x21a   :  { %v2966_v13 = vsel %vm3775_vm7, %v254_v9, 0.0 }
 0x21b   :  { %v423_v14 = vpack.c.bf16 %v2966_v13, %v2962_v12 }
 0x21d   :  { %425 = vrot.lane.b32.xlu2 %v423_v14, %s2762_s16 }
 0x220   :  { %v2975_v18 = vpop.permute.xlu1 %410 }
 0x221   :  { %vm3778_vm9 = vcmp.eq.s32.totalorder %v2975_v18, 1 }
 0x222   :  { %v2985_v20 = vsel %vm3778_vm9, %v403_v17, 0.0 }
 0x223   :  { %v561_v21 = vpack.c.bf16 %v2985_v20, %v2981_v19 }
 0x225   :  { %563 = vrot.lane.b32.xlu0 %v561_v21, %s2762_s16 }
 0x277   :  { %v426_v23 = vpop.permute.xlu2 %425 }
 0x278   :  { %2241 = vmatmul.msk.bf16.vlgmr.msrb.gmra.mxu0 %vm126_vm10, %v426_v23 }
 0x279   :  { %989 = vmatpush.bf16.msrb.mxu0 %v2835_v4 }
 0x297   :  { %v564_v24 = vpop.permute.xlu0 %563 }
 0x298   :  { %2249 = vmatmul.msk.bf16.vlgmr.msrb.gmra.mxu1 %vm126_vm10, %v564_v24 }
 0x299   :  { %1127 = vmatpush.bf16.msrb.mxu1 %v2831_v2 }
 0x2f5   :  { %v439_v26 = vpop.f32.mrf.mxu0 }
 0x2f6   :  { %v462_v27 = vadd.f32 %v461_v25, %v439_v26 }
 0x2f8   :  { %v466_v28 = vadd.f32 %v2869_v10, %v462_v27 }
 0x2fa   :  { %2386 = vtanh.f32 %v466_v28  ;;  %v2247_v54 = vmul.f32 -1.442695, %v466_v28 }
 0x2fd   :  { %v441_v30 = vpop.f32.mrf.mxu0 }
 0x2fe   :  { %v464_v31 = vadd.f32 %v463_v29, %v441_v30 }
 0x300   :  { %v2387_v32 = vpop.eup %2386  ;;  %v467_v33 = vadd.f32 %v2869_v10, %v464_v31 }
 0x301   :  { %512 = vrot.lane.b32.xlu1 %v2387_v32, %s2759_s9 }
 0x302   :  { %2388 = vtanh.f32 %v467_v33  ;;  %v2248_v49 = vmul.f32 -1.442695, %v467_v33 }
 0x308   :  { %v2389_v34 = vpop.eup %2388 }
 0x309   :  { %514 = vrot.lane.b32.xlu2 %v2389_v34, %s2759_s9 }
 0x315   :  { %v577_v36 = vpop.f32.mrf.mxu1 }
 0x316   :  { %v600_v37 = vadd.f32 %v599_v35, %v577_v36 }
 0x318   :  { %v604_v39 = vadd.f32 %v2875_v15, %v600_v37 }
 0x31a   :  { %2390 = vtanh.f32 %v604_v39  ;;  %v2255_v27 = vmul.f32 -1.442695, %v604_v39 }
 0x31d   :  { %v579_v41 = vpop.f32.mrf.mxu1 }
 0x31e   :  { %v602_v43 = vadd.f32 %v601_v40, %v579_v41 }
 0x320   :  { %v2391_v45 = vpop.eup %2390  ;;  %v605_v46 = vadd.f32 %v2875_v15, %v602_v43 }
 0x321   :  { %650 = vrot.lane.b32.xlu0 %v2391_v45, %s2759_s9 }
 0x322   :  { %2392 = vtanh.f32 %v605_v46  ;;  %v2256_v31 = vmul.f32 -1.442695, %v605_v46 }
 0x323   :  { %2394 = vpow2.f32 %v2248_v49 }
 0x328   :  { %v2393_v47 = vpop.eup %2392 }
 0x329   :  { %652 = vrot.lane.b32.xlu1 %v2393_v47, %s2759_s9  ;;  %v2395_v50 = vpop.eup %2394 }
 0x32a   :  { %v475_v51 = vadd.f32 1.0, %v2395_v50 }
 0x32c   :  { %2396 = vrcp.f32 %v475_v51  ;;  %v502_v9 = vand.u32 2147483648, %v475_v51  ;;  %vm496_vm12 = vweird.f32 %v475_v51  ;;  %v500_v14 = vand.u32 2147483647, %v475_v51 }
 0x32d   :  { %2398 = vpow2.f32 %v2247_v54 }
 0x32e   :  { %v503_v21 = vor.u32 1.1754944e-38, %v502_v9  ;;  %vm501_vm14 = vcmp.eq.f32.partialorder %v500_v14, 8.507059e+37 }
 0x332   :  { %v2397_v55 = vpop.eup %2396 }
 0x333   :  { %v2399_v56 = vpop.eup %2398  ;;  %v492_v57 = vmul.f32 %v2397_v55, %v475_v51  ;;  %vm497_vm11 = vweird.f32 %v2397_v55 }
 0x334   :  { %v474_v59 = vadd.f32 1.0, %v2399_v56  ;;  %vm498_vm13 = vmor %vm496_vm12, %vm497_vm11 }
 0x335   :  { %v493_v60 = vsub.f32 1.0, %v492_v57 }
 0x336   :  { %2400 = vrcp.f32 %v474_v59  ;;  %v487_v30 = vand.u32 2147483648, %v474_v59  ;;  %vm481_vm1 = vweird.f32 %v474_v59  ;;  %v485_v32 = vand.u32 2147483647, %v474_v59 }
 0x337   :  { %v494_v61 = vmul.f32 %v2397_v55, %v493_v60  ;;  %2402 = vpow2.f32 %v2255_v27 }
 0x338   :  { %v488_v35 = vor.u32 1.1754944e-38, %v487_v30  ;;  %2404 = vpow2.f32 %v2256_v31  ;;  %vm486_vm3 = vcmp.eq.f32.partialorder %v485_v32, 8.507059e+37 }
 0x339   :  { %v495_v62 = vadd.f32 %v2397_v55, %v494_v61 }
 0x33b   :  { %v499_v16 = vsel %vm498_vm13, %v2397_v55, %v495_v62 }
 0x33c   :  { %v2401_v8 = vpop.eup %2400  ;;  %v3008_v24 = vsel %vm501_vm14, %v503_v21, %v499_v16 }
 0x33d   :  { %v477_v17 = vmul.f32 %v2401_v8, %v474_v59  ;;  %vm482_vm15 = vweird.f32 %v2401_v8  ;;  %v2403_v33 = vpop.eup %2402 }
 0x33e   :  { %vm483_vm2 = vmor %vm481_vm1, %vm482_vm15  ;;  %v612_v36 = vadd.f32 1.0, %v2403_v33  ;;  %v2405_v41 = vpop.eup %2404  ;;  %vm421_vm1 = vcmp.gt.s32.totalorder %v2920_v44, 1  ;;  %v3036_v33 = vsel %vm3775_vm7, %v2913_v42, 0.0  ;;  %v3050_v42 = vsel %vm3778_vm9, %v2930_v52, 0.0 }
 0x33f   :  { %v478_v26 = vsub.f32 1.0, %v477_v17  ;;  %v613_v43 = vadd.f32 1.0, %v2405_v41  ;;  %v542_v27 = vsel %vm421_vm1, 1, %v2758_v0 }
 0x340   :  { %2406 = vrcp.f32 %v612_v36  ;;  %v625_v56 = vand.u32 2147483648, %v612_v36  ;;  %vm619_vm5 = vweird.f32 %v612_v36  ;;  %v623_v57 = vand.u32 2147483647, %v612_v36 }
 0x341   :  { %v479_v28 = vmul.f32 %v2401_v8, %v478_v26  ;;  %2408 = vrcp.f32 %v613_v43  ;;  %v640_v16 = vand.u32 2147483648, %v613_v43  ;;  %vm634_vm14 = vweird.f32 %v613_v43 }
 0x342   :  { %v626_v61 = vor.u32 1.1754944e-38, %v625_v56  ;;  %vm624_vm12 = vcmp.eq.f32.partialorder %v623_v57, 8.507059e+37  ;;  %v638_v17 = vand.u32 2147483647, %v613_v43 }
 0x343   :  { %v480_v29 = vadd.f32 %v2401_v8, %v479_v28 }
 0x345   :  { %v484_v34 = vsel %vm483_vm2, %v2401_v8, %v480_v29  ;;  %vm639_vm2 = vcmp.eq.f32.partialorder %v638_v17, 8.507059e+37  ;;  %v3026_v29 = vsel %vm3777_vm6, %v2909_v38, 0.0 }
 0x346   :  { %v3012_v40 = vsel %vm486_vm3, %v488_v35, %v484_v34  ;;  %v2407_v45 = vpop.eup %2406  ;;  %v509_v34 = vmul.f32 %v3008_v24, %v3036_v33  ;;  %vm560_vm3 = vcmp.gt.s32.totalorder %v2935_v53, 6 }
 0x347   :  { %v615_v46 = vmul.f32 %v2407_v45, %v612_v36  ;;  %v2409_v49 = vpop.eup %2408  ;;  %vm620_vm4 = vweird.f32 %v2407_v45  ;;  %v508_v30 = vmul.f32 %v3012_v40, %v3026_v29 }
 0x348   :  { %v630_v51 = vmul.f32 %v2409_v49, %v613_v43  ;;  %vm621_vm11 = vmor %vm619_vm5, %vm620_vm4  ;;  %vm635_vm13 = vweird.f32 %v2409_v49  ;;  %vm559_vm4 = vcmp.gt.s32.totalorder %v2920_v44, 6  ;;  %vm422_vm5 = vcmp.gt.s32.totalorder %v2935_v53, 1 }
 0x349   :  { %v616_v47 = vsub.f32 1.0, %v615_v46  ;;  %vm636_vm15 = vmor %vm634_vm14, %vm635_vm13 }
 0x34a   :  { %v631_v55 = vsub.f32 1.0, %v630_v51 }
 0x34b   :  { %v617_v50 = vmul.f32 %v2407_v45, %v616_v47  ;;  %v3061_v47 = vsel %vm3779_vm8, %v2926_v48, 0.0  ;;  %v3072_v48 = vld [vmem:[#allocation2 + $0x10] sm:$0xff] }
 0x34c   :  { %v632_v60 = vmul.f32 %v2409_v49, %v631_v55  ;;  %v543_v55 = vsel %vm422_vm5, 1, %v2758_v0  ;;  %2262 = vmatmul.msk.bf16.vlgmr.msra.gmra.mxu2 %vm3776_vm0, %v3072_v48 }
 0x34d   :  { %v618_v54 = vadd.f32 %v2407_v45, %v617_v50  ;;  %1273 = vmatpush.bf16.msra.mxu2 %v2829_v1 }
 0x34e   :  { %v633_v14 = vadd.f32 %v2409_v49, %v632_v60 }
 0x34f   :  { %v622_v59 = vsel %vm621_vm11, %v2407_v45, %v618_v54 }
 0x350   :  { %v3016_v8 = vsel %vm624_vm12, %v626_v61, %v622_v59  ;;  %v637_v21 = vsel %vm636_vm15, %v2409_v49, %v633_v14  ;;  %v680_v49 = vsel %vm559_vm4, 1, %v2758_v0 }
 0x351   :  { %v646_v52 = vmul.f32 %v3016_v8, %v3061_v47  ;;  %1274 = vmatpush.bf16.msra.mxu2 %v2842_v5 }
 0x363   :  { %v515_v23 = vpop.permute.xlu2 %514 }
 0x364   :  { %v519_v25 = vmul.f32 %v515_v23, %v3008_v24  ;;  %v641_v23 = vor.u32 1.1754944e-38, %v640_v16 }
 0x366   :  { %524 = vrot.lane.b32.xlu0 %v519_v25, %s2760_s10  ;;  %v642_v25 = vsel %vm639_vm2, %v641_v23, %v637_v21 }
 0x367   :  { %v647_v41 = vmul.f32 %v642_v25, %v3050_v42 }
 0x373   :  { %v513_v37 = vpop.permute.xlu1 %512 }
 0x374   :  { %v518_v39 = vmul.f32 %v513_v37, %v3012_v40 }
 0x376   :  { %522 = vrot.lane.b32.xlu2 %v518_v39, %s2760_s10  ;;  %v681_v39 = vsel %vm560_vm3, 1, %v2758_v0 }
 0x393   :  { %v651_v62 = vpop.permute.xlu0 %650 }
 0x394   :  { %v656_v9 = vmul.f32 %v651_v62, %v3016_v8 }
 0x396   :  { %660 = vrot.lane.b32.xlu1 %v656_v9, %s2760_s10 }
 0x39b   :  { %v653_v26 = vpop.permute.xlu1 %652 }
 0x39c   :  { %v657_v28 = vmul.f32 %v653_v26, %v642_v25 }
 0x39e   :  { %545 = vperm.xlu1 %2350, %v542_v27   ;;  %662 = vrot.lane.b32.xlu2 %v657_v28, %s2760_s10 }
 0x3d0   :  { %v523_v31 = vpop.permute.xlu2 %522 }
 0x3d1   :  { %v3030_v32 = vadd.f32 %v523_v31, %v508_v30 }
 0x3d3   :  { %2410 = vtanh.f32 %v3030_v32 }
 0x3d8   :  { %v525_v35 = vpop.permute.xlu0 %524 }
 0x3d9   :  { %v2411_v36 = vpop.eup %2410  ;;  %v3040_v38 = vadd.f32 %v525_v35, %v509_v34 }
 0x3da   :  { %534 = vrot.lane.b32.xlu0 %v2411_v36, %s2761_s11 }
 0x3db   :  { %2412 = vtanh.f32 %v3040_v38 }
 0x3e1   :  { %v2413_v37 = vpop.eup %2412 }
 0x3e2   :  { %536 = vrot.lane.b32.xlu1 %v2413_v37, %s2761_s11 }
 0x3ea   :  { %686 = vperm.xlu1 %2350, %v681_v39  }
 0x3f8   :  { %v663_v43 = vpop.permute.xlu2 %662 }
 0x3f9   :  { %v3053_v45 = vadd.f32 %v663_v43, %v647_v41 }
 0x3fb   :  { %2414 = vtanh.f32 %v3053_v45 }
 0x401   :  { %v2415_v46 = vpop.eup %2414 }
 0x402   :  { %674 = vrot.lane.b32.xlu0 %v2415_v46, %s2761_s11 }
 0x408   :  { %v661_v50 = vpop.permute.xlu1 %660 }
 0x409   :  { %v3066_v51 = vadd.f32 %v661_v50, %v646_v52 }
 0x40a   :  { %683 = vperm.xlu0 %2349, %v680_v49  }
 0x40b   :  { %2416 = vtanh.f32 %v3066_v51 }
 0x410   :  { %v3077_v56 = vpop.permute.xlu1 %545 }
 0x411   :  { %v2417_v54 = vpop.eup %2416  ;;  %vm3781_vm11 = vcmp.eq.s32.totalorder %v3077_v56, 1 }
 0x412   :  { %672 = vrot.lane.b32.xlu2 %v2417_v54, %s2761_s11 }
 0x41a   :  { %548 = vperm.xlu2 %2351, %v543_v55  }
 0x44c   :  { %v535_v57 = vpop.permute.xlu0 %534 }
 0x44d   :  { %v540_v61 = vmul.f32 %v535_v57, %v3012_v40 }
 0x44f   :  { %v3094_v5 = vsel %vm3781_vm11, %v540_v61, %v2962_v12 }
 0x454   :  { %v537_v60 = vpop.permute.xlu1 %536 }
 0x455   :  { %v541_v62 = vmul.f32 %v537_v60, %v3008_v24 }
 0x45c   :  { %v3099_v40 = vpop.permute.xlu1 %686 }
 0x45d   :  { %vm3782_vm13 = vcmp.eq.s32.totalorder %v3099_v40, 1 }
 0x46c   :  { %v673_v59 = vpop.permute.xlu2 %672 }
 0x46d   :  { %v678_v17 = vmul.f32 %v673_v59, %v3016_v8  ;;  %v3119_v8 = vld [vmem:[#allocation2 + $0x28] sm:$0xff] }
 0x46e   :  { %2270 = vmatmul.msk.bf16.vlgmr.msra.gmra.mxu3 %vm3776_vm0, %v3119_v8 }
 0x46f   :  { %1388 = vmatpush.bf16.msra.mxu3 %v2833_v3 }
 0x473   :  { %1389 = vmatpush.bf16.msra.mxu3 %v2846_v6 }
 0x474   :  { %v3082_v9 = vpop.permute.xlu2 %548  ;;  %v675_v14 = vpop.permute.xlu0 %674 }
 0x475   :  { %vm3780_vm12 = vcmp.eq.s32.totalorder %v3082_v9, 1  ;;  %v679_v16 = vmul.f32 %v675_v14, %v642_v25  ;;  %v737_v25 = vpop.f32.mrf.mxu2 }
 0x476   :  { %v3089_v1 = vsel %vm3780_vm12, %v541_v62, %v2966_v13 }
 0x477   :  { %v699_v24 = vpack.c.bf16 %v3089_v1, %v3094_v5  ;;  %v3114_v13 = vsel %vm3782_vm13, %v679_v16, %v2985_v20 }
 0x479   :  { %701 = vrot.lane.b32.xlu2 %v699_v24, %s2762_s16 }
 0x47c   :  { %v3102_v21 = vpop.permute.xlu0 %683 }
 0x47d   :  { %vm3783_vm14 = vcmp.eq.s32.totalorder %v3102_v21, 1  ;;  %v739_v30 = vpop.f32.mrf.mxu2 }
 0x47e   :  { %v3109_v12 = vsel %vm3783_vm14, %v678_v17, %v2981_v19 }
 0x47f   :  { %v837_v23 = vpack.c.bf16 %v3114_v13, %v3109_v12 }
 0x481   :  { %839 = vrot.lane.b32.xlu0 %v837_v23, %s2762_s16 }
 0x4d3   :  { %v702_v19 = vpop.permute.xlu2 %701 }
 0x4d4   :  { %2257 = vmatmul.msk.bf16.vlgmr.msra.gmra.mxu0 %vm126_vm10, %v702_v19 }
 0x4d5   :  { %1260 = vmatpush.bf16.msra.mxu0 %v2835_v4 }
 0x4f1   :  { %v875_v35 = vpop.f32.mrf.mxu3 }
 0x4f3   :  { %v840_v20 = vpop.permute.xlu0 %839 }
 0x4f4   :  { %2265 = vmatmul.msk.bf16.vlgmr.msra.gmra.mxu1 %vm126_vm10, %v840_v20 }
 0x4f5   :  { %1375 = vmatpush.bf16.msra.mxu1 %v2831_v2 }
 0x4f9   :  { %v877_v39 = vpop.f32.mrf.mxu3 }
 0x551   :  { %v715_v26 = vpop.f32.mrf.mxu0 }
 0x552   :  { %v738_v27 = vadd.f32 %v737_v25, %v715_v26 }
 0x554   :  { %v742_v28 = vadd.f32 %v2869_v10, %v738_v27 }
 0x556   :  { %2418 = vtanh.f32 %v742_v28  ;;  %v2263_v55 = vmul.f32 -1.442695, %v742_v28 }
 0x559   :  { %v717_v3 = vpop.f32.mrf.mxu0 }
 0x55a   :  { %v740_v31 = vadd.f32 %v739_v30, %v717_v3 }
 0x55c   :  { %v2419_v6 = vpop.eup %2418  ;;  %v743_v34 = vadd.f32 %v2869_v10, %v740_v31 }
 0x55d   :  { %788 = vrot.lane.b32.xlu1 %v2419_v6, %s2759_s9 }
 0x55e   :  { %2420 = vtanh.f32 %v743_v34  ;;  %v2264_v49 = vmul.f32 -1.442695, %v743_v34 }
 0x564   :  { %v2421_v4 = vpop.eup %2420 }
 0x565   :  { %790 = vrot.lane.b32.xlu2 %v2421_v4, %s2759_s9 }
 0x571   :  { %v853_v2 = vpop.f32.mrf.mxu1 }
 0x572   :  { %v876_v36 = vadd.f32 %v875_v35, %v853_v2 }
 0x574   :  { %v880_v37 = vadd.f32 %v2875_v15, %v876_v36 }
 0x576   :  { %2422 = vtanh.f32 %v880_v37  ;;  %v2271_v30 = vmul.f32 -1.442695, %v880_v37 }
 0x579   :  { %v855_v41 = vpop.f32.mrf.mxu1 }
 0x57a   :  { %v878_v43 = vadd.f32 %v877_v39, %v855_v41 }
 0x57c   :  { %v2423_v46 = vpop.eup %2422  ;;  %v881_v52 = vadd.f32 %v2875_v15, %v878_v43 }
 0x57d   :  { %926 = vrot.lane.b32.xlu0 %v2423_v46, %s2759_s9 }
 0x57e   :  { %2424 = vtanh.f32 %v881_v52  ;;  %v2272_v34 = vmul.f32 -1.442695, %v881_v52 }
 0x57f   :  { %2426 = vpow2.f32 %v2264_v49 }
 0x584   :  { %v2425_v10 = vpop.eup %2424 }
 0x585   :  { %928 = vrot.lane.b32.xlu1 %v2425_v10, %s2759_s9  ;;  %v2427_v50 = vpop.eup %2426 }
 0x586   :  { %v751_v54 = vadd.f32 1.0, %v2427_v50 }
 0x588   :  { %2428 = vrcp.f32 %v751_v54  ;;  %v778_v16 = vand.u32 2147483648, %v751_v54  ;;  %vm772_vm1 = vweird.f32 %v751_v54  ;;  %v776_v17 = vand.u32 2147483647, %v751_v54 }
 0x589   :  { %2430 = vpow2.f32 %v2263_v55 }
 0x58a   :  { %v779_v20 = vor.u32 1.1754944e-38, %v778_v16  ;;  %vm777_vm3 = vcmp.eq.f32.partialorder %v776_v17, 8.507059e+37 }
 0x58e   :  { %v2429_v57 = vpop.eup %2428 }
 0x58f   :  { %v2431_v59 = vpop.eup %2430  ;;  %v768_v60 = vmul.f32 %v2429_v57, %v751_v54  ;;  %vm773_vm15 = vweird.f32 %v2429_v57 }
 0x590   :  { %v750_v61 = vadd.f32 1.0, %v2431_v59  ;;  %vm774_vm2 = vmor %vm772_vm1, %vm773_vm15 }
 0x591   :  { %v769_v62 = vsub.f32 1.0, %v768_v60 }
 0x592   :  { %2432 = vrcp.f32 %v750_v61  ;;  %v763_v6 = vand.u32 2147483648, %v750_v61  ;;  %vm757_vm5 = vweird.f32 %v750_v61  ;;  %v761_v4 = vand.u32 2147483647, %v750_v61 }
 0x593   :  { %v770_v15 = vmul.f32 %v2429_v57, %v769_v62  ;;  %2434 = vpow2.f32 %v2271_v30 }
 0x594   :  { %v764_v36 = vor.u32 1.1754944e-38, %v763_v6  ;;  %2436 = vpow2.f32 %v2272_v34  ;;  %vm762_vm1 = vcmp.eq.f32.partialorder %v761_v4, 8.507059e+37  ;;  %v3159_v34 = vsel %vm3781_vm11, %v3030_v32, %v3026_v29 }
 0x595   :  { %v771_v14 = vadd.f32 %v2429_v57, %v770_v15 }
 0x597   :  { %v775_v23 = vsel %vm774_vm2, %v2429_v57, %v771_v14 }
 0x598   :  { %v2433_v24 = vpop.eup %2432  ;;  %v3137_v26 = vsel %vm777_vm3, %v779_v20, %v775_v23 }
 0x599   :  { %v753_v19 = vmul.f32 %v2433_v24, %v750_v61  ;;  %vm758_vm4 = vweird.f32 %v2433_v24  ;;  %v2435_v35 = vpop.eup %2434 }
 0x59a   :  { %vm759_vm15 = vmor %vm757_vm5, %vm758_vm4  ;;  %v888_v39 = vadd.f32 1.0, %v2435_v35  ;;  %v2437_v46 = vpop.eup %2436 }
 0x59b   :  { %v754_v28 = vsub.f32 1.0, %v753_v19  ;;  %v889_v10 = vadd.f32 1.0, %v2437_v46 }
 0x59c   :  { %2438 = vrcp.f32 %v888_v39  ;;  %v901_v61 = vand.u32 2147483648, %v888_v39  ;;  %vm895_vm3 = vweird.f32 %v888_v39  ;;  %v899_v62 = vand.u32 2147483647, %v888_v39 }
 0x59d   :  { %v755_v3 = vmul.f32 %v2433_v24, %v754_v28  ;;  %2440 = vrcp.f32 %v889_v10  ;;  %v916_v20 = vand.u32 2147483648, %v889_v10 }
 0x59e   :  { %vm900_vm5 = vcmp.eq.f32.partialorder %v899_v62, 8.507059e+37 }
 0x59f   :  { %v756_v31 = vadd.f32 %v2433_v24, %v755_v3  ;;  %v917_v28 = vor.u32 1.1754944e-38, %v916_v20 }
 0x5a1   :  { %v760_v2 = vsel %vm759_vm15, %v2433_v24, %v756_v31  ;;  %v902_v24 = vor.u32 1.1754944e-38, %v901_v61 }
 0x5a2   :  { %v3141_v41 = vsel %vm762_vm1, %v764_v36, %v760_v2  ;;  %v2439_v52 = vpop.eup %2438  ;;  %vm910_vm1 = vweird.f32 %v889_v10  ;;  %v3170_v36 = vsel %vm3780_vm12, %v3040_v38, %v3036_v33  ;;  %v3185_v33 = vsel %vm3782_vm13, %v3053_v45, %v3050_v42 }
 0x5a3   :  { %v891_v49 = vmul.f32 %v2439_v52, %v888_v39  ;;  %v2441_v54 = vpop.eup %2440  ;;  %vm896_vm2 = vweird.f32 %v2439_v52  ;;  %v784_v4 = vmul.f32 %v3141_v41, %v3159_v34  ;;  %v785_v39 = vmul.f32 %v3137_v26, %v3170_v36 }
 0x5a4   :  { %v906_v57 = vmul.f32 %v2441_v54, %v889_v10  ;;  %vm897_vm4 = vmor %vm895_vm3, %vm896_vm2  ;;  %vm911_vm15 = vweird.f32 %v2441_v54  ;;  %vm697_vm2 = vcmp.gt.s32.totalorder %v2920_v44, 2 }
 0x5a5   :  { %v892_v50 = vsub.f32 1.0, %v891_v49  ;;  %vm912_vm7 = vmor %vm910_vm1, %vm911_vm15  ;;  %v818_v31 = vsel %vm697_vm2, 1, %v2758_v0 }
 0x5a6   :  { %v907_v60 = vsub.f32 1.0, %v906_v57 }
 0x5a7   :  { %v893_v55 = vmul.f32 %v2439_v52, %v892_v50  ;;  %v3198_v50 = vsel %vm3783_vm14, %v3066_v51, %v3061_v47  ;;  %v2333_v47 = vld [vmem:[#allocation2 + $0x18] sm:$0xff]  ;;  %v2610_v51 = vld [vmem:[%s3768_s2 + $0x8] sm:$0xff] }
 0x5a8   :  { %v908_v14 = vmul.f32 %v2441_v54, %v907_v60  ;;  %2278 = vmatmul.msk.bf16.vlgmr.msrb.gmra.mxu2 %vm3776_vm0, %v2333_v47  ;;  %v2611_v60 = vld [vmem:[%s3768_s2] sm:$0xff] }
 0x5a9   :  { %v894_v59 = vadd.f32 %v2439_v52, %v893_v55  ;;  %1503 = vmatpush.bf16.msrb.mxu2 %v2610_v51 }
 0x5aa   :  { %v909_v19 = vadd.f32 %v2441_v54, %v908_v14 }
 0x5ab   :  { %v898_v15 = vsel %vm897_vm4, %v2439_v52, %v894_v59  ;;  %vm835_vm4 = vcmp.gt.s32.totalorder %v2920_v44, 5 }
 0x5ac   :  { %v3145_v17 = vsel %vm900_vm5, %v902_v24, %v898_v15  ;;  %v956_v45 = vsel %vm835_vm4, 1, %v2758_v0  ;;  %vm698_vm5 = vcmp.gt.s32.totalorder %v2935_v53, 2 }
 0x5ad   :  { %v922_v42 = vmul.f32 %v3145_v17, %v3198_v50  ;;  %v819_v44 = vsel %vm698_vm5, 1, %v2758_v0  ;;  %1504 = vmatpush.bf16.msrb.mxu2 %v2611_v60 }
 0x5bf   :  { %v791_v25 = vpop.permute.xlu2 %790 }
 0x5c0   :  { %v795_v27 = vmul.f32 %v791_v25, %v3137_v26  ;;  %v914_v25 = vand.u32 2147483647, %v889_v10 }
 0x5c2   :  { %800 = vrot.lane.b32.xlu0 %v795_v27, %s2760_s10  ;;  %v913_v27 = vsel %vm912_vm7, %v2441_v54, %v909_v19  ;;  %vm915_vm3 = vcmp.eq.f32.partialorder %v914_v25, 8.507059e+37  ;;  %vm836_vm7 = vcmp.gt.s32.totalorder %v2935_v53, 5 }
 0x5c3   :  { %v3150_v30 = vsel %vm915_vm3, %v917_v28, %v913_v27  ;;  %v957_v46 = vsel %vm836_vm7, 1, %v2758_v0 }
 0x5c4   :  { %v923_v38 = vmul.f32 %v3150_v30, %v3185_v33 }
 0x5cf   :  { %v789_v37 = vpop.permute.xlu1 %788 }
 0x5d0   :  { %v794_v43 = vmul.f32 %v789_v37, %v3141_v41 }
 0x5d2   :  { %798 = vrot.lane.b32.xlu2 %v794_v43, %s2760_s10 }
 0x5ef   :  { %v927_v16 = vpop.permute.xlu0 %926 }
 0x5f0   :  { %v932_v23 = vmul.f32 %v927_v16, %v3145_v17 }
 0x5f2   :  { %936 = vrot.lane.b32.xlu1 %v932_v23, %s2760_s10 }
 0x5f7   :  { %v929_v3 = vpop.permute.xlu1 %928 }
 0x5f8   :  { %v933_v6 = vmul.f32 %v929_v3, %v3150_v30  ;;  %v3264_v3 = vld [vmem:[#allocation5] sm:$0xff] }
 0x5fa   :  { %821 = vperm.xlu1 %2350, %v818_v31   ;;  %938 = vrot.lane.b32.xlu2 %v933_v6, %s2760_s10  ;;  %v3275_v6 = vld [vmem:[#allocation8] sm:$0xff] }
 0x62c   :  { %v799_v35 = vpop.permute.xlu2 %798 }
 0x62d   :  { %v3163_v2 = vadd.f32 %v799_v35, %v784_v4  ;;  %v2617_v4 = vld [vmem:[#allocation2] sm:$0xff] }
 0x62f   :  { %2442 = vtanh.f32 %v3163_v2 }
 0x634   :  { %v801_v37 = vpop.permute.xlu0 %800 }
 0x635   :  { %v2443_v29 = vpop.eup %2442  ;;  %v3174_v32 = vadd.f32 %v801_v37, %v785_v39 }
 0x636   :  { %810 = vrot.lane.b32.xlu0 %v2443_v29, %s2761_s11 }
 0x637   :  { %2444 = vtanh.f32 %v3174_v32 }
 0x63d   :  { %v2445_v43 = vpop.eup %2444 }
 0x63e   :  { %812 = vrot.lane.b32.xlu1 %v2445_v43, %s2761_s11 }
 0x646   :  { %962 = vperm.xlu1 %2350, %v957_v46  }
 0x654   :  { %v939_v10 = vpop.permute.xlu2 %938 }
 0x655   :  { %v3189_v52 = vadd.f32 %v939_v10, %v923_v38 }
 0x657   :  { %2446 = vtanh.f32 %v3189_v52 }
 0x65d   :  { %v2447_v49 = vpop.eup %2446 }
 0x65e   :  { %950 = vrot.lane.b32.xlu0 %v2447_v49, %s2761_s11 }
 0x664   :  { %v937_v54 = vpop.permute.xlu1 %936 }
 0x665   :  { %v3203_v55 = vadd.f32 %v937_v54, %v922_v42  ;;  %v3291_v54 = vld [vmem:[%s3773_s7] ss:$0 sm:$0xff] }
 0x666   :  { %959 = vperm.xlu0 %2349, %v956_v45  }
 0x667   :  { %2448 = vtanh.f32 %v3203_v55 }
 0x66c   :  { %v3213_v59 = vpop.permute.xlu1 %821 }
 0x66d   :  { %v2449_v57 = vpop.eup %2448  ;;  %vm826_vm15 = vcmp.eq.s32.totalorder %v3213_v59, 1 }
 0x66e   :  { %948 = vrot.lane.b32.xlu2 %v2449_v57, %s2761_s11 }
 0x676   :  { %824 = vperm.xlu2 %2351, %v819_v44  }
 0x6a8   :  { %v811_v61 = vpop.permute.xlu0 %810 }
 0x6a9   :  { %v816_v15 = vmul.f32 %v811_v61, %v3141_v41 }
 0x6ab   :  { %v3232_v19 = vsel %vm826_vm15, %v816_v15, %v3094_v5 }
 0x6b0   :  { %v813_v62 = vpop.permute.xlu1 %812 }
 0x6b1   :  { %v817_v14 = vmul.f32 %v813_v62, %v3137_v26 }
 0x6b8   :  { %v3237_v41 = vpop.permute.xlu1 %962 }
 0x6b9   :  { %vm965_vm2 = vcmp.eq.s32.totalorder %v3237_v41, 1 }
 0x6c8   :  { %v949_v53 = vpop.permute.xlu2 %948 }
 0x6c9   :  { %v954_v25 = vmul.f32 %v949_v53, %v3145_v17  ;;  %v2334_v17 = vld [vmem:[#allocation2 + $0x20] sm:$0xff] }
 0x6ca   :  { %2286 = vmatmul.msk.bf16.vlgmr.msrb.gmra.mxu3 %vm3776_vm0, %v2334_v17  ;;  %2290 = vmatmul.msk.bf16.vlgmr.msra.gmra.mxu2 %vm3776_vm0, %v2334_v17 }
 0x6cb   :  { %1733 = vmatpush.bf16.msra.mxu2 %v2610_v51 }
 0x6cf   :  { %1734 = vmatpush.bf16.msra.mxu2 %v2611_v60 }
 0x6d0   :  { %v951_v24 = vpop.permute.xlu0 %950  ;;  %v3220_v16 = vpop.permute.xlu2 %824 }
 0x6d1   :  { %vm3784_vm1 = vcmp.eq.s32.totalorder %v3220_v16, 1  ;;  %v955_v20 = vmul.f32 %v951_v24, %v3150_v30  ;;  %v2612_v30 = vld [vmem:[#allocation7 + $0x8] sm:$0xff] }
 0x6d2   :  { %v3227_v23 = vsel %vm3784_vm1, %v817_v14, %v3089_v1  ;;  %1618 = vmatpush.bf16.msrb.mxu3 %v2612_v30 }
 0x6d3   :  { %v975_v26 = vpack.c.bf16 %v3227_v23, %v3232_v19  ;;  %v3253_v5 = vsel %vm965_vm2, %v955_v20, %v3114_v13 }
 0x6d5   :  { %977 = vrot.lane.b32.xlu2 %v975_v26, %s2762_s16 }
 0x6d8   :  { %v3241_v27 = vpop.permute.xlu0 %959 }
 0x6d9   :  { %vm964_vm3 = vcmp.eq.s32.totalorder %v3241_v27, 1 }
 0x6da   :  { %v3248_v1 = vsel %vm964_vm3, %v954_v25, %v3109_v12  ;;  %v2613_v12 = vld [vmem:[#allocation7] sm:$0xff]  ;;  %2294 = vmatmul.msk.bf16.vlgmr.msra.gmra.mxu3 %vm3776_vm0, %v2333_v47  ;;  %2298 = vmatmul.msk.bf16.vlgmr.msrb.gmra.mxu2 %vm3776_vm0, %v3119_v8  ;;  %v2615_v8 = vld [vmem:[#allocation2 + $0x38] sm:$0xff] }
 0x6db   :  { %v1113_v28 = vpack.c.bf16 %v3253_v5, %v3248_v1  ;;  %1619 = vmatpush.bf16.msrb.mxu3 %v2613_v12  ;;  %1963 = vmatpush.bf16.msrb.mxu2 %v2610_v51 }
 0x6dd   :  { %1115 = vrot.lane.b32.xlu0 %v1113_v28, %s2762_s16 }
 0x6df   :  { %1848 = vmatpush.bf16.msra.mxu3 %v2612_v30  ;;  %1964 = vmatpush.bf16.msrb.mxu2 %v2611_v60 }
 0x6e3   :  { %1849 = vmatpush.bf16.msra.mxu3 %v2613_v12 }
 0x6ea   :  { %2302 = vmatmul.msk.bf16.vlgmr.msrb.gmra.mxu3 %vm3776_vm0, %v3072_v48  ;;  %2306 = vmatmul.msk.bf16.vlgmr.msra.gmra.mxu2 %vm3776_vm0, %v2990_v22  ;;  %v1013_v48 = vpop.f32.mrf.mxu2 }
 0x6eb   :  { %2076 = vmatpush.bf16.msrb.mxu3 %v2612_v30 }
 0x6ef   :  { %2077 = vmatpush.bf16.msrb.mxu3 %v2613_v12 }
 0x6f2   :  { %v1015_v37 = vpop.f32.mrf.mxu2 }
 0x6fa   :  { %2310 = vmatmul.msk.bf16.vlgmr.msra.gmra.mxu3 %vm3776_vm0, %v2946_v58  ;;  %2314 = vmatmul.msk.bf16.vlgmr.msrb.gmra.mxu2 %vm3776_vm0, %v2615_v8  ;;  %v3282_v58 = vld [vmem:[%s3770_s4] ss:$0 sm:$0xff] }
 0x70a   :  { %2318 = vmatmul.msk.bf16.vlgmr.msrb.gmra.mxu3 %vm3776_vm0, %v2617_v4 }
 0x72f   :  { %v978_v13 = vpop.permute.xlu2 %977 }
 0x730   :  { %2273 = vmatmul.msk.bf16.vlgmr.msrb.gmra.mxu0 %vm126_vm10, %v978_v13 }
 0x731   :  { %1490 = vmatpush.bf16.msrb.mxu0 %v3264_v3 }
 0x74d   :  { %v1151_v49 = vpop.f32.mrf.mxu3 }
 0x74f   :  { %v1116_v31 = vpop.permute.xlu0 %1115 }
 0x750   :  { %2281 = vmatmul.msk.bf16.vlgmr.msrb.gmra.mxu1 %vm126_vm10, %v1116_v31 }
 0x751   :  { %1605 = vmatpush.bf16.msrb.mxu1 %v3275_v6 }
 0x755   :  { %v1153_v44 = vpop.f32.mrf.mxu3 }
 0x7ad   :  { %v991_v22 = vpop.f32.mrf.mxu0 }
 0x7ae   :  { %v1014_v35 = vadd.f32 %v1013_v48, %v991_v22 }
 0x7b0   :  { %v1018_v39 = vadd.f32 %v3282_v58, %v1014_v35 }
 0x7b2   :  { %2450 = vtanh.f32 %v1018_v39  ;;  %v2279_v24 = vmul.f32 -1.442695, %v1018_v39 }
 0x7b5   :  { %v993_v29 = vpop.f32.mrf.mxu0 }
 0x7b6   :  { %v1016_v43 = vadd.f32 %v1015_v37, %v993_v29 }
 0x7b8   :  { %v2451_v46 = vpop.eup %2450  ;;  %v1019_v38 = vadd.f32 %v3282_v58, %v1016_v43 }
 0x7b9   :  { %1064 = vrot.lane.b32.xlu1 %v2451_v46, %s2759_s9 }
 0x7ba   :  { %2452 = vtanh.f32 %v1019_v38  ;;  %v2280_v62 = vmul.f32 -1.442695, %v1019_v38 }
 0x7c0   :  { %v2453_v10 = vpop.eup %2452 }
 0x7c1   :  { %1066 = vrot.lane.b32.xlu2 %v2453_v10, %s2759_s9 }
 0x7cd   :  { %v1129_v42 = vpop.f32.mrf.mxu1 }
 0x7ce   :  { %v1152_v45 = vadd.f32 %v1151_v49, %v1129_v42 }
 0x7d0   :  { %v1156_v57 = vadd.f32 %v3291_v54, %v1152_v45 }
 0x7d2   :  { %2454 = vtanh.f32 %v1156_v57  ;;  %v2287_v43 = vmul.f32 -1.442695, %v1156_v57 }
 0x7d5   :  { %v1131_v47 = vpop.f32.mrf.mxu1 }
 0x7d6   :  { %v1154_v51 = vadd.f32 %v1153_v44, %v1131_v47 }
 0x7d8   :  { %v2455_v60 = vpop.eup %2454  ;;  %v1157_v61 = vadd.f32 %v3291_v54, %v1154_v51 }
 0x7d9   :  { %1202 = vrot.lane.b32.xlu0 %v2455_v60, %s2759_s9 }
 0x7da   :  { %2456 = vtanh.f32 %v1157_v61  ;;  %v2288_v49 = vmul.f32 -1.442695, %v1157_v61 }
 0x7db   :  { %2458 = vpow2.f32 %v2280_v62 }
 0x7e0   :  { %v2457_v53 = vpop.eup %2456 }
 0x7e1   :  { %1204 = vrot.lane.b32.xlu1 %v2457_v53, %s2759_s9  ;;  %v2459_v15 = vpop.eup %2458 }
 0x7e2   :  { %v1027_v14 = vadd.f32 1.0, %v2459_v15 }
 0x7e4   :  { %2460 = vrcp.f32 %v1027_v14  ;;  %v1054_v8 = vand.u32 2147483648, %v1027_v14  ;;  %vm1048_vm4 = vweird.f32 %v1027_v14  ;;  %v1052_v31 = vand.u32 2147483647, %v1027_v14 }
 0x7e5   :  { %2462 = vpow2.f32 %v2279_v24 }
 0x7e6   :  { %v1055_v22 = vor.u32 1.1754944e-38, %v1054_v8  ;;  %vm1053_vm0 = vcmp.eq.f32.partialorder %v1052_v31, 8.507059e+37 }
 0x7ea   :  { %v2461_v26 = vpop.eup %2460 }
 0x7eb   :  { %v2463_v20 = vpop.eup %2462  ;;  %v1044_v25 = vmul.f32 %v2461_v26, %v1027_v14  ;;  %vm1049_vm7 = vweird.f32 %v2461_v26 }
 0x7ec   :  { %v1026_v28 = vadd.f32 1.0, %v2463_v20  ;;  %vm1050_vm5 = vmor %vm1048_vm4, %vm1049_vm7 }
 0x7ed   :  { %v1045_v17 = vsub.f32 1.0, %v1044_v25 }
 0x7ee   :  { %2464 = vrcp.f32 %v1026_v28  ;;  %v1039_v10 = vand.u32 2147483648, %v1026_v28  ;;  %vm1033_vm7 = vweird.f32 %v1026_v28  ;;  %v1037_v42 = vand.u32 2147483647, %v1026_v28 }
 0x7ef   :  { %v1046_v30 = vmul.f32 %v2461_v26, %v1045_v17  ;;  %2466 = vpow2.f32 %v2287_v43 }
 0x7f0   :  { %v1040_v47 = vor.u32 1.1754944e-38, %v1039_v10  ;;  %2468 = vpow2.f32 %v2288_v49 }
 0x7f1   :  { %v1047_v12 = vadd.f32 %v2461_v26, %v1046_v30 }
 0x7f3   :  { %v1051_v4 = vsel %vm1050_vm5, %v2461_v26, %v1047_v12 }
 0x7f4   :  { %v2465_v13 = vpop.eup %2464  ;;  %v3297_v39 = vsel %vm1053_vm0, %v1055_v22, %v1051_v4  ;;  %vm1038_vm0 = vcmp.eq.f32.partialorder %v1037_v42, 8.507059e+37 }
 0x7f5   :  { %v1029_v48 = vmul.f32 %v2465_v13, %v1026_v28  ;;  %vm1034_vm6 = vweird.f32 %v2465_v13  ;;  %v2467_v45 = vpop.eup %2466 }
 0x7f6   :  { %vm1035_vm4 = vmor %vm1033_vm7, %vm1034_vm6  ;;  %v1164_v51 = vadd.f32 1.0, %v2467_v45  ;;  %v2469_v62 = vpop.eup %2468 }
 0x7f7   :  { %v1030_v29 = vsub.f32 1.0, %v1029_v48  ;;  %v1165_v15 = vadd.f32 1.0, %v2469_v62 }
 0x7f8   :  { %2470 = vrcp.f32 %v1164_v51  ;;  %v1177_v30 = vand.u32 2147483648, %v1164_v51  ;;  %vm1171_vm5 = vweird.f32 %v1164_v51  ;;  %v1175_v12 = vand.u32 2147483647, %v1164_v51 }
 0x7f9   :  { %v1031_v46 = vmul.f32 %v2465_v13, %v1030_v29  ;;  %2472 = vrcp.f32 %v1165_v15  ;;  %vm1186_vm9 = vweird.f32 %v1165_v15  ;;  %v1190_v29 = vand.u32 2147483647, %v1165_v15 }
 0x7fa   :  { %v1178_v31 = vor.u32 1.1754944e-38, %v1177_v30 }
 0x7fb   :  { %v1032_v38 = vadd.f32 %v2465_v13, %v1031_v46  ;;  %v2620_v46 = vld [vmem:[%s3767_s1] sm:$0xff] }
 0x7fd   :  { %v1036_v44 = vsel %vm1035_vm4, %v2465_v13, %v1032_v38  ;;  %vm1176_vm4 = vcmp.eq.f32.partialorder %v1175_v12, 8.507059e+37 }
 0x7fe   :  { %v3301_v60 = vsel %vm1038_vm0, %v1040_v47, %v1036_v44  ;;  %v2471_v61 = vpop.eup %2470  ;;  %v3318_v44 = vsel %vm826_vm15, %v3163_v2, %v3159_v34 }
 0x7ff   :  { %v1167_v14 = vmul.f32 %v2471_v61, %v1164_v51  ;;  %v2473_v26 = vpop.eup %2472  ;;  %vm1172_vm6 = vweird.f32 %v2471_v61  ;;  %v1060_v47 = vmul.f32 %v3301_v60, %v3318_v44 }
 0x800   :  { %v1182_v25 = vmul.f32 %v2473_v26, %v1165_v15  ;;  %vm1173_vm7 = vmor %vm1171_vm5, %vm1172_vm6  ;;  %vm1187_vm0 = vweird.f32 %v2473_v26  ;;  %vm973_vm6 = vcmp.gt.s32.totalorder %v2620_v46, 3  ;;  %vm1191_vm5 = vcmp.eq.f32.partialorder %v1190_v29, 8.507059e+37 }
 0x801   :  { %v1168_v24 = vsub.f32 1.0, %v1167_v14  ;;  %vm1188_vm8 = vmor %vm1186_vm9, %vm1187_vm0  ;;  %v1094_v42 = vsel %vm973_vm6, 1, %v2758_v0  ;;  %v2621_v14 = vld [vmem:[%s3767_s1 + $0x8] sm:$0xff]  ;;  %vm1111_vm9 = vcmp.gt.s32.totalorder %v2620_v46, 4 }
 0x802   :  { %v1183_v17 = vsub.f32 1.0, %v1182_v25 }
 0x803   :  { %v1169_v20 = vmul.f32 %v2471_v61, %v1168_v24 }
 0x804   :  { %v1184_v8 = vmul.f32 %v2473_v26, %v1183_v17 }
 0x805   :  { %v1170_v28 = vadd.f32 %v2471_v61, %v1169_v20 }
 0x807   :  { %v1174_v13 = vsel %vm1173_vm7, %v2471_v61, %v1170_v28  ;;  %v3357_v28 = vsel %vm964_vm3, %v3203_v55, %v3198_v50  ;;  %vm974_vm7 = vcmp.gt.s32.totalorder %v2621_v14, 3 }
 0x808   :  { %v3305_v48 = vsel %vm1176_vm4, %v1178_v31, %v1174_v13  ;;  %v1095_v13 = vsel %vm974_vm7, 1, %v2758_v0 }
 0x81b   :  { %v1067_v35 = vpop.permute.xlu2 %1066 }
 0x81c   :  { %v1071_v37 = vmul.f32 %v1067_v35, %v3297_v39  ;;  %v1185_v35 = vadd.f32 %v2473_v26, %v1184_v8 }
 0x81e   :  { %1076 = vrot.lane.b32.xlu0 %v1071_v37, %s2760_s10  ;;  %v1192_v37 = vand.u32 2147483648, %v1165_v15  ;;  %v1189_v43 = vsel %vm1188_vm8, %v2473_v26, %v1185_v35  ;;  %vm1112_vm8 = vcmp.gt.s32.totalorder %v2621_v14, 4  ;;  %v1391_v14 = vpop.f32.mrf.mxu3 }
 0x820   :  { %v1193_v38 = vor.u32 1.1754944e-38, %v1192_v37 }
 0x822   :  { %v1194_v10 = vsel %vm1191_vm5, %v1193_v38, %v1189_v43 }
 0x82b   :  { %v1065_v57 = vpop.permute.xlu1 %1064 }
 0x82c   :  { %v1070_v53 = vmul.f32 %v1065_v57, %v3301_v60 }
 0x82e   :  { %1074 = vrot.lane.b32.xlu2 %v1070_v53, %s2760_s10  ;;  %v3329_v53 = vsel %vm3784_vm1, %v3174_v32, %v3170_v36  ;;  %v1233_v36 = vsel %vm1112_vm8, 1, %v2758_v0  ;;  %v3346_v32 = vsel %vm965_vm2, %v3189_v52, %v3185_v33  ;;  %v1198_v33 = vmul.f32 %v3305_v48, %v3357_v28 }
 0x82f   :  { %v1061_v62 = vmul.f32 %v3297_v39, %v3329_v53  ;;  %v1199_v24 = vmul.f32 %v1194_v10, %v3346_v32  ;;  %v1232_v52 = vsel %vm1111_vm9, 1, %v2758_v0 }
 0x84b   :  { %v1203_v4 = vpop.permute.xlu0 %1202 }
 0x84c   :  { %v1208_v22 = vmul.f32 %v1203_v4, %v3305_v48 }
 0x84e   :  { %1212 = vrot.lane.b32.xlu1 %v1208_v22, %s2760_s10 }
 0x853   :  { %v1205_v49 = vpop.permute.xlu1 %1204 }
 0x854   :  { %v1209_v45 = vmul.f32 %v1205_v49, %v1194_v10 }
 0x856   :  { %1097 = vperm.xlu1 %2350, %v1094_v42   ;;  %1214 = vrot.lane.b32.xlu2 %v1209_v45, %s2760_s10 }
 0x888   :  { %v1075_v51 = vpop.permute.xlu2 %1074 }
 0x889   :  { %v3322_v57 = vadd.f32 %v1075_v51, %v1060_v47 }
 0x88b   :  { %2474 = vtanh.f32 %v3322_v57 }
 0x890   :  { %v1077_v15 = vpop.permute.xlu0 %1076 }
 0x891   :  { %v2475_v34 = vpop.eup %2474  ;;  %v3333_v2 = vadd.f32 %v1077_v15, %v1061_v62 }
 0x892   :  { %1086 = vrot.lane.b32.xlu0 %v2475_v34, %s2761_s11 }
 0x893   :  { %2476 = vtanh.f32 %v3333_v2 }
 0x899   :  { %v2477_v61 = vpop.eup %2476 }
 0x89a   :  { %1088 = vrot.lane.b32.xlu1 %v2477_v61, %s2761_s11 }
 0x8a2   :  { %1238 = vperm.xlu1 %2350, %v1233_v36  }
 0x8b0   :  { %v1215_v26 = vpop.permute.xlu2 %1214 }
 0x8b1   :  { %v3349_v20 = vadd.f32 %v1215_v26, %v1199_v24 }
 0x8b3   :  { %2478 = vtanh.f32 %v3349_v20 }
 0x8b9   :  { %v2479_v25 = vpop.eup %2478 }
 0x8ba   :  { %1226 = vrot.lane.b32.xlu0 %v2479_v25, %s2761_s11  ;;  %v1393_v25 = vpop.f32.mrf.mxu3 }
 0x8c0   :  { %v1213_v17 = vpop.permute.xlu1 %1212 }
 0x8c1   :  { %v3362_v30 = vadd.f32 %v1213_v17, %v1198_v33 }
 0x8c2   :  { %1235 = vperm.xlu0 %2349, %v1232_v52  }
 0x8c3   :  { %2480 = vtanh.f32 %v3362_v30 }
 0x8c8   :  { %v3367_v50 = vpop.permute.xlu1 %1097 }
 0x8c9   :  { %v2481_v12 = vpop.eup %2480  ;;  %vm1102_vm4 = vcmp.eq.s32.totalorder %v3367_v50, 1 }
 0x8ca   :  { %1224 = vrot.lane.b32.xlu2 %v2481_v12, %s2761_s11 }
 0x8d2   :  { %1100 = vperm.xlu2 %2351, %v1095_v13  }
 0x904   :  { %v1087_v55 = vpop.permute.xlu0 %1086 }
 0x905   :  { %v1092_v4 = vmul.f32 %v1087_v55, %v3301_v60 }
 0x907   :  { %v3383_v29 = vsel %vm1102_vm4, %v1092_v4, %v3232_v19 }
 0x90c   :  { %v1089_v31 = vpop.permute.xlu1 %1088 }
 0x90d   :  { %v1093_v22 = vmul.f32 %v1089_v31, %v3297_v39 }
 0x914   :  { %v3388_v60 = vpop.permute.xlu1 %1238 }
 0x915   :  { %vm1241_vm6 = vcmp.eq.s32.totalorder %v3388_v60, 1 }
 0x924   :  { %v1225_v8 = vpop.permute.xlu2 %1224 }
 0x925   :  { %v1230_v46 = vmul.f32 %v1225_v8, %v3305_v48 }
 0x92c   :  { %v1227_v35 = vpop.permute.xlu0 %1226  ;;  %v3371_v37 = vpop.permute.xlu2 %1100 }
 0x92d   :  { %vm1103_vm0 = vcmp.eq.s32.totalorder %v3371_v37, 1  ;;  %v1231_v43 = vmul.f32 %v1227_v35, %v1194_v10 }
 0x92e   :  { %v3378_v0 = vsel %vm1103_vm0, %v1093_v22, %v3227_v23 }
 0x92f   :  { %v1246_v39 = vpack.c.bf16 %v3378_v0, %v3383_v29  ;;  %v3403_v19 = vsel %vm1241_vm6, %v1231_v43, %v3253_v5 }
 0x931   :  { %1248 = vrot.lane.b32.xlu2 %v1246_v39, %s2762_s16 }
 0x934   :  { %v3391_v38 = vpop.permute.xlu0 %1235 }
 0x935   :  { %vm1240_vm5 = vcmp.eq.s32.totalorder %v3391_v38, 1 }
 0x936   :  { %v3398_v23 = vsel %vm1240_vm5, %v1230_v46, %v3248_v1  ;;  %v1276_v1 = vpop.f32.mrf.mxu2 }
 0x937   :  { %v1361_v10 = vpack.c.bf16 %v3403_v19, %v3398_v23 }
 0x939   :  { %1363 = vrot.lane.b32.xlu0 %v1361_v10, %s2762_s16 }
 0x93e   :  { %v1278_v47 = vpop.f32.mrf.mxu2 }
 0x98b   :  { %v1249_v48 = vpop.permute.xlu2 %1248 }
 0x98c   :  { %2289 = vmatmul.msk.bf16.vlgmr.msra.gmra.mxu0 %vm126_vm10, %v1249_v48 }
 0x98d   :  { %1720 = vmatpush.bf16.msra.mxu0 %v3264_v3 }
 0x9ab   :  { %v1364_v49 = vpop.permute.xlu0 %1363 }
 0x9ac   :  { %2293 = vmatmul.msk.bf16.vlgmr.msra.gmra.mxu1 %vm126_vm10, %v1364_v49 }
 0x9ad   :  { %1835 = vmatpush.bf16.msra.mxu1 %v3275_v6 }
 0xa09   :  { %v1262_v42 = vpop.f32.mrf.mxu0 }
 0xa0a   :  { %v1277_v45 = vadd.f32 %v1276_v1, %v1262_v42 }
 0xa0c   :  { %v1281_v5 = vadd.f32 %v3282_v58, %v1277_v45 }
 0xa0e   :  { %2482 = vtanh.f32 %v1281_v5  ;;  %v2291_v4 = vmul.f32 -1.442695, %v1281_v5 }
 0xa11   :  { %v1264_v51 = vpop.f32.mrf.mxu0 }
 0xa12   :  { %v1279_v62 = vadd.f32 %v1278_v47, %v1264_v51 }
 0xa14   :  { %v2483_v15 = vpop.eup %2482  ;;  %v1282_v34 = vadd.f32 %v3282_v58, %v1279_v62 }
 0xa15   :  { %1327 = vrot.lane.b32.xlu1 %v2483_v15, %s2759_s9 }
 0xa16   :  { %2484 = vtanh.f32 %v1282_v34  ;;  %v2292_v55 = vmul.f32 -1.442695, %v1282_v34 }
 0xa1c   :  { %v2485_v61 = vpop.eup %2484 }
 0xa1d   :  { %1329 = vrot.lane.b32.xlu2 %v2485_v61, %s2759_s9 }
 0xa29   :  { %v1377_v36 = vpop.f32.mrf.mxu1 }
 0xa2a   :  { %v1392_v24 = vadd.f32 %v1391_v14, %v1377_v36 }
 0xa2c   :  { %v1396_v26 = vadd.f32 %v3291_v54, %v1392_v24 }
 0xa2e   :  { %2486 = vtanh.f32 %v1396_v26  ;;  %v2295_v61 = vmul.f32 -1.442695, %v1396_v26 }
 0xa31   :  { %v1379_v33 = vpop.f32.mrf.mxu1 }
 0xa32   :  { %v1394_v52 = vadd.f32 %v1393_v25, %v1379_v33 }
 0xa34   :  { %v2487_v17 = vpop.eup %2486  ;;  %v1397_v12 = vadd.f32 %v3291_v54, %v1394_v52 }
 0xa35   :  { %1442 = vrot.lane.b32.xlu0 %v2487_v17, %s2759_s9 }
 0xa36   :  { %2488 = vtanh.f32 %v1397_v12  ;;  %v2296_v25 = vmul.f32 -1.442695, %v1397_v12 }
 0xa37   :  { %2490 = vpow2.f32 %v2292_v55 }
 0xa3c   :  { %v2489_v13 = vpop.eup %2488 }
 0xa3d   :  { %1444 = vrot.lane.b32.xlu1 %v2489_v13, %s2759_s9  ;;  %v2491_v8 = vpop.eup %2490 }
 0xa3e   :  { %v1290_v31 = vadd.f32 1.0, %v2491_v8 }
 0xa40   :  { %2492 = vrcp.f32 %v1290_v31  ;;  %v1317_v1 = vand.u32 2147483648, %v1290_v31  ;;  %vm1311_vm9 = vweird.f32 %v1290_v31  ;;  %v1315_v42 = vand.u32 2147483647, %v1290_v31 }
 0xa41   :  { %2494 = vpow2.f32 %v2291_v4 }
 0xa42   :  { %v1318_v51 = vor.u32 1.1754944e-38, %v1317_v1  ;;  %vm1316_vm12 = vcmp.eq.f32.partialorder %v1315_v42, 8.507059e+37 }
 0xa46   :  { %v2493_v22 = vpop.eup %2492 }
 0xa47   :  { %v2495_v35 = vpop.eup %2494  ;;  %v1307_v39 = vmul.f32 %v2493_v22, %v1290_v31  ;;  %vm1312_vm8 = vweird.f32 %v2493_v22 }
 0xa48   :  { %v1289_v43 = vadd.f32 1.0, %v2495_v35  ;;  %vm1313_vm7 = vmor %vm1311_vm9, %vm1312_vm8 }
 0xa49   :  { %v1308_v46 = vsub.f32 1.0, %v1307_v39 }
 0xa4a   :  { %2496 = vrcp.f32 %v1289_v43  ;;  %v1302_v24 = vand.u32 2147483648, %v1289_v43  ;;  %vm1296_vm8 = vweird.f32 %v1289_v43  ;;  %v1300_v33 = vand.u32 2147483647, %v1289_v43 }
 0xa4b   :  { %v1309_v10 = vmul.f32 %v2493_v22, %v1308_v46  ;;  %2498 = vpow2.f32 %v2295_v61 }
 0xa4c   :  { %v1303_v13 = vor.u32 1.1754944e-38, %v1302_v24  ;;  %2500 = vpow2.f32 %v2296_v25 }
 0xa4d   :  { %v1310_v48 = vadd.f32 %v2493_v22, %v1309_v10 }
 0xa4f   :  { %v1314_v45 = vsel %vm1313_vm7, %v2493_v22, %v1310_v48 }
 0xa50   :  { %v2497_v49 = vpop.eup %2496  ;;  %v3420_v62 = vsel %vm1316_vm12, %v1318_v51, %v1314_v45  ;;  %vm1301_vm12 = vcmp.eq.f32.partialorder %v1300_v33, 8.507059e+37 }
 0xa51   :  { %v1292_v47 = vmul.f32 %v2497_v49, %v1289_v43  ;;  %vm1297_vm11 = vweird.f32 %v2497_v49  ;;  %v2499_v52 = vpop.eup %2498 }
 0xa52   :  { %vm1298_vm9 = vmor %vm1296_vm8, %vm1297_vm11  ;;  %v1404_v55 = vadd.f32 1.0, %v2499_v52  ;;  %v2501_v4 = vpop.eup %2500 }
 0xa53   :  { %v1293_v34 = vsub.f32 1.0, %v1292_v47  ;;  %v1405_v22 = vadd.f32 1.0, %v2501_v4  ;;  %v3445_v4 = vsel %vm1103_vm0, %v3333_v2, %v3329_v53  ;;  %v3458_v53 = vsel %vm1241_vm6, %v3349_v20, %v3346_v32 }
 0xa54   :  { %2502 = vrcp.f32 %v1404_v55  ;;  %v1417_v1 = vand.u32 2147483648, %v1404_v55  ;;  %vm1411_vm7 = vweird.f32 %v1404_v55  ;;  %v1415_v42 = vand.u32 2147483647, %v1404_v55 }
 0xa55   :  { %v1294_v14 = vmul.f32 %v2497_v49, %v1293_v34  ;;  %2504 = vrcp.f32 %v1405_v22  ;;  %vm1426_vm13 = vweird.f32 %v1405_v22 }
 0xa56   :  { %v1418_v51 = vor.u32 1.1754944e-38, %v1417_v1 }
 0xa57   :  { %v1295_v36 = vadd.f32 %v2497_v49, %v1294_v14  ;;  %v1432_v14 = vand.u32 2147483648, %v1405_v22 }
 0xa59   :  { %v1299_v17 = vsel %vm1298_vm9, %v2497_v49, %v1295_v36  ;;  %vm1416_vm9 = vcmp.eq.f32.partialorder %v1415_v42, 8.507059e+37  ;;  %v1430_v36 = vand.u32 2147483647, %v1405_v22  ;;  %v1433_v25 = vor.u32 1.1754944e-38, %v1432_v14 }
 0xa5a   :  { %v3424_v8 = vsel %vm1301_vm12, %v1303_v13, %v1299_v17  ;;  %v2503_v12 = vpop.eup %2502  ;;  %v3434_v13 = vsel %vm1102_vm4, %v3322_v57, %v3318_v44 }
 0xa5b   :  { %v1407_v35 = vmul.f32 %v2503_v12, %v1404_v55  ;;  %v2505_v43 = vpop.eup %2504  ;;  %vm1412_vm11 = vweird.f32 %v2503_v12  ;;  %vm1431_vm1 = vcmp.eq.f32.partialorder %v1430_v36, 8.507059e+37  ;;  %v1323_v55 = vmul.f32 %v3424_v8, %v3434_v13 }
 0xa5c   :  { %v1422_v10 = vmul.f32 %v2505_v43, %v1405_v22  ;;  %vm1413_vm8 = vmor %vm1411_vm7, %vm1412_vm11  ;;  %vm1427_vm12 = vweird.f32 %v2505_v43  ;;  %v1324_v22 = vmul.f32 %v3420_v62, %v3445_v4 }
 0xa5d   :  { %v1408_v39 = vsub.f32 1.0, %v1407_v35  ;;  %vm1428_vm14 = vmor %vm1426_vm13, %vm1427_vm12 }
 0xa5e   :  { %v1423_v49 = vsub.f32 1.0, %v1422_v10  ;;  %v3469_v10 = vsel %vm1240_vm5, %v3362_v30, %v3357_v28 }
 0xa5f   :  { %v1409_v46 = vmul.f32 %v2503_v12, %v1408_v39 }
 0xa60   :  { %v1424_v47 = vmul.f32 %v2505_v43, %v1423_v49 }
 0xa61   :  { %v1410_v48 = vadd.f32 %v2503_v12, %v1409_v46 }
 0xa62   :  { %v1425_v61 = vadd.f32 %v2505_v43, %v1424_v47 }
 0xa63   :  { %v1414_v45 = vsel %vm1413_vm8, %v2503_v12, %v1410_v48 }
 0xa64   :  { %v1429_v24 = vsel %vm1428_vm14, %v2505_v43, %v1425_v61 }
 0xa65   :  { %v1434_v33 = vsel %vm1431_vm1, %v1433_v25, %v1429_v24  ;;  %v1621_v25 = vpop.f32.mrf.mxu3 }
 0xa66   :  { %v1439_v2 = vmul.f32 %v1434_v33, %v3458_v53 }
 0xa77   :  { %v1330_v5 = vpop.permute.xlu2 %1329 }
 0xa78   :  { %v1334_v15 = vmul.f32 %v1330_v5, %v3420_v62 }
 0xa7a   :  { %1339 = vrot.lane.b32.xlu0 %v1334_v15, %s2760_s10  ;;  %v1419_v15 = vsel %vm1416_vm9, %v1418_v51, %v1414_v45 }
 0xa7b   :  { %v1438_v48 = vmul.f32 %v1419_v15, %v3469_v10 }
 0xa87   :  { %v1328_v26 = vpop.permute.xlu1 %1327 }
 0xa88   :  { %v1333_v31 = vmul.f32 %v1328_v26, %v3424_v8 }
 0xa8a   :  { %1337 = vrot.lane.b32.xlu2 %v1333_v31, %s2760_s10 }
 0xaa7   :  { %v1443_v5 = vpop.permute.xlu0 %1442 }
 0xaa8   :  { %v1448_v34 = vmul.f32 %v1443_v5, %v1419_v15 }
 0xaaa   :  { %1452 = vrot.lane.b32.xlu1 %v1448_v34, %s2760_s10 }
 0xaaf   :  { %v1445_v52 = vpop.permute.xlu1 %1444 }
 0xab0   :  { %v1449_v17 = vmul.f32 %v1445_v52, %v1434_v33 }
 0xab2   :  { %1454 = vrot.lane.b32.xlu2 %v1449_v17, %s2760_s10 }
 0xae4   :  { %v1338_v26 = vpop.permute.xlu2 %1337 }
 0xae5   :  { %v3438_v31 = vadd.f32 %v1338_v26, %v1323_v55 }
 0xae7   :  { %2506 = vtanh.f32 %v3438_v31  ;;  %v3550_v50 = vsel %vm1240_vm5, %v3438_v31, %v3434_v13 }
 0xaec   :  { %v1340_v12 = vpop.permute.xlu0 %1339 }
 0xaed   :  { %v2507_v44 = vpop.eup %2506  ;;  %v3449_v57 = vadd.f32 %v1340_v12, %v1324_v22 }
 0xaee   :  { %1349 = vrot.lane.b32.xlu0 %v2507_v44, %s2761_s11 }
 0xaef   :  { %2508 = vtanh.f32 %v3449_v57 }
 0xaf5   :  { %v2509_v35 = vpop.eup %2508 }
 0xaf6   :  { %1351 = vrot.lane.b32.xlu1 %v2509_v35, %s2761_s11 }
 0xb0c   :  { %v1455_v39 = vpop.permute.xlu2 %1454 }
 0xb0d   :  { %v3461_v43 = vadd.f32 %v1455_v39, %v1439_v2 }
 0xb0f   :  { %2510 = vtanh.f32 %v3461_v43 }
 0xb15   :  { %v2511_v46 = vpop.eup %2510 }
 0xb16   :  { %1466 = vrot.lane.b32.xlu0 %v2511_v46, %s2761_s11 }
 0xb1c   :  { %v1453_v32 = vpop.permute.xlu1 %1452 }
 0xb1d   :  { %v3472_v20 = vadd.f32 %v1453_v32, %v1438_v48 }
 0xb1f   :  { %2512 = vtanh.f32 %v3472_v20 }
 0xb25   :  { %v2513_v49 = vpop.eup %2512 }
 0xb26   :  { %1464 = vrot.lane.b32.xlu2 %v2513_v49, %s2761_s11 }
 0xb60   :  { %v1350_v1 = vpop.permute.xlu0 %1349 }
 0xb61   :  { %v1355_v42 = vmul.f32 %v1350_v1, %v3424_v8 }
 0xb63   :  { %v3481_v28 = vsel %vm1240_vm5, %v1355_v42, %v3383_v29 }
 0xb68   :  { %v1352_v45 = vpop.permute.xlu1 %1351 }
 0xb69   :  { %v1356_v47 = vmul.f32 %v1352_v45, %v3420_v62 }
 0xb6b   :  { %v3486_v30 = vsel %vm1241_vm6, %v1356_v47, %v3378_v0 }
 0xb6c   :  { %v1476_v51 = vpack.c.bf16 %v3486_v30, %v3481_v28 }
 0xb6e   :  { %1478 = vrot.lane.b32.xlu1 %v1476_v51, %s2762_s16 }
 0xb80   :  { %v1465_v5 = vpop.permute.xlu2 %1464 }
 0xb81   :  { %v1470_v8 = vmul.f32 %v1465_v5, %v1419_v15 }
 0xb83   :  { %v3494_v62 = vsel %vm1102_vm4, %v1470_v8, %v3398_v23  ;;  %v1506_v23 = vpop.f32.mrf.mxu2 }
 0xb88   :  { %v1467_v34 = vpop.permute.xlu0 %1466 }
 0xb89   :  { %v1471_v61 = vmul.f32 %v1467_v34, %v1434_v33 }
 0xb8b   :  { %v3499_v29 = vsel %vm1103_vm0, %v1471_v61, %v3403_v19  ;;  %v1508_v33 = vpop.f32.mrf.mxu2 }
 0xb8c   :  { %v1591_v0 = vpack.c.bf16 %v3499_v29, %v3494_v62 }
 0xb8e   :  { %1593 = vrot.lane.b32.xlu2 %v1591_v0, %s2762_s16 }
 0xbe0   :  { %v1479_v14 = vpop.permute.xlu1 %1478 }
 0xbe1   :  { %2297 = vmatmul.msk.bf16.vlgmr.msrb.gmra.mxu0 %vm126_vm10, %v1479_v14 }
 0xbe2   :  { %1950 = vmatpush.bf16.msrb.mxu0 %v3264_v3 }
 0xbe8   :  { %v1594_v15 = vpop.permute.xlu2 %1593 }
 0xbe9   :  { %2301 = vmatmul.msk.bf16.vlgmr.msrb.gmra.mxu1 %vm126_vm10, %v1594_v15 }
 0xbea   :  { %2063 = vmatpush.bf16.msrb.mxu1 %v3275_v6  ;;  %v1623_v6 = vpop.f32.mrf.mxu3 }
 0xc5e   :  { %v1492_v36 = vpop.f32.mrf.mxu0 }
 0xc5f   :  { %v1507_v24 = vadd.f32 %v1506_v23, %v1492_v36 }
 0xc61   :  { %v1511_v19 = vadd.f32 %v3282_v58, %v1507_v24 }
 0xc63   :  { %2514 = vtanh.f32 %v1511_v19  ;;  %v2299_v1 = vmul.f32 -1.442695, %v1511_v19 }
 0xc66   :  { %v1494_v52 = vpop.f32.mrf.mxu0  ;;  %v1607_v17 = vpop.f32.mrf.mxu1 }
 0xc67   :  { %v1509_v55 = vadd.f32 %v1508_v33, %v1494_v52  ;;  %v1622_v26 = vadd.f32 %v1621_v25, %v1607_v17 }
 0xc69   :  { %v2515_v22 = vpop.eup %2514  ;;  %v1512_v3 = vadd.f32 %v3282_v58, %v1509_v55  ;;  %v1626_v12 = vadd.f32 %v3291_v54, %v1622_v26 }
 0xc6a   :  { %1557 = vrot.lane.b32.xlu0 %v2515_v22, %s2759_s9 }
 0xc6b   :  { %2516 = vtanh.f32 %v1512_v3  ;;  %v2303_v58 = vmul.f32 -1.442695, %v1626_v12  ;;  %v2300_v45 = vmul.f32 -1.442695, %v1512_v3 }
 0xc6c   :  { %2518 = vtanh.f32 %v1626_v12 }
 0xc6e   :  { %v1609_v44 = vpop.f32.mrf.mxu1 }
 0xc6f   :  { %v1624_v35 = vadd.f32 %v1623_v6, %v1609_v44 }
 0xc71   :  { %v2517_v2 = vpop.eup %2516  ;;  %v1627_v39 = vadd.f32 %v3291_v54, %v1624_v35 }
 0xc72   :  { %v2519_v46 = vpop.eup %2518  ;;  %1559 = vrot.lane.b32.xlu1 %v2517_v2, %s2759_s9 }
 0xc73   :  { %2520 = vtanh.f32 %v1627_v39  ;;  %1672 = vrot.lane.b32.xlu2 %v2519_v46, %s2759_s9  ;;  %v2304_v8 = vmul.f32 -1.442695, %v1627_v39 }
 0xc74   :  { %2522 = vpow2.f32 %v2303_v58 }
 0xc79   :  { %v2521_v48 = vpop.eup %2520 }
 0xc7a   :  { %1674 = vrot.lane.b32.xlu0 %v2521_v48, %s2759_s9  ;;  %v2523_v32 = vpop.eup %2522 }
 0xc7b   :  { %v1634_v49 = vadd.f32 1.0, %v2523_v32 }
 0xc7d   :  { %2524 = vrcp.f32 %v1634_v49  ;;  %v1647_v23 = vand.u32 2147483648, %v1634_v49  ;;  %vm1641_vm14 = vweird.f32 %v1634_v49  ;;  %v1645_v36 = vand.u32 2147483647, %v1634_v49 }
 0xc7e   :  { %2526 = vpow2.f32 %v2299_v1 }
 0xc7f   :  { %2528 = vpow2.f32 %v2300_v45  ;;  %v1648_v33 = vor.u32 1.1754944e-38, %v1647_v23  ;;  %vm1646_vm11 = vcmp.eq.f32.partialorder %v1645_v36, 8.507059e+37 }
 0xc83   :  { %v2525_v42 = vpop.eup %2524 }
 0xc84   :  { %v2527_v47 = vpop.eup %2526  ;;  %v1637_v54 = vmul.f32 %v2525_v42, %v1634_v49  ;;  %vm1642_vm13 = vweird.f32 %v2525_v42 }
 0xc85   :  { %v1519_v51 = vadd.f32 1.0, %v2527_v47  ;;  %v2529_v34 = vpop.eup %2528  ;;  %vm1643_vm1 = vmor %vm1641_vm14, %vm1642_vm13 }
 0xc86   :  { %v1638_v5 = vsub.f32 1.0, %v1637_v54  ;;  %v1520_v0 = vadd.f32 1.0, %v2529_v34 }
 0xc87   :  { %2530 = vrcp.f32 %v1519_v51  ;;  %v1532_v39 = vand.u32 2147483648, %v1519_v51  ;;  %vm1526_vm8 = vweird.f32 %v1519_v51  ;;  %v1530_v46 = vand.u32 2147483647, %v1519_v51 }
 0xc88   :  { %v1639_v61 = vmul.f32 %v2525_v42, %v1638_v5  ;;  %2532 = vpow2.f32 %v2304_v8  ;;  %v1547_v5 = vand.u32 2147483648, %v1520_v0  ;;  %vm1541_vm14 = vweird.f32 %v1520_v0 }
 0xc89   :  { %2534 = vrcp.f32 %v1520_v0  ;;  %v1533_v49 = vor.u32 1.1754944e-38, %v1532_v39  ;;  %vm1531_vm12 = vcmp.eq.f32.partialorder %v1530_v46, 8.507059e+37  ;;  %v1545_v8 = vand.u32 2147483647, %v1520_v0 }
 0xc8a   :  { %v1640_v15 = vadd.f32 %v2525_v42, %v1639_v61  ;;  %v1548_v61 = vor.u32 1.1754944e-38, %v1547_v5  ;;  %v3561_v46 = vsel %vm1103_vm0, %v3461_v43, %v3458_v53 }
 0xc8c   :  { %v1644_v25 = vsel %vm1643_vm1, %v2525_v42, %v1640_v15 }
 0xc8d   :  { %v2531_v14 = vpop.eup %2530  ;;  %v3516_v55 = vsel %vm1646_vm11, %v1648_v33, %v1644_v25  ;;  %vm1546_vm11 = vcmp.eq.f32.partialorder %v1545_v8, 8.507059e+37 }
 0xc8e   :  { %v2533_v24 = vpop.eup %2532  ;;  %v1522_v19 = vmul.f32 %v2531_v14, %v1519_v51  ;;  %vm1527_vm7 = vweird.f32 %v2531_v14 }
 0xc8f   :  { %v1635_v52 = vadd.f32 1.0, %v2533_v24  ;;  %v2535_v22 = vpop.eup %2534  ;;  %vm1528_vm9 = vmor %vm1526_vm8, %vm1527_vm7 }
 0xc90   :  { %v1523_v26 = vsub.f32 1.0, %v1522_v19  ;;  %v1537_v6 = vmul.f32 %v2535_v22, %v1520_v0  ;;  %vm1542_vm13 = vweird.f32 %v2535_v22 }
 0xc91   :  { %2536 = vrcp.f32 %v1635_v52  ;;  %vm1543_vm1 = vmor %vm1541_vm14, %vm1542_vm13  ;;  %v1662_v24 = vand.u32 2147483648, %v1635_v52  ;;  %vm1656_vm8 = vweird.f32 %v1635_v52  ;;  %v1660_v19 = vand.u32 2147483647, %v1635_v52 }
 0xc92   :  { %v1524_v12 = vmul.f32 %v2531_v14, %v1523_v26  ;;  %v1538_v35 = vsub.f32 1.0, %v1537_v6 }
 0xc93   :  { %v1663_v33 = vor.u32 1.1754944e-38, %v1662_v24 }
 0xc94   :  { %v1525_v44 = vadd.f32 %v2531_v14, %v1524_v12  ;;  %v1539_v58 = vmul.f32 %v2535_v22, %v1538_v35 }
 0xc96   :  { %v1529_v48 = vsel %vm1528_vm9, %v2531_v14, %v1525_v44  ;;  %v1540_v47 = vadd.f32 %v2535_v22, %v1539_v58 }
 0xc97   :  { %v2537_v2 = vpop.eup %2536  ;;  %v1534_v42 = vsel %vm1531_vm12, %v1533_v49, %v1529_v48  ;;  %vm1661_vm12 = vcmp.eq.f32.partialorder %v1660_v19, 8.507059e+37 }
 0xc98   :  { %v1652_v32 = vmul.f32 %v2537_v2, %v1635_v52  ;;  %v1544_v34 = vsel %vm1543_vm1, %v2535_v22, %v1540_v47  ;;  %vm1657_vm7 = vweird.f32 %v2537_v2  ;;  %v3527_v22 = vsel %vm1241_vm6, %v3449_v57, %v3445_v4 }
 0xc99   :  { %v1549_v15 = vsel %vm1546_vm11, %v1548_v61, %v1544_v34  ;;  %vm1658_vm9 = vmor %vm1656_vm8, %vm1657_vm7  ;;  %v3533_v52 = vsel %vm1102_vm4, %v3472_v20, %v3469_v10  ;;  %v1553_v57 = vmul.f32 %v1534_v42, %v3550_v50  ;;  %vm3785_vm4 = vcmp.eq.s32.totalorder %v3220_v16, 1  ;;  %v1736_v34 = vpop.f32.mrf.mxu2  ;;  %v3600_v61 = vld [vmem:[%s3770_s4] ss:$0 sm:$0xff]  ;;  %s2763_s4 = smov [#allocation10]  }
 0xc9a   :  { %v1653_v54 = vsub.f32 1.0, %v1652_v32  ;;  %v1668_v12 = vmul.f32 %v3516_v55, %v3533_v52 }
 0xc9c   :  { %v1654_v51 = vmul.f32 %v2537_v2, %v1653_v54 }
 0xc9e   :  { %v1655_v36 = vadd.f32 %v2537_v2, %v1654_v51 }
 0xca0   :  { %v1659_v25 = vsel %vm1658_vm9, %v2537_v2, %v1655_v36 }
 0xca1   :  { %v1664_v0 = vsel %vm1661_vm12, %v1663_v33, %v1659_v25 }
 0xca2   :  { %v1669_v38 = vmul.f32 %v1664_v0, %v3561_v46 }
 0xccd   :  { %v1673_v17 = vpop.permute.xlu2 %1672 }
 0xcce   :  { %v1678_v3 = vmul.f32 %v1673_v17, %v3516_v55 }
 0xcd0   :  { %1682 = vrot.lane.b32.xlu0 %v1678_v3, %s2760_s10  ;;  %v1554_v3 = vmul.f32 %v1549_v15, %v3527_v22 }
 0xcdc   :  { %v1558_v1 = vpop.permute.xlu0 %1557 }
 0xcdd   :  { %v1563_v45 = vmul.f32 %v1558_v1, %v1534_v42 }
 0xcdf   :  { %1567 = vrot.lane.b32.xlu1 %v1563_v45, %s2760_s10 }
 0xce4   :  { %v1560_v14 = vpop.permute.xlu1 %1559 }
 0xce5   :  { %v1564_v23 = vmul.f32 %v1560_v14, %v1549_v15  ;;  %v1851_v14 = vpop.f32.mrf.mxu3 }
 0xce7   :  { %1569 = vrot.lane.b32.xlu2 %v1564_v23, %s2760_s10 }
 0xcec   :  { %v1675_v17 = vpop.permute.xlu0 %1674 }
 0xced   :  { %v1679_v26 = vmul.f32 %v1675_v17, %v1664_v0 }
 0xcef   :  { %1684 = vrot.lane.b32.xlu1 %v1679_v26, %s2760_s10  ;;  %v1853_v26 = vpop.f32.mrf.mxu3 }
 0xd41   :  { %v1570_v6 = vpop.permute.xlu2 %1569 }
 0xd42   :  { %v1683_v44 = vpop.permute.xlu0 %1682  ;;  %v3538_v35 = vadd.f32 %v1570_v6, %v1554_v3 }
 0xd43   :  { %v3540_v2 = vadd.f32 %v1683_v44, %v1668_v12 }
 0xd44   :  { %2538 = vtanh.f32 %v3538_v35 }
 0xd45   :  { %2540 = vtanh.f32 %v3540_v2 }
 0xd4a   :  { %v2539_v60 = vpop.eup %2538 }
 0xd4b   :  { %v2541_v4 = vpop.eup %2540  ;;  %1581 = vrot.lane.b32.xlu0 %v2539_v60, %s2761_s11 }
 0xd4c   :  { %1694 = vrot.lane.b32.xlu1 %v2541_v4, %s2761_s11 }
 0xd51   :  { %v1568_v10 = vpop.permute.xlu1 %1567 }
 0xd52   :  { %v3553_v20 = vadd.f32 %v1568_v10, %v1553_v57 }
 0xd54   :  { %2542 = vtanh.f32 %v3553_v20 }
 0xd5a   :  { %v2543_v39 = vpop.eup %2542 }
 0xd5b   :  { %1579 = vrot.lane.b32.xlu2 %v2543_v39, %s2761_s11 }
 0xd61   :  { %v1685_v13 = vpop.permute.xlu1 %1684 }
 0xd62   :  { %v3564_v31 = vadd.f32 %v1685_v13, %v1669_v38 }
 0xd64   :  { %2544 = vtanh.f32 %v3564_v31 }
 0xd6a   :  { %v2545_v48 = vpop.eup %2544 }
 0xd6b   :  { %1696 = vrot.lane.b32.xlu2 %v2545_v48, %s2761_s11 }
 0xdb5   :  { %v1580_v58 = vpop.permute.xlu2 %1579 }
 0xdb6   :  { %v1585_v32 = vmul.f32 %v1580_v58, %v1534_v42 }
 0xdb8   :  { %v3571_v37 = vsel %vm964_vm3, %v1585_v32, %v3481_v28 }
 0xdbd   :  { %v1582_v49 = vpop.permute.xlu0 %1581 }
 0xdbe   :  { %v1586_v1 = vmul.f32 %v1582_v49, %v1549_v15  ;;  %v1695_v43 = vpop.permute.xlu1 %1694  ;;  %v1738_v15 = vpop.f32.mrf.mxu2 }
 0xdbf   :  { %v1700_v42 = vmul.f32 %v1695_v43, %v3516_v55 }
 0xdc0   :  { %v3576_v53 = vsel %vm965_vm2, %v1586_v1, %v3486_v30 }
 0xdc1   :  { %v1706_v45 = vpack.c.bf16 %v3576_v53, %v3571_v37  ;;  %v3585_v28 = vsel %vm826_vm15, %v1700_v42, %v3494_v62 }
 0xdc3   :  { %1708 = vrot.lane.b32.xlu0 %v1706_v45, %s2762_s16 }
 0xdc5   :  { %v1697_v47 = vpop.permute.xlu2 %1696 }
 0xdc6   :  { %v1701_v54 = vmul.f32 %v1697_v47, %v1664_v0  ;;  %v3607_v0 = vld [vmem:[%s3773_s7] ss:$0 sm:$0xff]  ;;  %s2186_s7 = sshll.u32 %s2763_s4, 4  ;;  %s2187_s7 = int_to_ptr.vmem [resolvable:$true] %s2186_s7 }
 0xdc8   :  { %v3590_v30 = vsel %vm3785_vm4, %v1701_v54, %v3499_v29 }
 0xdc9   :  { %v1821_v5 = vpack.c.bf16 %v3590_v30, %v3585_v28 }
 0xdcb   :  { %1823 = vrot.lane.b32.xlu1 %v1821_v5, %s2762_s16 }
 0xe35   :  { %v1709_v8 = vpop.permute.xlu0 %1708 }
 0xe36   :  { %2305 = vmatmul.msk.bf16.vlgmr.msra.gmra.mxu0 %vm126_vm10, %v1709_v8 }
 0xe3d   :  { %v1824_v55 = vpop.permute.xlu1 %1823 }
 0xe3e   :  { %2309 = vmatmul.msk.bf16.vlgmr.msra.gmra.mxu1 %vm126_vm10, %v1824_v55 }
 0xeb3   :  { %v1722_v51 = vpop.f32.mrf.mxu0 }
 0xeb4   :  { %v1737_v62 = vadd.f32 %v1736_v34, %v1722_v51 }
 0xeb6   :  { %v1741_v29 = vadd.f32 %v3600_v61, %v1737_v62 }
 0xeb8   :  { %2546 = vtanh.f32 %v1741_v29  ;;  %v2307_v57 = vmul.f32 -1.442695, %v1741_v29 }
 0xebb   :  { %v1724_v23 = vpop.f32.mrf.mxu0  ;;  %v1837_v36 = vpop.f32.mrf.mxu1 }
 0xebc   :  { %v1739_v24 = vadd.f32 %v1738_v15, %v1724_v23  ;;  %v1852_v19 = vadd.f32 %v1851_v14, %v1837_v36 }
 0xebe   :  { %v2547_v25 = vpop.eup %2546  ;;  %v1742_v33 = vadd.f32 %v3600_v61, %v1739_v24  ;;  %v1856_v17 = vadd.f32 %v3607_v0, %v1852_v19 }
 0xebf   :  { %1787 = vrot.lane.b32.xlu2 %v2547_v25, %s2759_s9 }
 0xec0   :  { %2548 = vtanh.f32 %v1742_v33  ;;  %v2308_v1 = vmul.f32 -1.442695, %v1742_v33  ;;  %v2311_v43 = vmul.f32 -1.442695, %v1856_v17 }
 0xec1   :  { %2550 = vtanh.f32 %v1856_v17 }
 0xec3   :  { %v1839_v3 = vpop.f32.mrf.mxu1 }
 0xec4   :  { %v1854_v12 = vadd.f32 %v1853_v26, %v1839_v3 }
 0xec6   :  { %v2549_v6 = vpop.eup %2548  ;;  %v1857_v44 = vadd.f32 %v3607_v0, %v1854_v12 }
 0xec7   :  { %v2551_v60 = vpop.eup %2550  ;;  %1789 = vrot.lane.b32.xlu0 %v2549_v6, %s2759_s9 }
 0xec8   :  { %2552 = vtanh.f32 %v1857_v44  ;;  %1902 = vrot.lane.b32.xlu1 %v2551_v60, %s2759_s9  ;;  %v2312_v38 = vmul.f32 -1.442695, %v1857_v44 }
 0xec9   :  { %2554 = vpow2.f32 %v2307_v57 }
 0xece   :  { %v2553_v4 = vpop.eup %2552 }
 0xecf   :  { %1904 = vrot.lane.b32.xlu2 %v2553_v4, %s2759_s9  ;;  %v2555_v10 = vpop.eup %2554 }
 0xed0   :  { %v1749_v39 = vadd.f32 1.0, %v2555_v10 }
 0xed2   :  { %2556 = vrcp.f32 %v1749_v39  ;;  %v1762_v54 = vand.u32 2147483648, %v1749_v39  ;;  %vm1756_vm6 = vweird.f32 %v1749_v39  ;;  %v1760_v5 = vand.u32 2147483647, %v1749_v39 }
 0xed3   :  { %2558 = vpow2.f32 %v2312_v38 }
 0xed4   :  { %v1763_v62 = vor.u32 1.1754944e-38, %v1762_v54  ;;  %vm1761_vm13 = vcmp.eq.f32.partialorder %v1760_v5, 8.507059e+37 }
 0xed8   :  { %v2557_v13 = vpop.eup %2556 }
 0xed9   :  { %v2559_v48 = vpop.eup %2558  ;;  %v1752_v58 = vmul.f32 %v2557_v13, %v1749_v39  ;;  %vm1757_vm0 = vweird.f32 %v2557_v13 }
 0xeda   :  { %v1865_v32 = vadd.f32 1.0, %v2559_v48  ;;  %vm1758_vm5 = vmor %vm1756_vm6, %vm1757_vm0 }
 0xedb   :  { %v1753_v49 = vsub.f32 1.0, %v1752_v58 }
 0xedc   :  { %2560 = vrcp.f32 %v1865_v32  ;;  %v1892_v17 = vand.u32 2147483648, %v1865_v32  ;;  %vm1886_vm1 = vweird.f32 %v1865_v32  ;;  %v1890_v3 = vand.u32 2147483647, %v1865_v32 }
 0xedd   :  { %v1754_v45 = vmul.f32 %v2557_v13, %v1753_v49  ;;  %2562 = vpow2.f32 %v2308_v1 }
 0xede   :  { %2564 = vpow2.f32 %v2311_v43  ;;  %v1893_v44 = vor.u32 1.1754944e-38, %v1892_v17  ;;  %vm1891_vm7 = vcmp.eq.f32.partialorder %v1890_v3, 8.507059e+37 }
 0xedf   :  { %v1755_v42 = vadd.f32 %v2557_v13, %v1754_v45 }
 0xee1   :  { %v1759_v55 = vsel %vm1758_vm5, %v2557_v13, %v1755_v42 }
 0xee2   :  { %v2561_v47 = vpop.eup %2560  ;;  %v3615_v15 = vsel %vm1761_vm13, %v1763_v62, %v1759_v55 }
 0xee3   :  { %v2563_v8 = vpop.eup %2562  ;;  %v1882_v34 = vmul.f32 %v2561_v47, %v1865_v32  ;;  %vm1887_vm14 = vweird.f32 %v2561_v47 }
 0xee4   :  { %v2565_v51 = vpop.eup %2564  ;;  %v1750_v29 = vadd.f32 1.0, %v2563_v8  ;;  %vm1888_vm11 = vmor %vm1886_vm1, %vm1887_vm14  ;;  %vm3789_vm14 = vcmp.eq.s32.totalorder %v3077_v56, 1  ;;  %vm3790_vm1 = vcmp.eq.s32.totalorder %v3082_v9, 1 }
 0xee5   :  { %v1864_v23 = vadd.f32 1.0, %v2565_v51  ;;  %v1883_v24 = vsub.f32 1.0, %v1882_v34 }
 0xee6   :  { %2566 = vrcp.f32 %v1750_v29  ;;  %v1777_v49 = vand.u32 2147483648, %v1750_v29  ;;  %vm1771_vm12 = vweird.f32 %v1750_v29  ;;  %v1775_v43 = vand.u32 2147483647, %v1750_v29 }
 0xee7   :  { %2568 = vrcp.f32 %v1864_v23  ;;  %v1884_v19 = vmul.f32 %v2561_v47, %v1883_v24  ;;  %v1877_v1 = vand.u32 2147483648, %v1864_v23  ;;  %vm1871_vm4 = vweird.f32 %v1864_v23 }
 0xee8   :  { %v1875_v45 = vand.u32 2147483647, %v1864_v23  ;;  %v1778_v54 = vor.u32 1.1754944e-38, %v1777_v49  ;;  %vm1776_vm5 = vcmp.eq.f32.partialorder %v1775_v43, 8.507059e+37 }
 0xee9   :  { %v1885_v25 = vadd.f32 %v2561_v47, %v1884_v19  ;;  %v1878_v5 = vor.u32 1.1754944e-38, %v1877_v1  ;;  %v3640_v19 = vsel %vm826_vm15, %v3540_v2, %v3533_v52  ;;  %vm3787_vm15 = vcmp.eq.s32.totalorder %v3102_v21, 1 }
 0xeea   :  { %vm1876_vm13 = vcmp.eq.f32.partialorder %v1875_v45, 8.507059e+37 }
 0xeeb   :  { %v1889_v12 = vsel %vm1888_vm11, %v2561_v47, %v1885_v25 }
 0xeec   :  { %v2567_v33 = vpop.eup %2566  ;;  %v3619_v4 = vsel %vm1891_vm7, %v1893_v44, %v1889_v12 }
 0xeed   :  { %v2569_v26 = vpop.eup %2568  ;;  %v1767_v6 = vmul.f32 %v2567_v33, %v1750_v29  ;;  %vm1772_vm8 = vweird.f32 %v2567_v33  ;;  %v3629_v29 = vsel %vm964_vm3, %v3553_v20, %v3550_v50  ;;  %vm3786_vm3 = vcmp.eq.s32.totalorder %v3220_v16, 1 }
 0xeee   :  { %v1867_v60 = vmul.f32 %v2569_v26, %v1864_v23  ;;  %vm1872_vm9 = vweird.f32 %v2569_v26  ;;  %vm1773_vm0 = vmor %vm1771_vm12, %vm1772_vm8  ;;  %v1783_v23 = vmul.f32 %v3615_v15, %v3629_v29  ;;  %v3651_v20 = vsel %vm3786_vm3, %v3564_v31, %v3561_v46 }
 0xeef   :  { %v1768_v39 = vsub.f32 1.0, %v1767_v6  ;;  %vm1873_vm6 = vmor %vm1871_vm4, %vm1872_vm9  ;;  %v1899_v59 = vmul.f32 %v3619_v4, %v3651_v20  ;;  %v3664_v16 = vsel %vm965_vm2, %v3538_v35, %v3527_v22  ;;  %vm3788_vm2 = vcmp.eq.s32.totalorder %v3099_v40, 1 }
 0xef0   :  { %v1868_v38 = vsub.f32 1.0, %v1867_v60 }
 0xef1   :  { %v1769_v13 = vmul.f32 %v2567_v33, %v1768_v39 }
 0xef2   :  { %v1869_v48 = vmul.f32 %v2569_v26, %v1868_v38 }
 0xef3   :  { %v1770_v58 = vadd.f32 %v2567_v33, %v1769_v13 }
 0xef4   :  { %v1870_v32 = vadd.f32 %v2569_v26, %v1869_v48 }
 0xef5   :  { %v1774_v42 = vsel %vm1773_vm0, %v2567_v33, %v1770_v58 }
 0xef6   :  { %v1874_v47 = vsel %vm1873_vm6, %v2569_v26, %v1870_v32  ;;  %v1779_v55 = vsel %vm1776_vm5, %v1778_v54, %v1774_v42  ;;  %v2079_v54 = vpop.f32.mrf.mxu3 }
 0xef7   :  { %v1879_v51 = vsel %vm1876_vm13, %v1878_v5, %v1874_v47  ;;  %v1784_v46 = vmul.f32 %v1779_v55, %v3664_v16 }
 0xef8   :  { %v1898_v25 = vmul.f32 %v1879_v51, %v3640_v19 }
 0xf19   :  { %v1788_v14 = vpop.permute.xlu2 %1787 }
 0xf1a   :  { %v1793_v36 = vmul.f32 %v1788_v14, %v3615_v15 }
 0xf1c   :  { %1797 = vrot.lane.b32.xlu0 %v1793_v36, %s2760_s10 }
 0xf29   :  { %v1905_v57 = vpop.permute.xlu2 %1904 }
 0xf2a   :  { %v1909_v10 = vmul.f32 %v1905_v57, %v3619_v4 }
 0xf2c   :  { %1914 = vrot.lane.b32.xlu0 %v1909_v10, %s2760_s10 }
 0xf39   :  { %v1790_v8 = vpop.permute.xlu0 %1789 }
 0xf3a   :  { %v1903_v34 = vpop.permute.xlu1 %1902  ;;  %v1794_v62 = vmul.f32 %v1790_v8, %v1779_v55 }
 0xf3b   :  { %v1908_v14 = vmul.f32 %v1903_v34, %v1879_v51  ;;  %v2081_v34 = vpop.f32.mrf.mxu3 }
 0xf3c   :  { %1799 = vrot.lane.b32.xlu1 %v1794_v62, %s2760_s10 }
 0xf3d   :  { %1912 = vrot.lane.b32.xlu2 %v1908_v14, %s2760_s10 }
 0xf8e   :  { %v1798_v36 = vpop.permute.xlu0 %1797 }
 0xf8f   :  { %v3633_v24 = vadd.f32 %v1798_v36, %v1783_v23 }
 0xf91   :  { %2570 = vtanh.f32 %v3633_v24 }
 0xf97   :  { %v2571_v33 = vpop.eup %2570  ;;  %v1913_v27 = vpop.permute.xlu2 %1912 }
 0xf98   :  { %v3643_v50 = vadd.f32 %v1913_v27, %v1898_v25  ;;  %1809 = vrot.lane.b32.xlu1 %v2571_v33, %s2761_s11 }
 0xf9a   :  { %2572 = vtanh.f32 %v3643_v50 }
 0xf9e   :  { %v1915_v52 = vpop.permute.xlu0 %1914 }
 0xf9f   :  { %v3655_v2 = vadd.f32 %v1915_v52, %v1899_v59 }
 0xfa0   :  { %v2573_v17 = vpop.eup %2572 }
 0xfa1   :  { %2574 = vtanh.f32 %v3655_v2  ;;  %1924 = vrot.lane.b32.xlu0 %v2573_v17, %s2761_s11 }
 0xfa7   :  { %v2575_v26 = vpop.eup %2574 }
 0xfa8   :  { %1926 = vrot.lane.b32.xlu1 %v2575_v26, %s2761_s11 }
 0xfae   :  { %v1800_v31 = vpop.permute.xlu1 %1799 }
 0xfaf   :  { %v3667_v3 = vadd.f32 %v1800_v31, %v1784_v46 }
 0xfb1   :  { %2576 = vtanh.f32 %v3667_v3 }
 0xfb7   :  { %v2577_v12 = vpop.eup %2576 }
 0xfb8   :  { %1811 = vrot.lane.b32.xlu2 %v2577_v12, %s2761_s11 }
0x100a   :  { %v1810_v6 = vpop.permute.xlu1 %1809 }
0x100b   :  { %v1815_v44 = vmul.f32 %v1810_v6, %v3615_v15 }
0x100d   :  { %v3675_v41 = vsel %vm3787_vm15, %v1815_v44, %v3571_v37 }
0x1012   :  { %v1812_v60 = vpop.permute.xlu2 %1811 }
0x1013   :  { %v1816_v57 = vmul.f32 %v1812_v60, %v1779_v55  ;;  %v1925_v35 = vpop.permute.xlu0 %1924 }
0x1014   :  { %v1930_v39 = vmul.f32 %v1925_v35, %v1879_v51 }
0x1015   :  { %v3680_v22 = vsel %vm3788_vm2, %v1816_v57, %v3576_v53 }
0x1016   :  { %v1936_v10 = vpack.c.bf16 %v3680_v22, %v3675_v41  ;;  %v3689_v37 = vsel %vm3789_vm14, %v1930_v39, %v3585_v28 }
0x1018   :  { %1938 = vrot.lane.b32.xlu2 %v1936_v10, %s2762_s16 }
0x101a   :  { %v1927_v15 = vpop.permute.xlu1 %1926 }
0x101b   :  { %v1931_v38 = vmul.f32 %v1927_v15, %v3619_v4  ;;  %v1966_v4 = vpop.f32.mrf.mxu2 }
0x101d   :  { %v3694_v53 = vsel %vm3790_vm1, %v1931_v38, %v3590_v30 }
0x101e   :  { %v2049_v13 = vpack.c.bf16 %v3694_v53, %v3689_v37 }
0x1020   :  { %2051 = vrot.lane.b32.xlu0 %v2049_v13, %s2762_s16 }
0x1023   :  { %v1968_v1 = vpop.f32.mrf.mxu2 }
0x1072   :  { %v1939_v48 = vpop.permute.xlu2 %1938 }
0x1073   :  { %2313 = vmatmul.msk.bf16.vlgmr.msrb.gmra.mxu0 %vm126_vm10, %v1939_v48 }
0x1092   :  { %v2052_v58 = vpop.permute.xlu0 %2051 }
0x1093   :  { %2317 = vmatmul.msk.bf16.vlgmr.msrb.gmra.mxu1 %vm126_vm10, %v2052_v58 }
0x10f0   :  { %v1952_v32 = vpop.f32.mrf.mxu0 }
0x10f1   :  { %v1967_v28 = vadd.f32 %v1966_v4, %v1952_v32 }
0x10f3   :  { %v1971_v49 = vadd.f32 %v3600_v61, %v1967_v28 }
0x10f5   :  { %2578 = vtanh.f32 %v1971_v49  ;;  %v2315_v27 = vmul.f32 -1.442695, %v1971_v49 }
0x10f8   :  { %v1954_v30 = vpop.f32.mrf.mxu0 }
0x10f9   :  { %v1969_v43 = vadd.f32 %v1968_v1, %v1954_v30 }
0x10fb   :  { %v2579_v45 = vpop.eup %2578  ;;  %v1972_v42 = vadd.f32 %v3600_v61, %v1969_v43 }
0x10fc   :  { %2017 = vrot.lane.b32.xlu1 %v2579_v45, %s2759_s9 }
0x10fd   :  { %2580 = vtanh.f32 %v1972_v42  ;;  %v2316_v36 = vmul.f32 -1.442695, %v1972_v42 }
0x1103   :  { %v2581_v47 = vpop.eup %2580 }
0x1104   :  { %2019 = vrot.lane.b32.xlu2 %v2581_v47, %s2759_s9 }
0x1110   :  { %v2065_v5 = vpop.f32.mrf.mxu1 }
0x1111   :  { %v2080_v8 = vadd.f32 %v2079_v54, %v2065_v5 }
0x1113   :  { %v2084_v55 = vadd.f32 %v3607_v0, %v2080_v8 }
0x1115   :  { %2582 = vtanh.f32 %v2084_v55  ;;  %v2319_v13 = vmul.f32 -1.442695, %v2084_v55 }
0x1118   :  { %v2067_v51 = vpop.f32.mrf.mxu1 }
0x1119   :  { %v2082_v62 = vadd.f32 %v2081_v34, %v2067_v51 }
0x111b   :  { %v2583_v14 = vpop.eup %2582  ;;  %v2085_v23 = vadd.f32 %v3607_v0, %v2082_v62 }
0x111c   :  { %2130 = vrot.lane.b32.xlu0 %v2583_v14, %s2759_s9 }
0x111d   :  { %2584 = vtanh.f32 %v2085_v23  ;;  %v2320_v32 = vmul.f32 -1.442695, %v2085_v23 }
0x111e   :  { %2586 = vpow2.f32 %v2316_v36 }
0x1123   :  { %v2585_v61 = vpop.eup %2584 }
0x1124   :  { %2132 = vrot.lane.b32.xlu1 %v2585_v61, %s2759_s9  ;;  %v2587_v25 = vpop.eup %2586 }
0x1125   :  { %v1980_v33 = vadd.f32 1.0, %v2587_v25 }
0x1127   :  { %2588 = vrcp.f32 %v1980_v33  ;;  %v2007_v6 = vand.u32 2147483648, %v1980_v33  ;;  %vm2001_vm7 = vweird.f32 %v1980_v33  ;;  %v2005_v44 = vand.u32 2147483647, %v1980_v33 }
0x1128   :  { %2590 = vpow2.f32 %v2315_v27 }
0x1129   :  { %v2008_v35 = vor.u32 1.1754944e-38, %v2007_v6  ;;  %vm2006_vm9 = vcmp.eq.f32.partialorder %v2005_v44, 8.507059e+37 }
0x112d   :  { %v2589_v59 = vpop.eup %2588 }
0x112e   :  { %v2591_v52 = vpop.eup %2590  ;;  %v1997_v17 = vmul.f32 %v2589_v59, %v1980_v33  ;;  %vm2002_vm11 = vweird.f32 %v2589_v59 }
0x112f   :  { %v1979_v26 = vadd.f32 1.0, %v2591_v52  ;;  %vm2003_vm8 = vmor %vm2001_vm7, %vm2002_vm11  ;;  %vm3791_vm7 = vcmp.eq.s32.totalorder %v3102_v21, 1 }
0x1130   :  { %v1998_v46 = vsub.f32 1.0, %v1997_v17 }
0x1131   :  { %2592 = vrcp.f32 %v1979_v26  ;;  %v1992_v4 = vand.u32 2147483648, %v1979_v26  ;;  %vm1986_vm4 = vweird.f32 %v1979_v26  ;;  %v1990_v28 = vand.u32 2147483647, %v1979_v26 }
0x1132   :  { %v1999_v0 = vmul.f32 %v2589_v59, %v1998_v46  ;;  %2594 = vpow2.f32 %v2319_v13 }
0x1133   :  { %v1993_v30 = vor.u32 1.1754944e-38, %v1992_v4  ;;  %2596 = vpow2.f32 %v2320_v32  ;;  %vm1991_vm6 = vcmp.eq.f32.partialorder %v1990_v28, 8.507059e+37 }
0x1134   :  { %v2000_v31 = vadd.f32 %v2589_v59, %v1999_v0 }
0x1136   :  { %v2004_v60 = vsel %vm2003_vm8, %v2589_v59, %v2000_v31  ;;  %vm3792_vm8 = vcmp.eq.s32.totalorder %v3099_v40, 1 }
0x1137   :  { %v2593_v12 = vpop.eup %2592  ;;  %v3709_v39 = vsel %vm2006_vm9, %v2008_v35, %v2004_v60  ;;  %v1819_v35 = vsel %vm3791_vm7, %v3633_v24, %v3629_v29  ;;  %v1820_v13 = vsel %vm3792_vm8, %v3667_v3, %v3664_v16  ;;  %vm3793_vm9 = vcmp.eq.s32.totalorder %v3082_v9, 1 }
0x1138   :  { %v1982_v57 = vmul.f32 %v2593_v12, %v1979_v26  ;;  %vm1987_vm12 = vweird.f32 %v2593_v12  ;;  %v2595_v49 = vpop.eup %2594  ;;  %v1935_v29 = vsel %vm3793_vm9, %v3655_v2, %v3651_v20 }
0x1139   :  { %vm1988_vm0 = vmor %vm1986_vm4, %vm1987_vm12  ;;  %v2092_v43 = vadd.f32 1.0, %v2595_v49  ;;  %v2597_v54 = vpop.eup %2596  ;;  %vm3794_vm12 = vcmp.eq.s32.totalorder %v3077_v56, 1  ;;  %vm3795_vm4 = vcmp.eq.s32.totalorder %v2971_v63, 1 }
0x113a   :  { %v1983_v38 = vsub.f32 1.0, %v1982_v57  ;;  %v2093_v5 = vadd.f32 1.0, %v2597_v54  ;;  %v1934_v3 = vsel %vm3794_vm12, %v3643_v50, %v3640_v19 }
0x113b   :  { %2598 = vrcp.f32 %v2092_v43  ;;  %v2105_v36 = vand.u32 2147483648, %v2092_v43  ;;  %vm2099_vm13 = vweird.f32 %v2092_v43  ;;  %v2103_v25 = vand.u32 2147483647, %v2092_v43 }
0x113c   :  { %v1984_v48 = vmul.f32 %v2593_v12, %v1983_v38  ;;  %2600 = vrcp.f32 %v2093_v5  ;;  %v2120_v0 = vand.u32 2147483648, %v2093_v5  ;;  %vm2114_vm14 = vweird.f32 %v2093_v5 }
0x113d   :  { %v2106_v59 = vor.u32 1.1754944e-38, %v2105_v36  ;;  %vm2104_vm15 = vcmp.eq.f32.partialorder %v2103_v25, 8.507059e+37  ;;  %v2118_v31 = vand.u32 2147483647, %v2093_v5 }
0x113e   :  { %v1985_v58 = vadd.f32 %v2593_v12, %v1984_v48  ;;  %v2121_v6 = vor.u32 1.1754944e-38, %v2120_v0  ;;  %v2014_v48 = vmul.f32 %v3709_v39, %v1820_v13 }
0x113f   :  { %vm2119_vm11 = vcmp.eq.f32.partialorder %v2118_v31, 8.507059e+37 }
0x1140   :  { %v1989_v1 = vsel %vm1988_vm0, %v2593_v12, %v1985_v58  ;;  %vm3796_vm0 = vcmp.eq.s32.totalorder %v2975_v18, 1 }
0x1141   :  { %v3713_v42 = vsel %vm1991_vm6, %v1993_v30, %v1989_v1  ;;  %v2599_v8 = vpop.eup %2598  ;;  %vm3797_vm6 = vcmp.eq.s32.totalorder %v2952_v7, 1 }
0x1142   :  { %v2095_v55 = vmul.f32 %v2599_v8, %v2092_v43  ;;  %v2601_v51 = vpop.eup %2600  ;;  %vm2100_vm5 = vweird.f32 %v2599_v8 }
0x1143   :  { %v2110_v14 = vmul.f32 %v2601_v51, %v2093_v5  ;;  %vm2101_vm3 = vmor %vm2099_vm13, %vm2100_vm5  ;;  %vm2115_vm2 = vweird.f32 %v2601_v51  ;;  %vm3798_vm5 = vcmp.eq.s32.totalorder %v2957_v11, 1  ;;  %vm3799_vm13 = vcmask 261120  }
0x1144   :  { %v2096_v34 = vsub.f32 1.0, %v2095_v55  ;;  %vm2116_vm1 = vmor %vm2114_vm14, %vm2115_vm2 }
0x1145   :  { %v2111_v61 = vsub.f32 1.0, %v2110_v14 }
0x1146   :  { %v2097_v62 = vmul.f32 %v2599_v8, %v2096_v34 }
0x1147   :  { %v2112_v27 = vmul.f32 %v2601_v51, %v2111_v61 }
0x1148   :  { %v2098_v23 = vadd.f32 %v2599_v8, %v2097_v62 }
0x1149   :  { %v2113_v46 = vadd.f32 %v2601_v51, %v2112_v27 }
0x114a   :  { %v2102_v33 = vsel %vm2101_vm3, %v2599_v8, %v2098_v23  ;;  %vm3800_vm3 = vmmov %vm3799_vm13 }
0x114b   :  { %v2107_v17 = vsel %vm2104_vm15, %v2106_v59, %v2102_v33  ;;  %v2117_v12 = vsel %vm2116_vm1, %v2601_v51, %v2113_v46 }
0x114c   :  { %v2122_v44 = vsel %vm2119_vm11, %v2121_v6, %v2117_v12  ;;  %v2126_v49 = vmul.f32 %v2107_v17, %v1934_v3 }
0x114d   :  { %v2127_v24 = vmul.f32 %v2122_v44, %v1935_v29 }
0x115e   :  { %v2020_v10 = vpop.permute.xlu2 %2019 }
0x115f   :  { %v2024_v15 = vmul.f32 %v2020_v10, %v3709_v39  ;;  %v2013_v10 = vmul.f32 %v3713_v42, %v1819_v35 }
0x1161   :  { %2029 = vrot.lane.b32.xlu0 %v2024_v15, %s2760_s10 }
0x116e   :  { %v2018_v45 = vpop.permute.xlu1 %2017 }
0x116f   :  { %v2023_v47 = vmul.f32 %v2018_v45, %v3713_v42 }
0x1171   :  { %2027 = vrot.lane.b32.xlu2 %v2023_v47, %s2760_s10 }
0x118e   :  { %v2131_v52 = vpop.permute.xlu0 %2130 }
0x118f   :  { %v2136_v26 = vmul.f32 %v2131_v52, %v2107_v17 }
0x1191   :  { %2140 = vrot.lane.b32.xlu1 %v2136_v26, %s2760_s10 }
0x1196   :  { %v2133_v60 = vpop.permute.xlu1 %2132 }
0x1197   :  { %v2137_v57 = vmul.f32 %v2133_v60, %v2122_v44 }
0x1199   :  { %2142 = vrot.lane.b32.xlu2 %v2137_v57, %s2760_s10 }
0x11cb   :  { %v2028_v15 = vpop.permute.xlu2 %2027 }
0x11cc   :  { %v2033_v38 = vadd.f32 %v2028_v15, %v2013_v10 }
0x11ce   :  { %2602 = vtanh.f32 %v2033_v38 }
0x11d3   :  { %v2030_v58 = vpop.permute.xlu0 %2029 }
0x11d4   :  { %v2603_v4 = vpop.eup %2602  ;;  %v2034_v32 = vadd.f32 %v2030_v58, %v2014_v48 }
0x11d5   :  { %2039 = vrot.lane.b32.xlu0 %v2603_v4, %s2761_s11 }
0x11d6   :  { %2604 = vtanh.f32 %v2034_v32 }
0x11dc   :  { %v2605_v21 = vpop.eup %2604 }
0x11dd   :  { %2041 = vrot.lane.b32.xlu1 %v2605_v21, %s2761_s11 }
0x11f3   :  { %v2143_v28 = vpop.permute.xlu2 %2142 }
0x11f4   :  { %v2147_v40 = vadd.f32 %v2143_v28, %v2127_v24 }
0x11f6   :  { %2606 = vtanh.f32 %v2147_v40 }
0x11fc   :  { %v2607_v16 = vpop.eup %2606 }
0x11fd   :  { %2154 = vrot.lane.b32.xlu0 %v2607_v16, %s2761_s11 }
0x1203   :  { %v2141_v1 = vpop.permute.xlu1 %2140 }
0x1204   :  { %v2146_v30 = vadd.f32 %v2141_v1, %v2126_v49 }
0x1206   :  { %2608 = vtanh.f32 %v2146_v30 }
0x120c   :  { %v2609_v43 = vpop.eup %2608 }
0x120d   :  { %2152 = vrot.lane.b32.xlu2 %v2609_v43, %s2761_s11 }
0x1247   :  { %v2040_v9 = vpop.permute.xlu0 %2039 }
0x1248   :  { %v2045_v20 = vmul.f32 %v2040_v9, %v3713_v42 }
0x124a   :  { %v2047_v2 = vsel %vm3795_vm4, %v2045_v20, %v3675_v41 }
0x124b   :  { %2164 = vrot.lane.b32.xlu1 %v2047_v2, %s2762_s16 }
0x124f   :  { %v2042_v45 = vpop.permute.xlu1 %2041 }
0x1250   :  { %v2046_v56 = vmul.f32 %v2042_v45, %v3709_v39 }
0x1252   :  { %v2048_v19 = vsel %vm3796_vm0, %v2046_v56, %v3680_v22 }
0x1253   :  { %2166 = vrot.lane.b32.xlu2 %v2048_v19, %s2762_s16 }
0x1267   :  { %v2153_v50 = vpop.permute.xlu2 %2152 }
0x1268   :  { %v2158_v47 = vmul.f32 %v2153_v50, %v2107_v17 }
0x126a   :  { %v2160_v42 = vsel %vm3797_vm6, %v2158_v47, %v3689_v37 }
0x126b   :  { %2172 = vrot.lane.b32.xlu0 %v2160_v42, %s2759_s9 }
0x126f   :  { %v2155_v63 = vpop.permute.xlu0 %2154 }
0x1270   :  { %v2159_v41 = vmul.f32 %v2155_v63, %v2122_v44 }
0x1272   :  { %v2161_v39 = vsel %vm3798_vm5, %v2159_v41, %v3694_v53 }
0x1273   :  { %2174 = vrot.lane.b32.xlu1 %v2161_v39, %s2759_s9  ;;  %s2765_s9 = smov 8  }
0x12ad   :  { %v2167_v7 = vpop.permute.xlu2 %2166 }
0x12bd   :  { %v2165_v18 = vpop.permute.xlu1 %2164 }
0x12dd   :  { %v2173_v22 = vpop.permute.xlu0 %2172 }
0x12de   :  { %v2178_v54 = vsel %vm126_vm10, %v2165_v18, %v2173_v22 }
0x12df   :  { %2180 = vst.msk [vmem:[#allocation10] sm:$0xff] %vm3799_vm13, %v2178_v54 }
0x12e5   :  { %v2175_v37 = vpop.permute.xlu1 %2174 }
0x12e6   :  { %v2179_v11 = vsel %vm126_vm10, %v2167_v7, %v2175_v37 }
0x12e7   :  { %2181 = vst.msk [vmem:[#allocation10 + $0x8] sm:$0xff] %vm3800_vm3, %v2179_v11 }
0x12e8   :  { %2194 = dma.vmem_to_hbm [thread:$0]  %s2187_s7, 256, %s2189_s29, [#allocation4], %s2764_s30, %s2764_s30, %s2765_s9  }
0x12e9   :  { %2750 = dma.done.wait [#allocation4], 256  }
0x12ea   :  { %2751 = vsyncadd [#allocation4], 4294967040 }
0x12eb   :  { %2199 = vsyncpa [#allocation3], 1 }
0x12ec   :  { %2200 = vsyncpa [#allocation6], 1 }
0x12ed   :  { %2201 = vsyncpa [#allocation9], 1 }
0x12ee   :  { %2202 = vsyncpa [#allocation4], 1 }

</bundles_post_ra>
